<compile_context>
chip_gen: v7x
topology: tpu7x:2x2x1
jax: 0.10.0
libtpu: 0.0.40
codegen_flags: <defaults>
</compile_context>

<pallas_src>
import numpy as np
import jax
import jax.numpy as jnp
from jax.experimental import pallas as pl
from jax.experimental.pallas import tpu as pltpu


# Geometry for the 32x32 single-channel input the PyTorch Net requires (16*6*6 = fc1 in).
_IN_W = 32       # input row stride on the flattened grid
_C1_LEN = 958    # conv1 positions computed (valid outputs live at h,w <= 29)
_M1_LEN = 925    # after the 2x2 window max (uses p, p+1, p+32, p+33)
_P1_W = 15       # pooled1 width (15x15 -> 225 lanes)
_C2_LEN = 193    # conv2 positions computed on the 15-wide grid
_M2_LEN = 177    # after the 2x2 window max (uses p, p+1, p+15, p+16)


def _net_kernel(x_ref, w1_ref, b1_ref, w2_ref, b2_ref, s1_ref, s2_ref,
                fw1_ref, fb1_ref, fw2_ref, fb2_ref, fw3_ref, fb3_ref, o_ref):
    f32 = jnp.float32
    x = x_ref[0]                                        # (1, 1024), one sample, h*32+w

    # ---- conv1: 1->6, 3x3 via 9 tap broadcasts (in-VMEM "im2col"), bias + ReLU
    w1 = w1_ref[...]                                    # (6, 9), taps ordered kh*3+kw
    acc1 = jnp.zeros((6, _C1_LEN), f32)
    for kh in range(3):
        for kw in range(3):
            t = kh * 3 + kw
            s = kh * _IN_W + kw
            acc1 = acc1 + w1[:, t:t + 1] * x[:, s:s + _C1_LEN]
    c1 = jnp.maximum(acc1 + b1_ref[...], 0.0)           # (6, 958)

    # ---- maxpool1 (2x2 / stride 2): max of 4 shifts, then exact 0/1 selection matmul
    mA = jnp.maximum(c1[:, 0:_C1_LEN - 1], c1[:, 1:_C1_LEN])
    m1 = jnp.maximum(mA[:, 0:_M1_LEN], mA[:, _IN_W:_IN_W + _M1_LEN])      # (6, 925)
    p1 = jnp.dot(m1, s1_ref[...], preferred_element_type=f32)            # (6, 225)

    # ---- conv2: 6->16, 3x3 as a sum of 9 per-tap (16,6)@(6,193) matmuls, bias + ReLU
    acc2 = jnp.zeros((16, _C2_LEN), f32)
    for kh in range(3):
        for kw in range(3):
            t = kh * 3 + kw
            s = kh * _P1_W + kw
            acc2 = acc2 + jnp.dot(w2_ref[t], p1[:, s:s + _C2_LEN],
                                  preferred_element_type=f32)
    c2 = jnp.maximum(acc2 + b2_ref[...], 0.0)           # (16, 193)

    # ---- maxpool2
    mB = jnp.maximum(c2[:, 0:_C2_LEN - 1], c2[:, 1:_C2_LEN])
    m2 = jnp.maximum(mB[:, 0:_M2_LEN], mB[:, _P1_W:_P1_W + _M2_LEN])      # (16, 177)
    p2 = jnp.dot(m2, s2_ref[...], preferred_element_type=f32)            # (16, 36)

    # ---- fc1 (576->120, padded to 128): contract (channel, 6*6) per channel.
    # Matches torch's x.view(-1, 16*6*6) on NCHW: flat index = c*36 + h*6 + w.
    h1 = fb1_ref[...]                                   # (1, 128)
    for c in range(16):
        h1 = h1 + jnp.dot(p2[c:c + 1, :], fw1_ref[c], preferred_element_type=f32)
    h1 = jnp.maximum(h1, 0.0)

    # ---- fc2 (120->84) + ReLU and fc3 (84->10), both zero-padded to 128x128
    h2 = jnp.maximum(jnp.dot(h1, fw2_ref[...], preferred_element_type=f32)
                     + fb2_ref[...], 0.0)               # (1, 128)
    out = jnp.dot(h2, fw3_ref[...], preferred_element_type=f32) + fb3_ref[...]
    o_ref[0] = out.astype(o_ref.dtype)                  # (1, 128); real logits in [:10]


def _pool_select_matrix(src_len, row_stride, hp, wp):
    """S[p, q] = 1 where p = 2*i*row_stride + 2*j and q = i*wp + j (exact picks)."""
    s = np.zeros((src_len, hp * wp), np.float32)
    for i in range(hp):
        for j in range(wp):
            s[2 * i * row_stride + 2 * j, i * wp + j] = 1.0
    return jnp.asarray(s)


def prepare_params(params):
    """One-time weight relayout (hoisted out of the forward, per review)."""
    (w1, b1), (w2, b2), (fw1, fb1), (fw2, fb2), (fw3, fb3) = params
    w1f = w1.reshape(6, 9).astype(jnp.float32)                          # (cout, kh*3+kw)
    b1c = b1.reshape(6, 1).astype(jnp.float32)
    w2t = jnp.transpose(w2, (2, 3, 0, 1)).reshape(9, 16, 6).astype(jnp.float32)
    b2c = b2.reshape(16, 1).astype(jnp.float32)
    # fc1: rows of fw1.T grouped per input channel (c, 36, 120), zero-pad 120 -> 128.
    fw1s = jnp.pad(fw1.T.reshape(16, 36, 120), ((0, 0), (0, 0), (0, 8)))
    fb1p = jnp.pad(fb1, (0, 8)).reshape(1, 128)
    fw2p = jnp.pad(fw2.T, ((0, 8), (0, 44)))                            # (128, 128)
    fb2p = jnp.pad(fb2, (0, 44)).reshape(1, 128)
    fw3p = jnp.pad(fw3.T, ((0, 44), (0, 118)))                          # (128, 128)
    fb3p = jnp.pad(fb3, (0, 118)).reshape(1, 128)
    s1 = _pool_select_matrix(_M1_LEN, _IN_W, 15, 15)                    # (925, 225)
    s2 = _pool_select_matrix(_M2_LEN, _P1_W, 6, 6)                      # (177, 36)
    return (w1f, b1c, w2t, b2c, s1, s2, fw1s, fb1p, fw2p, fb2p, fw3p, fb3p)


@jax.jit
def net_forward(x_nchw, prep):
    n = x_nchw.shape[0]
    x3 = x_nchw.astype(jnp.float32).reshape(n, 1, 32 * 32)   # (N, 1, H*W), lane-dense

    def _full(a):
        nd = a.ndim
        return pl.BlockSpec(a.shape, lambda i, _nd=nd: (0,) * _nd)   # VMEM-resident

    out = pl.pallas_call(
        _net_kernel,
        out_shape=jax.ShapeDtypeStruct((n, 1, 128), jnp.float32),
        grid=(n,),
        in_specs=[pl.BlockSpec((1, 1, 32 * 32), lambda i: (i, 0, 0))]
                 + [_full(a) for a in prep],
        out_specs=pl.BlockSpec((1, 1, 128), lambda i: (i, 0, 0)),
        compiler_params=pltpu.CompilerParams(
            dimension_semantics=("parallel",)),       # lets v7x split batch over 2 TCs
    )(x3, *prep)
    return out[:, 0, :10]                              # drop the zero-padded logits


# ---------------------------------------------------------------------------
# Pure-JAX reference (sanity check only)
# ---------------------------------------------------------------------------
def net_reference(x, params):
    (w1, b1), (w2, b2), (fw1, fb1), (fw2, fb2), (fw3, fb3) = params
    hi = jax.lax.Precision.HIGHEST

    def conv(x, w, b):
        y = jax.lax.conv_general_dilated(
            x, w, (1, 1), 'VALID',
            dimension_numbers=('NCHW', 'OIHW', 'NCHW'), precision=hi)
        return y + b[None, :, None, None]

    def pool(x):
        return jax.lax.reduce_window(x, -jnp.inf, jax.lax.max,
                                     (1, 1, 2, 2), (1, 1, 2, 2), 'VALID')

    y = pool(jax.nn.relu(conv(x, w1, b1)))
    y = pool(jax.nn.relu(conv(y, w2, b2)))
    y = y.reshape(y.shape[0], -1)
    y = jax.nn.relu(jnp.dot(y, fw1.T, precision=hi) + fb1)
    y = jax.nn.relu(jnp.dot(y, fw2.T, precision=hi) + fb2)
    return jnp.dot(y, fw3.T, precision=hi) + fb3


def init_params(key):
    ks = jax.random.split(key, 10)

    def u(k, shape, fan_in):
        bound = 1.0 / (fan_in ** 0.5)
        return jax.random.uniform(k, shape, jnp.float32, -bound, bound)

    w1 = u(ks[0], (6, 1, 3, 3), 9);       b1 = u(ks[1], (6,), 9)
    w2 = u(ks[2], (16, 6, 3, 3), 54);     b2 = u(ks[3], (16,), 54)
    fw1 = u(ks[4], (120, 576), 576);      fb1 = u(ks[5], (120,), 576)
    fw2 = u(ks[6], (84, 120), 120);       fb2 = u(ks[7], (84,), 120)
    fw3 = u(ks[8], (10, 84), 84);         fb3 = u(ks[9], (10,), 84)
    return ((w1, b1), (w2, b2), (fw1, fb1), (fw2, fb2), (fw3, fb3))


if __name__ == "__main__":
    key = jax.random.PRNGKey(0)
    pkey, xkey = jax.random.split(key)
    params = init_params(pkey)
    prep = prepare_params(params)          # hoisted: done once, not per forward
    # PyTorch Net requires 32x32 single-channel input so that 16*6*6 matches fc1.
    x = jax.random.normal(xkey, (2, 1, 32, 32), jnp.float32)   # NCHW

    out = jax.block_until_ready(net_forward(x, prep))
    assert out.shape == (2, 10)

    ref = jax.block_until_ready(net_reference(x, params))
    assert jnp.allclose(out, ref, rtol=5e-2, atol=5e-2), (
        float(jnp.max(jnp.abs(out - ref))))

    print("KERNEL_OK")
</pallas_src>

<mosaic_0001>
module attributes {stable_mosaic.version = 11 : i64} {
  func.func @_net_kernel(%arg0: i32, %arg1: memref<1x1x1024xf32, #tpu.memory_space<vmem>>, %arg2: memref<6x9xf32, #tpu.memory_space<vmem>>, %arg3: memref<6x1xf32, #tpu.memory_space<vmem>>, %arg4: memref<9x16x6xf32, #tpu.memory_space<vmem>>, %arg5: memref<16x1xf32, #tpu.memory_space<vmem>>, %arg6: memref<925x225xf32, #tpu.memory_space<vmem>>, %arg7: memref<177x36xf32, #tpu.memory_space<vmem>>, %arg8: memref<16x36x128xf32, #tpu.memory_space<vmem>>, %arg9: memref<1x128xf32, #tpu.memory_space<vmem>>, %arg10: memref<128x128xf32, #tpu.memory_space<vmem>>, %arg11: memref<1x128xf32, #tpu.memory_space<vmem>>, %arg12: memref<128x128xf32, #tpu.memory_space<vmem>>, %arg13: memref<1x128xf32, #tpu.memory_space<vmem>>, %arg14: memref<1x1x128xf32, #tpu.memory_space<vmem>>) attributes {dimension_semantics = [#tpu.dimension_semantics<parallel>], iteration_bounds = array<i64: 2>, scalar_prefetch = 0 : i64, scratch_operands = 0 : i64, tpu.core_type = #tpu.core_type<tc>, window_params = [{transform_indices = @transform_0, window_bounds = array<i64: 1, 1, 1024>}, {pipeline_mode = #tpu.pipeline_mode<synchronous>, transform_indices = @transform_1, window_bounds = array<i64: 6, 9>}, {pipeline_mode = #tpu.pipeline_mode<synchronous>, transform_indices = @transform_2, window_bounds = array<i64: 6, 1>}, {pipeline_mode = #tpu.pipeline_mode<synchronous>, transform_indices = @transform_3, window_bounds = array<i64: 9, 16, 6>}, {pipeline_mode = #tpu.pipeline_mode<synchronous>, transform_indices = @transform_4, window_bounds = array<i64: 16, 1>}, {pipeline_mode = #tpu.pipeline_mode<synchronous>, transform_indices = @transform_5, window_bounds = array<i64: 925, 225>}, {pipeline_mode = #tpu.pipeline_mode<synchronous>, transform_indices = @transform_6, window_bounds = array<i64: 177, 36>}, {pipeline_mode = #tpu.pipeline_mode<synchronous>, transform_indices = @transform_7, window_bounds = array<i64: 16, 36, 128>}, {pipeline_mode = #tpu.pipeline_mode<synchronous>, transform_indices = @transform_8, window_bounds = array<i64: 1, 128>}, {pipeline_mode = #tpu.pipeline_mode<synchronous>, transform_indices = @transform_9, window_bounds = array<i64: 128, 128>}, {pipeline_mode = #tpu.pipeline_mode<synchronous>, transform_indices = @transform_10, window_bounds = array<i64: 1, 128>}, {pipeline_mode = #tpu.pipeline_mode<synchronous>, transform_indices = @transform_11, window_bounds = array<i64: 128, 128>}, {pipeline_mode = #tpu.pipeline_mode<synchronous>, transform_indices = @transform_12, window_bounds = array<i64: 1, 128>}, {transform_indices = @transform_13, window_bounds = array<i64: 1, 1, 128>}]} {
    %c0 = arith.constant 0 : index
    %c0_0 = arith.constant 0 : index
    %c0_1 = arith.constant 0 : index
    %0 = vector.load %arg1[%c0, %c0_0, %c0_1] : memref<1x1x1024xf32, #tpu.memory_space<vmem>>, vector<1x1x1024xf32>
    %1 = vector.shape_cast %0 : vector<1x1x1024xf32> to vector<1x1024xf32>
    %c0_2 = arith.constant 0 : index
    %c0_3 = arith.constant 0 : index
    %2 = vector.load %arg2[%c0_2, %c0_3] : memref<6x9xf32, #tpu.memory_space<vmem>>, vector<6x9xf32>
    %cst = arith.constant 0.000000e+00 : f32
    %3 = vector.broadcast %cst : f32 to vector<6x958xf32>
    %4 = vector.extract_strided_slice %2 {offsets = [0, 0], sizes = [6, 1], strides = [1, 1]} : vector<6x9xf32> to vector<6x1xf32>
    %5 = vector.extract_strided_slice %1 {offsets = [0, 0], sizes = [1, 958], strides = [1, 1]} : vector<1x1024xf32> to vector<1x958xf32>
    %6 = vector.broadcast %4 : vector<6x1xf32> to vector<6x958xf32>
    %7 = vector.broadcast %5 : vector<1x958xf32> to vector<6x958xf32>
    %8 = arith.mulf %6, %7 : vector<6x958xf32>
    %9 = arith.addf %3, %8 : vector<6x958xf32>
    %10 = vector.extract_strided_slice %2 {offsets = [0, 1], sizes = [6, 1], strides = [1, 1]} : vector<6x9xf32> to vector<6x1xf32>
    %11 = vector.extract_strided_slice %1 {offsets = [0, 1], sizes = [1, 958], strides = [1, 1]} : vector<1x1024xf32> to vector<1x958xf32>
    %12 = vector.broadcast %10 : vector<6x1xf32> to vector<6x958xf32>
    %13 = vector.broadcast %11 : vector<1x958xf32> to vector<6x958xf32>
    %14 = arith.mulf %12, %13 : vector<6x958xf32>
    %15 = arith.addf %9, %14 : vector<6x958xf32>
    %16 = vector.extract_strided_slice %2 {offsets = [0, 2], sizes = [6, 1], strides = [1, 1]} : vector<6x9xf32> to vector<6x1xf32>
    %17 = vector.extract_strided_slice %1 {offsets = [0, 2], sizes = [1, 958], strides = [1, 1]} : vector<1x1024xf32> to vector<1x958xf32>
    %18 = vector.broadcast %16 : vector<6x1xf32> to vector<6x958xf32>
    %19 = vector.broadcast %17 : vector<1x958xf32> to vector<6x958xf32>
    %20 = arith.mulf %18, %19 : vector<6x958xf32>
    %21 = arith.addf %15, %20 : vector<6x958xf32>
    %22 = vector.extract_strided_slice %2 {offsets = [0, 3], sizes = [6, 1], strides = [1, 1]} : vector<6x9xf32> to vector<6x1xf32>
    %23 = vector.extract_strided_slice %1 {offsets = [0, 32], sizes = [1, 958], strides = [1, 1]} : vector<1x1024xf32> to vector<1x958xf32>
    %24 = vector.broadcast %22 : vector<6x1xf32> to vector<6x958xf32>
    %25 = vector.broadcast %23 : vector<1x958xf32> to vector<6x958xf32>
    %26 = arith.mulf %24, %25 : vector<6x958xf32>
    %27 = arith.addf %21, %26 : vector<6x958xf32>
    %28 = vector.extract_strided_slice %2 {offsets = [0, 4], sizes = [6, 1], strides = [1, 1]} : vector<6x9xf32> to vector<6x1xf32>
    %29 = vector.extract_strided_slice %1 {offsets = [0, 33], sizes = [1, 958], strides = [1, 1]} : vector<1x1024xf32> to vector<1x958xf32>
    %30 = vector.broadcast %28 : vector<6x1xf32> to vector<6x958xf32>
    %31 = vector.broadcast %29 : vector<1x958xf32> to vector<6x958xf32>
    %32 = arith.mulf %30, %31 : vector<6x958xf32>
    %33 = arith.addf %27, %32 : vector<6x958xf32>
    %34 = vector.extract_strided_slice %2 {offsets = [0, 5], sizes = [6, 1], strides = [1, 1]} : vector<6x9xf32> to vector<6x1xf32>
    %35 = vector.extract_strided_slice %1 {offsets = [0, 34], sizes = [1, 958], strides = [1, 1]} : vector<1x1024xf32> to vector<1x958xf32>
    %36 = vector.broadcast %34 : vector<6x1xf32> to vector<6x958xf32>
    %37 = vector.broadcast %35 : vector<1x958xf32> to vector<6x958xf32>
    %38 = arith.mulf %36, %37 : vector<6x958xf32>
    %39 = arith.addf %33, %38 : vector<6x958xf32>
    %40 = vector.extract_strided_slice %2 {offsets = [0, 6], sizes = [6, 1], strides = [1, 1]} : vector<6x9xf32> to vector<6x1xf32>
    %41 = vector.extract_strided_slice %1 {offsets = [0, 64], sizes = [1, 958], strides = [1, 1]} : vector<1x1024xf32> to vector<1x958xf32>
    %42 = vector.broadcast %40 : vector<6x1xf32> to vector<6x958xf32>
    %43 = vector.broadcast %41 : vector<1x958xf32> to vector<6x958xf32>
    %44 = arith.mulf %42, %43 : vector<6x958xf32>
    %45 = arith.addf %39, %44 : vector<6x958xf32>
    %46 = vector.extract_strided_slice %2 {offsets = [0, 7], sizes = [6, 1], strides = [1, 1]} : vector<6x9xf32> to vector<6x1xf32>
    %47 = vector.extract_strided_slice %1 {offsets = [0, 65], sizes = [1, 958], strides = [1, 1]} : vector<1x1024xf32> to vector<1x958xf32>
    %48 = vector.broadcast %46 : vector<6x1xf32> to vector<6x958xf32>
    %49 = vector.broadcast %47 : vector<1x958xf32> to vector<6x958xf32>
    %50 = arith.mulf %48, %49 : vector<6x958xf32>
    %51 = arith.addf %45, %50 : vector<6x958xf32>
    %52 = vector.extract_strided_slice %2 {offsets = [0, 8], sizes = [6, 1], strides = [1, 1]} : vector<6x9xf32> to vector<6x1xf32>
    %53 = vector.extract_strided_slice %1 {offsets = [0, 66], sizes = [1, 958], strides = [1, 1]} : vector<1x1024xf32> to vector<1x958xf32>
    %54 = vector.broadcast %52 : vector<6x1xf32> to vector<6x958xf32>
    %55 = vector.broadcast %53 : vector<1x958xf32> to vector<6x958xf32>
    %56 = arith.mulf %54, %55 : vector<6x958xf32>
    %57 = arith.addf %51, %56 : vector<6x958xf32>
    %c0_4 = arith.constant 0 : index
    %c0_5 = arith.constant 0 : index
    %58 = vector.load %arg3[%c0_4, %c0_5] : memref<6x1xf32, #tpu.memory_space<vmem>>, vector<6x1xf32>
    %59 = vector.broadcast %58 : vector<6x1xf32> to vector<6x958xf32>
    %60 = arith.addf %57, %59 : vector<6x958xf32>
    %cst_6 = arith.constant 0.000000e+00 : f32
    %61 = vector.broadcast %cst_6 : f32 to vector<6x958xf32>
    %62 = arith.maximumf %60, %61 : vector<6x958xf32>
    %63 = vector.extract_strided_slice %62 {offsets = [0, 0], sizes = [6, 957], strides = [1, 1]} : vector<6x958xf32> to vector<6x957xf32>
    %64 = vector.extract_strided_slice %62 {offsets = [0, 1], sizes = [6, 957], strides = [1, 1]} : vector<6x958xf32> to vector<6x957xf32>
    %65 = arith.maximumf %63, %64 : vector<6x957xf32>
    %66 = vector.extract_strided_slice %65 {offsets = [0, 0], sizes = [6, 925], strides = [1, 1]} : vector<6x957xf32> to vector<6x925xf32>
    %67 = vector.extract_strided_slice %65 {offsets = [0, 32], sizes = [6, 925], strides = [1, 1]} : vector<6x957xf32> to vector<6x925xf32>
    %68 = arith.maximumf %66, %67 : vector<6x925xf32>
    %c0_7 = arith.constant 0 : index
    %c0_8 = arith.constant 0 : index
    %69 = vector.load %arg6[%c0_7, %c0_8] : memref<925x225xf32, #tpu.memory_space<vmem>>, vector<925x225xf32>
    %cst_9 = arith.constant dense<0.000000e+00> : vector<6x225xf32>
    %70 = tpu.matmul %68, %69, %cst_9 {dimension_numbers = #tpu.dot_dimension_numbers<[1], [0], [0], [1], [0, 0, 1, 1], [], []>} : vector<6x925xf32>, vector<925x225xf32>, vector<6x225xf32> -> vector<6x225xf32>
    %cst_10 = arith.constant 0.000000e+00 : f32
    %71 = vector.broadcast %cst_10 : f32 to vector<16x193xf32>
    %c0_11 = arith.constant 0 : index
    %c0_12 = arith.constant 0 : index
    %c0_13 = arith.constant 0 : index
    %72 = vector.load %arg4[%c0_11, %c0_12, %c0_13] : memref<9x16x6xf32, #tpu.memory_space<vmem>>, vector<1x16x6xf32>
    %73 = vector.shape_cast %72 : vector<1x16x6xf32> to vector<16x6xf32>
    %74 = vector.extract_strided_slice %70 {offsets = [0, 0], sizes = [6, 193], strides = [1, 1]} : vector<6x225xf32> to vector<6x193xf32>
    %cst_14 = arith.constant dense<0.000000e+00> : vector<16x193xf32>
    %75 = tpu.matmul %73, %74, %cst_14 {dimension_numbers = #tpu.dot_dimension_numbers<[1], [0], [0], [1], [0, 0, 1, 1], [], []>} : vector<16x6xf32>, vector<6x193xf32>, vector<16x193xf32> -> vector<16x193xf32>
    %76 = arith.addf %71, %75 : vector<16x193xf32>
    %c1 = arith.constant 1 : index
    %c0_15 = arith.constant 0 : index
    %c0_16 = arith.constant 0 : index
    %77 = vector.load %arg4[%c1, %c0_15, %c0_16] : memref<9x16x6xf32, #tpu.memory_space<vmem>>, vector<1x16x6xf32>
    %78 = vector.shape_cast %77 : vector<1x16x6xf32> to vector<16x6xf32>
    %79 = vector.extract_strided_slice %70 {offsets = [0, 1], sizes = [6, 193], strides = [1, 1]} : vector<6x225xf32> to vector<6x193xf32>
    %cst_17 = arith.constant dense<0.000000e+00> : vector<16x193xf32>
    %80 = tpu.matmul %78, %79, %cst_17 {dimension_numbers = #tpu.dot_dimension_numbers<[1], [0], [0], [1], [0, 0, 1, 1], [], []>} : vector<16x6xf32>, vector<6x193xf32>, vector<16x193xf32> -> vector<16x193xf32>
    %81 = arith.addf %76, %80 : vector<16x193xf32>
    %c2 = arith.constant 2 : index
    %c0_18 = arith.constant 0 : index
    %c0_19 = arith.constant 0 : index
    %82 = vector.load %arg4[%c2, %c0_18, %c0_19] : memref<9x16x6xf32, #tpu.memory_space<vmem>>, vector<1x16x6xf32>
    %83 = vector.shape_cast %82 : vector<1x16x6xf32> to vector<16x6xf32>
    %84 = vector.extract_strided_slice %70 {offsets = [0, 2], sizes = [6, 193], strides = [1, 1]} : vector<6x225xf32> to vector<6x193xf32>
    %cst_20 = arith.constant dense<0.000000e+00> : vector<16x193xf32>
    %85 = tpu.matmul %83, %84, %cst_20 {dimension_numbers = #tpu.dot_dimension_numbers<[1], [0], [0], [1], [0, 0, 1, 1], [], []>} : vector<16x6xf32>, vector<6x193xf32>, vector<16x193xf32> -> vector<16x193xf32>
    %86 = arith.addf %81, %85 : vector<16x193xf32>
    %c3 = arith.constant 3 : index
    %c0_21 = arith.constant 0 : index
    %c0_22 = arith.constant 0 : index
    %87 = vector.load %arg4[%c3, %c0_21, %c0_22] : memref<9x16x6xf32, #tpu.memory_space<vmem>>, vector<1x16x6xf32>
    %88 = vector.shape_cast %87 : vector<1x16x6xf32> to vector<16x6xf32>
    %89 = vector.extract_strided_slice %70 {offsets = [0, 15], sizes = [6, 193], strides = [1, 1]} : vector<6x225xf32> to vector<6x193xf32>
    %cst_23 = arith.constant dense<0.000000e+00> : vector<16x193xf32>
    %90 = tpu.matmul %88, %89, %cst_23 {dimension_numbers = #tpu.dot_dimension_numbers<[1], [0], [0], [1], [0, 0, 1, 1], [], []>} : vector<16x6xf32>, vector<6x193xf32>, vector<16x193xf32> -> vector<16x193xf32>
    %91 = arith.addf %86, %90 : vector<16x193xf32>
    %c4 = arith.constant 4 : index
    %c0_24 = arith.constant 0 : index
    %c0_25 = arith.constant 0 : index
    %92 = vector.load %arg4[%c4, %c0_24, %c0_25] : memref<9x16x6xf32, #tpu.memory_space<vmem>>, vector<1x16x6xf32>
    %93 = vector.shape_cast %92 : vector<1x16x6xf32> to vector<16x6xf32>
    %94 = vector.extract_strided_slice %70 {offsets = [0, 16], sizes = [6, 193], strides = [1, 1]} : vector<6x225xf32> to vector<6x193xf32>
    %cst_26 = arith.constant dense<0.000000e+00> : vector<16x193xf32>
    %95 = tpu.matmul %93, %94, %cst_26 {dimension_numbers = #tpu.dot_dimension_numbers<[1], [0], [0], [1], [0, 0, 1, 1], [], []>} : vector<16x6xf32>, vector<6x193xf32>, vector<16x193xf32> -> vector<16x193xf32>
    %96 = arith.addf %91, %95 : vector<16x193xf32>
    %c5 = arith.constant 5 : index
    %c0_27 = arith.constant 0 : index
    %c0_28 = arith.constant 0 : index
    %97 = vector.load %arg4[%c5, %c0_27, %c0_28] : memref<9x16x6xf32, #tpu.memory_space<vmem>>, vector<1x16x6xf32>
    %98 = vector.shape_cast %97 : vector<1x16x6xf32> to vector<16x6xf32>
    %99 = vector.extract_strided_slice %70 {offsets = [0, 17], sizes = [6, 193], strides = [1, 1]} : vector<6x225xf32> to vector<6x193xf32>
    %cst_29 = arith.constant dense<0.000000e+00> : vector<16x193xf32>
    %100 = tpu.matmul %98, %99, %cst_29 {dimension_numbers = #tpu.dot_dimension_numbers<[1], [0], [0], [1], [0, 0, 1, 1], [], []>} : vector<16x6xf32>, vector<6x193xf32>, vector<16x193xf32> -> vector<16x193xf32>
    %101 = arith.addf %96, %100 : vector<16x193xf32>
    %c6 = arith.constant 6 : index
    %c0_30 = arith.constant 0 : index
    %c0_31 = arith.constant 0 : index
    %102 = vector.load %arg4[%c6, %c0_30, %c0_31] : memref<9x16x6xf32, #tpu.memory_space<vmem>>, vector<1x16x6xf32>
    %103 = vector.shape_cast %102 : vector<1x16x6xf32> to vector<16x6xf32>
    %104 = vector.extract_strided_slice %70 {offsets = [0, 30], sizes = [6, 193], strides = [1, 1]} : vector<6x225xf32> to vector<6x193xf32>
    %cst_32 = arith.constant dense<0.000000e+00> : vector<16x193xf32>
    %105 = tpu.matmul %103, %104, %cst_32 {dimension_numbers = #tpu.dot_dimension_numbers<[1], [0], [0], [1], [0, 0, 1, 1], [], []>} : vector<16x6xf32>, vector<6x193xf32>, vector<16x193xf32> -> vector<16x193xf32>
    %106 = arith.addf %101, %105 : vector<16x193xf32>
    %c7 = arith.constant 7 : index
    %c0_33 = arith.constant 0 : index
    %c0_34 = arith.constant 0 : index
    %107 = vector.load %arg4[%c7, %c0_33, %c0_34] : memref<9x16x6xf32, #tpu.memory_space<vmem>>, vector<1x16x6xf32>
    %108 = vector.shape_cast %107 : vector<1x16x6xf32> to vector<16x6xf32>
    %109 = vector.extract_strided_slice %70 {offsets = [0, 31], sizes = [6, 193], strides = [1, 1]} : vector<6x225xf32> to vector<6x193xf32>
    %cst_35 = arith.constant dense<0.000000e+00> : vector<16x193xf32>
    %110 = tpu.matmul %108, %109, %cst_35 {dimension_numbers = #tpu.dot_dimension_numbers<[1], [0], [0], [1], [0, 0, 1, 1], [], []>} : vector<16x6xf32>, vector<6x193xf32>, vector<16x193xf32> -> vector<16x193xf32>
    %111 = arith.addf %106, %110 : vector<16x193xf32>
    %c8 = arith.constant 8 : index
    %c0_36 = arith.constant 0 : index
    %c0_37 = arith.constant 0 : index
    %112 = vector.load %arg4[%c8, %c0_36, %c0_37] : memref<9x16x6xf32, #tpu.memory_space<vmem>>, vector<1x16x6xf32>
    %113 = vector.shape_cast %112 : vector<1x16x6xf32> to vector<16x6xf32>
    %114 = vector.extract_strided_slice %70 {offsets = [0, 32], sizes = [6, 193], strides = [1, 1]} : vector<6x225xf32> to vector<6x193xf32>
    %cst_38 = arith.constant dense<0.000000e+00> : vector<16x193xf32>
    %115 = tpu.matmul %113, %114, %cst_38 {dimension_numbers = #tpu.dot_dimension_numbers<[1], [0], [0], [1], [0, 0, 1, 1], [], []>} : vector<16x6xf32>, vector<6x193xf32>, vector<16x193xf32> -> vector<16x193xf32>
    %116 = arith.addf %111, %115 : vector<16x193xf32>
    %c0_39 = arith.constant 0 : index
    %c0_40 = arith.constant 0 : index
    %117 = vector.load %arg5[%c0_39, %c0_40] : memref<16x1xf32, #tpu.memory_space<vmem>>, vector<16x1xf32>
    %118 = vector.broadcast %117 : vector<16x1xf32> to vector<16x193xf32>
    %119 = arith.addf %116, %118 : vector<16x193xf32>
    %cst_41 = arith.constant 0.000000e+00 : f32
    %120 = vector.broadcast %cst_41 : f32 to vector<16x193xf32>
    %121 = arith.maximumf %119, %120 : vector<16x193xf32>
    %122 = vector.extract_strided_slice %121 {offsets = [0, 0], sizes = [16, 192], strides = [1, 1]} : vector<16x193xf32> to vector<16x192xf32>
    %123 = vector.extract_strided_slice %121 {offsets = [0, 1], sizes = [16, 192], strides = [1, 1]} : vector<16x193xf32> to vector<16x192xf32>
    %124 = arith.maximumf %122, %123 : vector<16x192xf32>
    %125 = vector.extract_strided_slice %124 {offsets = [0, 0], sizes = [16, 177], strides = [1, 1]} : vector<16x192xf32> to vector<16x177xf32>
    %126 = vector.extract_strided_slice %124 {offsets = [0, 15], sizes = [16, 177], strides = [1, 1]} : vector<16x192xf32> to vector<16x177xf32>
    %127 = arith.maximumf %125, %126 : vector<16x177xf32>
    %c0_42 = arith.constant 0 : index
    %c0_43 = arith.constant 0 : index
    %128 = vector.load %arg7[%c0_42, %c0_43] : memref<177x36xf32, #tpu.memory_space<vmem>>, vector<177x36xf32>
    %cst_44 = arith.constant dense<0.000000e+00> : vector<16x36xf32>
    %129 = tpu.matmul %127, %128, %cst_44 {dimension_numbers = #tpu.dot_dimension_numbers<[1], [0], [0], [1], [0, 0, 1, 1], [], []>} : vector<16x177xf32>, vector<177x36xf32>, vector<16x36xf32> -> vector<16x36xf32>
    %c0_45 = arith.constant 0 : index
    %c0_46 = arith.constant 0 : index
    %130 = vector.load %arg9[%c0_45, %c0_46] : memref<1x128xf32, #tpu.memory_space<vmem>>, vector<1x128xf32>
    %131 = vector.extract_strided_slice %129 {offsets = [0, 0], sizes = [1, 36], strides = [1, 1]} : vector<16x36xf32> to vector<1x36xf32>
    %c0_47 = arith.constant 0 : index
    %c0_48 = arith.constant 0 : index
    %c0_49 = arith.constant 0 : index
    %132 = vector.load %arg8[%c0_47, %c0_48, %c0_49] : memref<16x36x128xf32, #tpu.memory_space<vmem>>, vector<1x36x128xf32>
    %133 = vector.shape_cast %132 : vector<1x36x128xf32> to vector<36x128xf32>
    %cst_50 = arith.constant dense<0.000000e+00> : vector<1x128xf32>
    %134 = tpu.matmul %131, %133, %cst_50 {dimension_numbers = #tpu.dot_dimension_numbers<[1], [0], [0], [1], [0, 0, 1, 1], [], []>} : vector<1x36xf32>, vector<36x128xf32>, vector<1x128xf32> -> vector<1x128xf32>
    %135 = arith.addf %130, %134 : vector<1x128xf32>
    %136 = vector.extract_strided_slice %129 {offsets = [1, 0], sizes = [1, 36], strides = [1, 1]} : vector<16x36xf32> to vector<1x36xf32>
    %c1_51 = arith.constant 1 : index
    %c0_52 = arith.constant 0 : index
    %c0_53 = arith.constant 0 : index
    %137 = vector.load %arg8[%c1_51, %c0_52, %c0_53] : memref<16x36x128xf32, #tpu.memory_space<vmem>>, vector<1x36x128xf32>
    %138 = vector.shape_cast %137 : vector<1x36x128xf32> to vector<36x128xf32>
    %cst_54 = arith.constant dense<0.000000e+00> : vector<1x128xf32>
    %139 = tpu.matmul %136, %138, %cst_54 {dimension_numbers = #tpu.dot_dimension_numbers<[1], [0], [0], [1], [0, 0, 1, 1], [], []>} : vector<1x36xf32>, vector<36x128xf32>, vector<1x128xf32> -> vector<1x128xf32>
    %140 = arith.addf %135, %139 : vector<1x128xf32>
    %141 = vector.extract_strided_slice %129 {offsets = [2, 0], sizes = [1, 36], strides = [1, 1]} : vector<16x36xf32> to vector<1x36xf32>
    %c2_55 = arith.constant 2 : index
    %c0_56 = arith.constant 0 : index
    %c0_57 = arith.constant 0 : index
    %142 = vector.load %arg8[%c2_55, %c0_56, %c0_57] : memref<16x36x128xf32, #tpu.memory_space<vmem>>, vector<1x36x128xf32>
    %143 = vector.shape_cast %142 : vector<1x36x128xf32> to vector<36x128xf32>
    %cst_58 = arith.constant dense<0.000000e+00> : vector<1x128xf32>
    %144 = tpu.matmul %141, %143, %cst_58 {dimension_numbers = #tpu.dot_dimension_numbers<[1], [0], [0], [1], [0, 0, 1, 1], [], []>} : vector<1x36xf32>, vector<36x128xf32>, vector<1x128xf32> -> vector<1x128xf32>
    %145 = arith.addf %140, %144 : vector<1x128xf32>
    %146 = vector.extract_strided_slice %129 {offsets = [3, 0], sizes = [1, 36], strides = [1, 1]} : vector<16x36xf32> to vector<1x36xf32>
    %c3_59 = arith.constant 3 : index
    %c0_60 = arith.constant 0 : index
    %c0_61 = arith.constant 0 : index
    %147 = vector.load %arg8[%c3_59, %c0_60, %c0_61] : memref<16x36x128xf32, #tpu.memory_space<vmem>>, vector<1x36x128xf32>
    %148 = vector.shape_cast %147 : vector<1x36x128xf32> to vector<36x128xf32>
    %cst_62 = arith.constant dense<0.000000e+00> : vector<1x128xf32>
    %149 = tpu.matmul %146, %148, %cst_62 {dimension_numbers = #tpu.dot_dimension_numbers<[1], [0], [0], [1], [0, 0, 1, 1], [], []>} : vector<1x36xf32>, vector<36x128xf32>, vector<1x128xf32> -> vector<1x128xf32>
    %150 = arith.addf %145, %149 : vector<1x128xf32>
    %151 = vector.extract_strided_slice %129 {offsets = [4, 0], sizes = [1, 36], strides = [1, 1]} : vector<16x36xf32> to vector<1x36xf32>
    %c4_63 = arith.constant 4 : index
    %c0_64 = arith.constant 0 : index
    %c0_65 = arith.constant 0 : index
    %152 = vector.load %arg8[%c4_63, %c0_64, %c0_65] : memref<16x36x128xf32, #tpu.memory_space<vmem>>, vector<1x36x128xf32>
    %153 = vector.shape_cast %152 : vector<1x36x128xf32> to vector<36x128xf32>
    %cst_66 = arith.constant dense<0.000000e+00> : vector<1x128xf32>
    %154 = tpu.matmul %151, %153, %cst_66 {dimension_numbers = #tpu.dot_dimension_numbers<[1], [0], [0], [1], [0, 0, 1, 1], [], []>} : vector<1x36xf32>, vector<36x128xf32>, vector<1x128xf32> -> vector<1x128xf32>
    %155 = arith.addf %150, %154 : vector<1x128xf32>
    %156 = vector.extract_strided_slice %129 {offsets = [5, 0], sizes = [1, 36], strides = [1, 1]} : vector<16x36xf32> to vector<1x36xf32>
    %c5_67 = arith.constant 5 : index
    %c0_68 = arith.constant 0 : index
    %c0_69 = arith.constant 0 : index
    %157 = vector.load %arg8[%c5_67, %c0_68, %c0_69] : memref<16x36x128xf32, #tpu.memory_space<vmem>>, vector<1x36x128xf32>
    %158 = vector.shape_cast %157 : vector<1x36x128xf32> to vector<36x128xf32>
    %cst_70 = arith.constant dense<0.000000e+00> : vector<1x128xf32>
    %159 = tpu.matmul %156, %158, %cst_70 {dimension_numbers = #tpu.dot_dimension_numbers<[1], [0], [0], [1], [0, 0, 1, 1], [], []>} : vector<1x36xf32>, vector<36x128xf32>, vector<1x128xf32> -> vector<1x128xf32>
    %160 = arith.addf %155, %159 : vector<1x128xf32>
    %161 = vector.extract_strided_slice %129 {offsets = [6, 0], sizes = [1, 36], strides = [1, 1]} : vector<16x36xf32> to vector<1x36xf32>
    %c6_71 = arith.constant 6 : index
    %c0_72 = arith.constant 0 : index
    %c0_73 = arith.constant 0 : index
    %162 = vector.load %arg8[%c6_71, %c0_72, %c0_73] : memref<16x36x128xf32, #tpu.memory_space<vmem>>, vector<1x36x128xf32>
    %163 = vector.shape_cast %162 : vector<1x36x128xf32> to vector<36x128xf32>
    %cst_74 = arith.constant dense<0.000000e+00> : vector<1x128xf32>
    %164 = tpu.matmul %161, %163, %cst_74 {dimension_numbers = #tpu.dot_dimension_numbers<[1], [0], [0], [1], [0, 0, 1, 1], [], []>} : vector<1x36xf32>, vector<36x128xf32>, vector<1x128xf32> -> vector<1x128xf32>
    %165 = arith.addf %160, %164 : vector<1x128xf32>
    %166 = vector.extract_strided_slice %129 {offsets = [7, 0], sizes = [1, 36], strides = [1, 1]} : vector<16x36xf32> to vector<1x36xf32>
    %c7_75 = arith.constant 7 : index
    %c0_76 = arith.constant 0 : index
    %c0_77 = arith.constant 0 : index
    %167 = vector.load %arg8[%c7_75, %c0_76, %c0_77] : memref<16x36x128xf32, #tpu.memory_space<vmem>>, vector<1x36x128xf32>
    %168 = vector.shape_cast %167 : vector<1x36x128xf32> to vector<36x128xf32>
    %cst_78 = arith.constant dense<0.000000e+00> : vector<1x128xf32>
    %169 = tpu.matmul %166, %168, %cst_78 {dimension_numbers = #tpu.dot_dimension_numbers<[1], [0], [0], [1], [0, 0, 1, 1], [], []>} : vector<1x36xf32>, vector<36x128xf32>, vector<1x128xf32> -> vector<1x128xf32>
    %170 = arith.addf %165, %169 : vector<1x128xf32>
    %171 = vector.extract_strided_slice %129 {offsets = [8, 0], sizes = [1, 36], strides = [1, 1]} : vector<16x36xf32> to vector<1x36xf32>
    %c8_79 = arith.constant 8 : index
    %c0_80 = arith.constant 0 : index
    %c0_81 = arith.constant 0 : index
    %172 = vector.load %arg8[%c8_79, %c0_80, %c0_81] : memref<16x36x128xf32, #tpu.memory_space<vmem>>, vector<1x36x128xf32>
    %173 = vector.shape_cast %172 : vector<1x36x128xf32> to vector<36x128xf32>
    %cst_82 = arith.constant dense<0.000000e+00> : vector<1x128xf32>
    %174 = tpu.matmul %171, %173, %cst_82 {dimension_numbers = #tpu.dot_dimension_numbers<[1], [0], [0], [1], [0, 0, 1, 1], [], []>} : vector<1x36xf32>, vector<36x128xf32>, vector<1x128xf32> -> vector<1x128xf32>
    %175 = arith.addf %170, %174 : vector<1x128xf32>
    %176 = vector.extract_strided_slice %129 {offsets = [9, 0], sizes = [1, 36], strides = [1, 1]} : vector<16x36xf32> to vector<1x36xf32>
    %c9 = arith.constant 9 : index
    %c0_83 = arith.constant 0 : index
    %c0_84 = arith.constant 0 : index
    %177 = vector.load %arg8[%c9, %c0_83, %c0_84] : memref<16x36x128xf32, #tpu.memory_space<vmem>>, vector<1x36x128xf32>
    %178 = vector.shape_cast %177 : vector<1x36x128xf32> to vector<36x128xf32>
    %cst_85 = arith.constant dense<0.000000e+00> : vector<1x128xf32>
    %179 = tpu.matmul %176, %178, %cst_85 {dimension_numbers = #tpu.dot_dimension_numbers<[1], [0], [0], [1], [0, 0, 1, 1], [], []>} : vector<1x36xf32>, vector<36x128xf32>, vector<1x128xf32> -> vector<1x128xf32>
    %180 = arith.addf %175, %179 : vector<1x128xf32>
    %181 = vector.extract_strided_slice %129 {offsets = [10, 0], sizes = [1, 36], strides = [1, 1]} : vector<16x36xf32> to vector<1x36xf32>
    %c10 = arith.constant 10 : index
    %c0_86 = arith.constant 0 : index
    %c0_87 = arith.constant 0 : index
    %182 = vector.load %arg8[%c10, %c0_86, %c0_87] : memref<16x36x128xf32, #tpu.memory_space<vmem>>, vector<1x36x128xf32>
    %183 = vector.shape_cast %182 : vector<1x36x128xf32> to vector<36x128xf32>
    %cst_88 = arith.constant dense<0.000000e+00> : vector<1x128xf32>
    %184 = tpu.matmul %181, %183, %cst_88 {dimension_numbers = #tpu.dot_dimension_numbers<[1], [0], [0], [1], [0, 0, 1, 1], [], []>} : vector<1x36xf32>, vector<36x128xf32>, vector<1x128xf32> -> vector<1x128xf32>
    %185 = arith.addf %180, %184 : vector<1x128xf32>
    %186 = vector.extract_strided_slice %129 {offsets = [11, 0], sizes = [1, 36], strides = [1, 1]} : vector<16x36xf32> to vector<1x36xf32>
    %c11 = arith.constant 11 : index
    %c0_89 = arith.constant 0 : index
    %c0_90 = arith.constant 0 : index
    %187 = vector.load %arg8[%c11, %c0_89, %c0_90] : memref<16x36x128xf32, #tpu.memory_space<vmem>>, vector<1x36x128xf32>
    %188 = vector.shape_cast %187 : vector<1x36x128xf32> to vector<36x128xf32>
    %cst_91 = arith.constant dense<0.000000e+00> : vector<1x128xf32>
    %189 = tpu.matmul %186, %188, %cst_91 {dimension_numbers = #tpu.dot_dimension_numbers<[1], [0], [0], [1], [0, 0, 1, 1], [], []>} : vector<1x36xf32>, vector<36x128xf32>, vector<1x128xf32> -> vector<1x128xf32>
    %190 = arith.addf %185, %189 : vector<1x128xf32>
    %191 = vector.extract_strided_slice %129 {offsets = [12, 0], sizes = [1, 36], strides = [1, 1]} : vector<16x36xf32> to vector<1x36xf32>
    %c12 = arith.constant 12 : index
    %c0_92 = arith.constant 0 : index
    %c0_93 = arith.constant 0 : index
    %192 = vector.load %arg8[%c12, %c0_92, %c0_93] : memref<16x36x128xf32, #tpu.memory_space<vmem>>, vector<1x36x128xf32>
    %193 = vector.shape_cast %192 : vector<1x36x128xf32> to vector<36x128xf32>
    %cst_94 = arith.constant dense<0.000000e+00> : vector<1x128xf32>
    %194 = tpu.matmul %191, %193, %cst_94 {dimension_numbers = #tpu.dot_dimension_numbers<[1], [0], [0], [1], [0, 0, 1, 1], [], []>} : vector<1x36xf32>, vector<36x128xf32>, vector<1x128xf32> -> vector<1x128xf32>
    %195 = arith.addf %190, %194 : vector<1x128xf32>
    %196 = vector.extract_strided_slice %129 {offsets = [13, 0], sizes = [1, 36], strides = [1, 1]} : vector<16x36xf32> to vector<1x36xf32>
    %c13 = arith.constant 13 : index
    %c0_95 = arith.constant 0 : index
    %c0_96 = arith.constant 0 : index
    %197 = vector.load %arg8[%c13, %c0_95, %c0_96] : memref<16x36x128xf32, #tpu.memory_space<vmem>>, vector<1x36x128xf32>
    %198 = vector.shape_cast %197 : vector<1x36x128xf32> to vector<36x128xf32>
    %cst_97 = arith.constant dense<0.000000e+00> : vector<1x128xf32>
    %199 = tpu.matmul %196, %198, %cst_97 {dimension_numbers = #tpu.dot_dimension_numbers<[1], [0], [0], [1], [0, 0, 1, 1], [], []>} : vector<1x36xf32>, vector<36x128xf32>, vector<1x128xf32> -> vector<1x128xf32>
    %200 = arith.addf %195, %199 : vector<1x128xf32>
    %201 = vector.extract_strided_slice %129 {offsets = [14, 0], sizes = [1, 36], strides = [1, 1]} : vector<16x36xf32> to vector<1x36xf32>
    %c14 = arith.constant 14 : index
    %c0_98 = arith.constant 0 : index
    %c0_99 = arith.constant 0 : index
    %202 = vector.load %arg8[%c14, %c0_98, %c0_99] : memref<16x36x128xf32, #tpu.memory_space<vmem>>, vector<1x36x128xf32>
    %203 = vector.shape_cast %202 : vector<1x36x128xf32> to vector<36x128xf32>
    %cst_100 = arith.constant dense<0.000000e+00> : vector<1x128xf32>
    %204 = tpu.matmul %201, %203, %cst_100 {dimension_numbers = #tpu.dot_dimension_numbers<[1], [0], [0], [1], [0, 0, 1, 1], [], []>} : vector<1x36xf32>, vector<36x128xf32>, vector<1x128xf32> -> vector<1x128xf32>
    %205 = arith.addf %200, %204 : vector<1x128xf32>
    %206 = vector.extract_strided_slice %129 {offsets = [15, 0], sizes = [1, 36], strides = [1, 1]} : vector<16x36xf32> to vector<1x36xf32>
    %c15 = arith.constant 15 : index
    %c0_101 = arith.constant 0 : index
    %c0_102 = arith.constant 0 : index
    %207 = vector.load %arg8[%c15, %c0_101, %c0_102] : memref<16x36x128xf32, #tpu.memory_space<vmem>>, vector<1x36x128xf32>
    %208 = vector.shape_cast %207 : vector<1x36x128xf32> to vector<36x128xf32>
    %cst_103 = arith.constant dense<0.000000e+00> : vector<1x128xf32>
    %209 = tpu.matmul %206, %208, %cst_103 {dimension_numbers = #tpu.dot_dimension_numbers<[1], [0], [0], [1], [0, 0, 1, 1], [], []>} : vector<1x36xf32>, vector<36x128xf32>, vector<1x128xf32> -> vector<1x128xf32>
    %210 = arith.addf %205, %209 : vector<1x128xf32>
    %cst_104 = arith.constant 0.000000e+00 : f32
    %211 = vector.broadcast %cst_104 : f32 to vector<1x128xf32>
    %212 = arith.maximumf %210, %211 : vector<1x128xf32>
    %c0_105 = arith.constant 0 : index
    %c0_106 = arith.constant 0 : index
    %213 = vector.load %arg10[%c0_105, %c0_106] : memref<128x128xf32, #tpu.memory_space<vmem>>, vector<128x128xf32>
    %cst_107 = arith.constant dense<0.000000e+00> : vector<1x128xf32>
    %214 = tpu.matmul %212, %213, %cst_107 {dimension_numbers = #tpu.dot_dimension_numbers<[1], [0], [0], [1], [0, 0, 1, 1], [], []>} : vector<1x128xf32>, vector<128x128xf32>, vector<1x128xf32> -> vector<1x128xf32>
    %c0_108 = arith.constant 0 : index
    %c0_109 = arith.constant 0 : index
    %215 = vector.load %arg11[%c0_108, %c0_109] : memref<1x128xf32, #tpu.memory_space<vmem>>, vector<1x128xf32>
    %216 = arith.addf %214, %215 : vector<1x128xf32>
    %cst_110 = arith.constant 0.000000e+00 : f32
    %217 = vector.broadcast %cst_110 : f32 to vector<1x128xf32>
    %218 = arith.maximumf %216, %217 : vector<1x128xf32>
    %c0_111 = arith.constant 0 : index
    %c0_112 = arith.constant 0 : index
    %219 = vector.load %arg12[%c0_111, %c0_112] : memref<128x128xf32, #tpu.memory_space<vmem>>, vector<128x128xf32>
    %cst_113 = arith.constant dense<0.000000e+00> : vector<1x128xf32>
    %220 = tpu.matmul %218, %219, %cst_113 {dimension_numbers = #tpu.dot_dimension_numbers<[1], [0], [0], [1], [0, 0, 1, 1], [], []>} : vector<1x128xf32>, vector<128x128xf32>, vector<1x128xf32> -> vector<1x128xf32>
    %c0_114 = arith.constant 0 : index
    %c0_115 = arith.constant 0 : index
    %221 = vector.load %arg13[%c0_114, %c0_115] : memref<1x128xf32, #tpu.memory_space<vmem>>, vector<1x128xf32>
    %222 = arith.addf %220, %221 : vector<1x128xf32>
    %c0_116 = arith.constant 0 : index
    %c0_117 = arith.constant 0 : index
    %c0_118 = arith.constant 0 : index
    %223 = vector.load %arg14[%c0_116, %c0_117, %c0_118] : memref<1x1x128xf32, #tpu.memory_space<vmem>>, vector<1x1x128xf32>
    %224 = vector.shape_cast %223 : vector<1x1x128xf32> to vector<1x128xf32>
    %225 = vector.shape_cast %222 : vector<1x128xf32> to vector<1x1x128xf32>
    tpu.vector_store %arg14[%c0_116, %c0_117, %c0_118], %225 {strides = array<i32>} : memref<1x1x128xf32, #tpu.memory_space<vmem>>, vector<1x1x128xf32>,
    return
  }
  func.func @transform_0(%arg0: i32) -> (i32, i32, i32) {
    %c0_i32 = arith.constant 0 : i32
    %c0_i32_0 = arith.constant 0 : i32
    %c0_i32_1 = arith.constant 0 : i32
    return %arg0, %c0_i32, %c0_i32_0 : i32, i32, i32
  }
  func.func @transform_1(%arg0: i32) -> (i32, i32) {
    %c0_i32 = arith.constant 0 : i32
    %c0_i32_0 = arith.constant 0 : i32
    %c0_i32_1 = arith.constant 0 : i32
    return %c0_i32, %c0_i32_0 : i32, i32
  }
  func.func @transform_2(%arg0: i32) -> (i32, i32) {
    %c0_i32 = arith.constant 0 : i32
    %c0_i32_0 = arith.constant 0 : i32
    %c0_i32_1 = arith.constant 0 : i32
    return %c0_i32, %c0_i32_0 : i32, i32
  }
  func.func @transform_3(%arg0: i32) -> (i32, i32, i32) {
    %c0_i32 = arith.constant 0 : i32
    %c0_i32_0 = arith.constant 0 : i32
    %c0_i32_1 = arith.constant 0 : i32
    %c0_i32_2 = arith.constant 0 : i32
    return %c0_i32, %c0_i32_0, %c0_i32_1 : i32, i32, i32
  }
  func.func @transform_4(%arg0: i32) -> (i32, i32) {
    %c0_i32 = arith.constant 0 : i32
    %c0_i32_0 = arith.constant 0 : i32
    %c0_i32_1 = arith.constant 0 : i32
    return %c0_i32, %c0_i32_0 : i32, i32
  }
  func.func @transform_5(%arg0: i32) -> (i32, i32) {
    %c0_i32 = arith.constant 0 : i32
    %c0_i32_0 = arith.constant 0 : i32
    %c0_i32_1 = arith.constant 0 : i32
    return %c0_i32, %c0_i32_0 : i32, i32
  }
  func.func @transform_6(%arg0: i32) -> (i32, i32) {
    %c0_i32 = arith.constant 0 : i32
    %c0_i32_0 = arith.constant 0 : i32
    %c0_i32_1 = arith.constant 0 : i32
    return %c0_i32, %c0_i32_0 : i32, i32
  }
  func.func @transform_7(%arg0: i32) -> (i32, i32, i32) {
    %c0_i32 = arith.constant 0 : i32
    %c0_i32_0 = arith.constant 0 : i32
    %c0_i32_1 = arith.constant 0 : i32
    %c0_i32_2 = arith.constant 0 : i32
    return %c0_i32, %c0_i32_0, %c0_i32_1 : i32, i32, i32
  }
  func.func @transform_8(%arg0: i32) -> (i32, i32) {
    %c0_i32 = arith.constant 0 : i32
    %c0_i32_0 = arith.constant 0 : i32
    %c0_i32_1 = arith.constant 0 : i32
    return %c0_i32, %c0_i32_0 : i32, i32
  }
  func.func @transform_9(%arg0: i32) -> (i32, i32) {
    %c0_i32 = arith.constant 0 : i32
    %c0_i32_0 = arith.constant 0 : i32
    %c0_i32_1 = arith.constant 0 : i32
    return %c0_i32, %c0_i32_0 : i32, i32
  }
  func.func @transform_10(%arg0: i32) -> (i32, i32) {
    %c0_i32 = arith.constant 0 : i32
    %c0_i32_0 = arith.constant 0 : i32
    %c0_i32_1 = arith.constant 0 : i32
    return %c0_i32, %c0_i32_0 : i32, i32
  }
  func.func @transform_11(%arg0: i32) -> (i32, i32) {
    %c0_i32 = arith.constant 0 : i32
    %c0_i32_0 = arith.constant 0 : i32
    %c0_i32_1 = arith.constant 0 : i32
    return %c0_i32, %c0_i32_0 : i32, i32
  }
  func.func @transform_12(%arg0: i32) -> (i32, i32) {
    %c0_i32 = arith.constant 0 : i32
    %c0_i32_0 = arith.constant 0 : i32
    %c0_i32_1 = arith.constant 0 : i32
    return %c0_i32, %c0_i32_0 : i32, i32
  }
  func.func @transform_13(%arg0: i32) -> (i32, i32, i32) {
    %c0_i32 = arith.constant 0 : i32
    %c0_i32_0 = arith.constant 0 : i32
    %c0_i32_1 = arith.constant 0 : i32
    return %arg0, %c0_i32, %c0_i32_0 : i32, i32, i32
  }
}

</mosaic_0001>

<bundles_post_ra>
// kernel: net_forward.1
= control target key start
LH: loop header
LB: loop body
LE: loop exit
PB: predicated region body
PF: predicated region fallthrough
CT: control target
= control target key end

     0   :  { %18 = vsyncpa [#allocation3], 0  ;;  %s7121_s0 = inlined_call_operand.vmem [shape: f32[2,1,1024], index: 0, kind: input, shape index: {}]   ;;  %s7122_s1 = inlined_call_operand.vmem [shape: f32[6,9], index: 1, kind: input, shape index: {}]   ;;  %s7123_s2 = inlined_call_operand.vmem [shape: f32[6,1], index: 2, kind: input, shape index: {}]   ;;  %s7124_s3 = inlined_call_operand.vmem [shape: f32[9,16,6], index: 3, kind: input, shape index: {}]   ;;  %s7125_s4 = inlined_call_operand.vmem [shape: f32[16,1], index: 4, kind: input, shape index: {}]   ;;  %s7126_s5 = inlined_call_operand.hbm [shape: f32[925,225], index: 5, kind: input, shape index: {}]   ;;  %s7127_s6 = inlined_call_operand.vmem [shape: f32[177,36], index: 6, kind: input, shape index: {}]   ;;  %s7128_s7 = inlined_call_operand.vmem [shape: f32[16,36,128], index: 7, kind: input, shape index: {}]   ;;  %s7129_s8 = inlined_call_operand.vmem [shape: f32[1,128], index: 8, kind: input, shape index: {}]   ;;  %s7130_s9 = inlined_call_operand.vmem [shape: f32[128,128], index: 9, kind: input, shape index: {}]   ;;  %s7131_s10 = inlined_call_operand.vmem [shape: f32[1,128], index: 10, kind: input, shape index: {}]   ;;  %s7132_s11 = inlined_call_operand.vmem [shape: f32[128,128], index: 11, kind: input, shape index: {}]   ;;  %s7133_s12 = inlined_call_operand.vmem [shape: f32[1,128], index: 12, kind: input, shape index: {}]   ;;  %s7134_s13 = inlined_call_operand.hbm [shape: f32[2,1,128], index: 13, kind: output, shape index: {}]  }
   0x1   :  { %19 = vsyncpa [#allocation4], 0 }
   0x2   :  { %21 = vsyncpa [#allocation4 + $0x1], 0  ;;  %s5660_s25 = smov 0   ;;  %s5662_s26 = smov 0  }
   0x3   :  { %s5664_s27 = smov 0   ;;  %s5666_s28 = smov 0  }
   0x4 LB: > { %7141 = sst [smem:[#allocation8_spill]] %s5554_s27  ;;  %s5681_s29 = sadd.s32 4294967295, %s5558_s28   ;;  %s5558_s28 = sphi %s5666_s28, %s7153_s28   ;;  %s5554_s27 = sphi %s5664_s27, %s7155_s27   ;;  %s5550_s26 = sphi %s5662_s26, %s7157_s26   ;;  %s5546_s25 = sphi %s5660_s25, %s7156_s25  }
   0x5   : > { %s4283_s30 = sadd.s32 4294967294, %s5558_s28   ;;  %s5685_s14 = sadd.s32 1, %s5558_s28  }
   0x6   : > { %7142 = sst [smem:[#allocation9_spill]] %s5685_s14  ;;  %s312_s15 = sadd.s32 1, %s5554_s27 }
   0x7   : > { %s309_s16 = ssub.s32 %s5558_s28, %s5685_s14  ;;  %p322_p0 = scmp.ne.s32.totalorder %s5554_s27, %s5550_s26 }
   0x8   : > { %p310_p1 = scmp.eq.s32.totalorder %s309_s16, 0  ;;  %p323_p2 = scmp.eq.s32.totalorder %s5681_s29, 1 }
   0x9   : > { %p328_p3 = scmp.ne.s32.totalorder %s5550_s26, %s5546_s25  ;;  %p329_p4 = scmp.eq.s32.totalorder %s4283_s30, 1 }
   0xa   : > { %s5696_s17 = scalar_select %p310_p1, %s5554_s27, %s312_s15  }
   0xb   : > { %p5698_p5 = por %p323_p2, %p322_p0  ;;  %p5702_p6 = por %p329_p4, %p328_p3 }
   0xc   : > { %7143 = sst [smem:[#allocation10_spill]] %s5696_s17  ;;  %p4284_p7 = scmp.ge.s32.totalorder %s5558_s28, 1 }
   0xd   : > { %s7144_s18 = scalar_select %p5698_p5, 1, 0 }
   0xe   : > { %s7145_s19 = scalar_select %p5702_p6, 1, 0 }
   0xf   : > { %p336_p8 = scmp.lt.s32.totalorder %s5558_s28, 3  ;;  %p7138_p9 = scmp.eq.s32.totalorder %s5681_s29, 0 }
  0x10   : > { %s5560_s21 = smov [#allocation2]   ;;  %s5464_s15 = scalar_lea.hbm %s7126_s5, 29696 }
  0x11   : > { %p5709_p10 = pnand %p4284_p7, %p336_p8  ;;  %s360_s22 = sshll.u32 %s5560_s21, 4  ;;  %s361_s22 = int_to_ptr.vmem [resolvable:$true] %s360_s22 }
  0x12   : > { %p5465_p13 = scmp.ne.s32.totalorder %s7126_s5, %s5464_s15  ;;  %p5471_p3 = scmp.lt.u32.totalorder %s5464_s15, %s7126_s5 }
  0x13   : > { %s7146_s20 = scalar_select %p5709_p10, 1, 0 }
  0x14   : > { %p5352_p11 = pneg %p5709_p10 }
  0x16   : > { %p5717_p12 = pnand %p7138_p9, %p5352_p11 }
  0x18   : > { %p5466_p0 = pneg %p5717_p12 }
  0x1a   : > { %p5467_p1 = pnand %p5466_p0, %p5465_p13 }
  0x1c   : > { %p5468_p2 = pneg %p5467_p1 }
  0x1e   : > { %p5473_p4 = pnand %p5471_p3, %p5468_p2 }
  0x20   : > { %5476 = shalt.err (!%p5473_p4)
}
  0x21   : > { %s5477_s14 = scalar_lea.vmem %s361_s22, 29696  ;;  %p5485_p9 = scmp.lt.s32.totalorder %s361_s22, %s361_s22 }
  0x22   : > { %p5478_p7 = scmp.ne.s32.totalorder %s361_s22, %s5477_s14  ;;  %p5486_p6 = scmp.lt.s32.totalorder %s5477_s14, %s5477_s14 }
  0x24   : > { %p5480_p8 = pnand %p5478_p7, %p5466_p0  ;;  %p5487_p5 = por %p5486_p6, %p5485_p9 }
  0x26   : > { %p5481_p11 = pneg %p5480_p8 }
  0x28   : > { %p5488_p10 = pnand %p5487_p5, %p5481_p11 }
  0x2a   : > { %5491 = shalt.err (!%p5488_p10)
}
  0x2b   : > { %s5561_s17 = smov 256   ;;  %s5562_s24 = smov 16  }
  0x2c   : > { %5355 = dma.hbm_to_vmem [thread:$0]  (!%p5717_p12), %s7126_s5, 29696, %s361_s22, [#allocation3], %s5561_s17, %s5561_s17, %s5562_s24  }
  0x2d   : > { %p7148_p13 = scmp.ne.s32.totalorder %s7146_s20, 0 }
  0x2e   : > { %p7149_p1 = scmp.eq.s32.totalorder (!%p7148_p13), %s5681_s29, 0 }
  0x2f   : > { %404 = sbr.rel (%p7148_p13) target bundleno = 2842 (0xb1a), region = 72 }
  0x36   : > { %5537 = dma.done.wait (%p7149_p1), [#allocation3], 29696   ;;  %p7150_p0 = pmov %p7149_p1 }
  0x37   : > { %v5563_v0 = vmov 1   ;;  %v5564_v1 = vmov 3   ;;  %p446_p5 = scmp.lt.s32.totalorder %s5681_s29, 1  ;;  %v458_v2 = vlaneseq  ;;  %v451_v4 = vld [vmem:[%s7122_s1] sm:$0x3f]  ;;  %v5565_v12 = vmov 2  }
  0x38   : > { %5539 = vsyncadd (%p7150_p0), [#allocation3], 4294937600  ;;  %5424 = vset.pattern.permute.xlu0 %v5563_v0  ;;  %5426 = vset.pattern.permute.xlu1 %v5564_v1  ;;  %v5566_v13 = vmov 4   ;;  %v5567_v14 = vmov 5   ;;  %v5568_v15 = vmov 6   ;;  %v5569_v16 = vmov 7  }
  0x39   : > { %s447_s27 = scalar_select %p446_p5, %s5681_s29, 1  ;;  %v459_v3 = vshrl.u32 %v458_v2, 7  ;;  %515 = vperm.xlu0 %5424, %v451_v4   ;;  %635 = vperm.xlu1 %5426, %v451_v4   ;;  %v5570_v17 = vmov 0   ;;  %v5571_v18 = vmov 8   ;;  %v994_v19 = vld [vmem:[%s7123_s2] sm:$0x3f] }
  0x3a   : > { %s5572_s30 = smov 127   ;;  %s5573_s16 = smov 126   ;;  %vm550_vm0 = vcmask 1039360   ;;  %vm610_vm1 = vcmask 1031168   ;;  %vm670_vm2 = vcmask 785408   ;;  %vm730_vm3 = vcmask 777216  }
  0x3b   : > { %s4289_s14 = sshll.u32 %s447_s27, 3  ;;  %v480_v6 = vsub.s32 5, %v459_v3  ;;  %v484_v7 = vsub.s32 6, %v459_v3  ;;  %v488_v8 = vsub.s32 7, %v459_v3  ;;  %v472_v20 = vsub.s32 3, %v459_v3  ;;  %s5574_s27 = smov 96  }
  0x3c   : > { %s449_s23 = scalar_lea.vmem %s7121_s0, %s4289_s14  ;;  %v464_v21 = vsub.s32 1, %v459_v3  ;;  %v468_v24 = vsub.s32 2, %v459_v3  ;;  %v460_v25 = vsub.s32 0, %v459_v3  ;;  %v476_v27 = vsub.s32 4, %v459_v3  ;;  %s5575_s14 = smov 95  }
  0x3d   : > { %v450_v5 = vld [vmem:[%s449_s23] sm:$0xff]  ;;  %5425 = vset.pattern.permute.xlu0 %v5565_v12  ;;  %5427 = vset.pattern.permute.xlu1 %v5566_v13  ;;  %s5576_s22 = smov 94   ;;  %s5577_s20 = smov 64   ;;  %vm790_vm4 = vcmask 769024   ;;  %vm850_vm5 = vcmask 523264   ;;  %vm910_vm6 = vcmask 515072  }
  0x3e   : > { %v5751_v9 = vrot.slane %v450_v5, %v480_v6  ;;  %v5753_v10 = vrot.slane %v450_v5, %v484_v7  ;;  %v5755_v11 = vrot.slane %v450_v5, %v488_v8  ;;  %575 = vperm.xlu0 %5425, %v451_v4   ;;  %695 = vperm.xlu1 %5427, %v451_v4   ;;  %s5578_s23 = smov 63   ;;  %s5579_s15 = smov 62   ;;  %vm970_vm7 = vcmask 506880  }
  0x3f   : > { %v5760_v22 = vrot.slane %v450_v5, %v472_v20  ;;  %v5762_v23 = vrot.slane %v450_v5, %v464_v21  ;;  %v5770_v30 = vrot.slane %v450_v5, %v468_v24  ;;  %v5772_v31 = vrot.slane %v450_v5, %v460_v25  ;;  %s5582_s21 = smov 113   ;;  %s5583_s17 = smov 112  }
  0x40   : > { %v5782_v35 = vrot.slane %v450_v5, %v476_v27  ;;  %vm1342_vm8 = vcmask 236544   ;;  %vm1346_vm9 = vcmask 1044480   ;;  %vm5580_vm10 = vmmov 1   ;;  %s5584_s24 = smov 111   ;;  %p7151_p9 = scmp.ne.s32.totalorder %s7144_s18, 0 }
  0x41   : > { %vm5095_vm11 = vmpackc.low %vm1346_vm9, %vm5580_vm10  ;;  %vm1656_vm12 = vcmask 1045504   ;;  %vm1649_vm13 = vcmask 48128   ;;  %vm1931_vm14 = vcmask 924672   ;;  %vm2031_vm15 = vcmask 916480  }
  0x42   : > { %5428 = vset.pattern.permute.xlu1 %v5567_v14  ;;  %5429 = vset.pattern.permute.xlu0 %v5568_v15 }
  0x43   : > { %755 = vperm.xlu1 %5428, %v451_v4   ;;  %815 = vperm.xlu0 %5429, %v451_v4  }
  0x47   : > { %5430 = vset.pattern.permute.xlu1 %v5569_v16  ;;  %5432 = vset.pattern.permute.xlu0 %v5570_v17 }
  0x48   : > { %875 = vperm.xlu1 %5430, %v451_v4   ;;  %454 = vperm.xlu0 %5432, %v451_v4  }
  0x4c   : > { %5431 = vset.pattern.permute.xlu1 %v5571_v18 }
  0x4d   : > { %935 = vperm.xlu1 %5431, %v451_v4  }
  0x51   : > { %5433 = vset.pattern.permute.xlu1 %v5570_v17 }
  0x52   : > { %997 = vperm.xlu1 %5433, %v994_v19  }
  0xb8   : > { %v5764_v26 = vpop.permute.xlu0 %515  ;;  %v5792_v38 = vpop.permute.xlu1 %635 }
  0xb9   : > { %v521_v28 = vmul.f32 %v5764_v26, %v5760_v22  ;;  %v519_v29 = vmul.f32 %v5764_v26, %v5762_v23  ;;  %v520_v32 = vmul.f32 %v5764_v26, %v5770_v30  ;;  %v518_v33 = vmul.f32 %v5764_v26, %v5772_v31 }
  0xba   : > { %v522_v37 = vmul.f32 %v5764_v26, %v5782_v35  ;;  %v639_v41 = vmul.f32 %v5792_v38, %v5762_v23  ;;  %v641_v44 = vmul.f32 %v5792_v38, %v5760_v22  ;;  %v640_v46 = vmul.f32 %v5792_v38, %v5770_v30 }
  0xbb   : > { %540 = vrot.lane.b32.xlu0 %v521_v28, %s5572_s30  ;;  %536 = vrot.lane.b32.xlu1 %v519_v29, %s5572_s30  ;;  %v638_v47 = vmul.f32 %v5792_v38, %v5772_v31  ;;  %v642_v49 = vmul.f32 %v5792_v38, %v5782_v35  ;;  %v523_v17 = vmul.f32 %v5764_v26, %v5751_v9 }
  0xbc   : > { %v524_v18 = vmul.f32 %v5764_v26, %v5753_v10  ;;  %v643_v21 = vmul.f32 %v5792_v38, %v5751_v9  ;;  %v644_v24 = vmul.f32 %v5792_v38, %v5753_v10 }
  0xbd   : > { %v5780_v34 = vpop.permute.xlu0 %575  ;;  %v5812_v45 = vpop.permute.xlu1 %695 }
  0xbe   : > { %v580_v36 = vmul.f32 %v5780_v34, %v5770_v30  ;;  %v579_v39 = vmul.f32 %v5780_v34, %v5762_v23  ;;  %v582_v40 = vmul.f32 %v5780_v34, %v5782_v35  ;;  %v581_v42 = vmul.f32 %v5780_v34, %v5760_v22 }
  0xbf   : > { %538 = vrot.lane.b32.xlu1 %v520_v32, %s5572_s30  ;;  %534 = vrot.lane.b32.xlu0 %v518_v33, %s5572_s30  ;;  %v578_v43 = vmul.f32 %v5780_v34, %v5772_v31  ;;  %v700_v48 = vmul.f32 %v5812_v45, %v5770_v30  ;;  %v699_v51 = vmul.f32 %v5812_v45, %v5762_v23 }
  0xc0   : > { %v702_v52 = vmul.f32 %v5812_v45, %v5782_v35  ;;  %v701_v54 = vmul.f32 %v5812_v45, %v5760_v22  ;;  %v698_v55 = vmul.f32 %v5812_v45, %v5772_v31  ;;  %v583_v19 = vmul.f32 %v5780_v34, %v5751_v9 }
  0xc1   : > { %v584_v20 = vmul.f32 %v5780_v34, %v5753_v10  ;;  %v703_v25 = vmul.f32 %v5812_v45, %v5751_v9  ;;  %v704_v27 = vmul.f32 %v5812_v45, %v5753_v10 }
  0xc2   : > { %v5826_v50 = vpop.permute.xlu1 %755  ;;  %v5846_v57 = vpop.permute.xlu0 %815 }
  0xc3   : > { %542 = vrot.lane.b32.xlu1 %v522_v37, %s5572_s30  ;;  %598 = vrot.lane.b32.xlu0 %v580_v36, %s5573_s16  ;;  %v759_v53 = vmul.f32 %v5826_v50, %v5762_v23  ;;  %v761_v56 = vmul.f32 %v5826_v50, %v5760_v22  ;;  %v760_v58 = vmul.f32 %v5826_v50, %v5770_v30 }
  0xc4   : > { %v758_v59 = vmul.f32 %v5826_v50, %v5772_v31  ;;  %v820_v60 = vmul.f32 %v5846_v57, %v5770_v30  ;;  %v762_v61 = vmul.f32 %v5826_v50, %v5782_v35  ;;  %v819_v62 = vmul.f32 %v5846_v57, %v5762_v23 }
  0xc5   : > { %v822_v63 = vmul.f32 %v5846_v57, %v5782_v35  ;;  %v821_v1 = vmul.f32 %v5846_v57, %v5760_v22  ;;  %v818_v2 = vmul.f32 %v5846_v57, %v5772_v31  ;;  %v763_v28 = vmul.f32 %v5826_v50, %v5751_v9 }
  0xc6   : > { %v764_v29 = vmul.f32 %v5826_v50, %v5753_v10  ;;  %v823_v32 = vmul.f32 %v5846_v57, %v5751_v9  ;;  %v824_v33 = vmul.f32 %v5846_v57, %v5753_v10 }
  0xc7   : > { %596 = vrot.lane.b32.xlu1 %v579_v39, %s5573_s16  ;;  %602 = vrot.lane.b32.xlu0 %v582_v40, %s5573_s16  ;;  %v5866_v0 = vpop.permute.xlu1 %875 }
  0xc8   : > { %v879_v3 = vmul.f32 %v5866_v0, %v5762_v23  ;;  %v880_v4 = vmul.f32 %v5866_v0, %v5770_v30  ;;  %v881_v6 = vmul.f32 %v5866_v0, %v5760_v22  ;;  %v882_v7 = vmul.f32 %v5866_v0, %v5782_v35 }
  0xc9   : > { %v878_v12 = vmul.f32 %v5866_v0, %v5772_v31  ;;  %v883_v36 = vmul.f32 %v5866_v0, %v5751_v9  ;;  %v884_v37 = vmul.f32 %v5866_v0, %v5753_v10 }
  0xcb   : > { %600 = vrot.lane.b32.xlu1 %v581_v42, %s5573_s16  ;;  %656 = vrot.lane.b32.xlu0 %v639_v41, %s5574_s27  ;;  %v5956_v42 = vpop.permute.xlu0 %454 }
  0xcc   : > { %v5880_v5 = vpop.permute.xlu1 %935 }
  0xcd   : > { %v939_v8 = vmul.f32 %v5880_v5, %v5762_v23  ;;  %v940_v13 = vmul.f32 %v5880_v5, %v5770_v30  ;;  %v941_v14 = vmul.f32 %v5880_v5, %v5760_v22  ;;  %v942_v15 = vmul.f32 %v5880_v5, %v5782_v35 }
  0xce   : > { %v938_v16 = vmul.f32 %v5880_v5, %v5772_v31  ;;  %v943_v39 = vmul.f32 %v5880_v5, %v5751_v9  ;;  %v944_v40 = vmul.f32 %v5880_v5, %v5753_v10 }
  0xcf   : > { %594 = vrot.lane.b32.xlu1 %v578_v43, %s5573_s16  ;;  %660 = vrot.lane.b32.xlu0 %v641_v44, %s5574_s27 }
  0xd1   : > { %v5954_v41 = vpop.permute.xlu1 %997 }
  0xd3   : > { %658 = vrot.lane.b32.xlu1 %v640_v46, %s5574_s27  ;;  %654 = vrot.lane.b32.xlu0 %v638_v47, %s5574_s27 }
  0xd7   : > { %662 = vrot.lane.b32.xlu1 %v642_v49, %s5574_s27  ;;  %718 = vrot.lane.b32.xlu0 %v700_v48, %s5575_s14 }
  0xdb   : > { %716 = vrot.lane.b32.xlu1 %v699_v51, %s5575_s14  ;;  %722 = vrot.lane.b32.xlu0 %v702_v52, %s5575_s14 }
  0xdf   : > { %720 = vrot.lane.b32.xlu1 %v701_v54, %s5575_s14  ;;  %776 = vrot.lane.b32.xlu0 %v759_v53, %s5576_s22 }
  0xe3   : > { %714 = vrot.lane.b32.xlu1 %v698_v55, %s5575_s14  ;;  %780 = vrot.lane.b32.xlu0 %v761_v56, %s5576_s22 }
  0xe7   : > { %778 = vrot.lane.b32.xlu1 %v760_v58, %s5576_s22  ;;  %774 = vrot.lane.b32.xlu0 %v758_v59, %s5576_s22 }
  0xeb   : > { %782 = vrot.lane.b32.xlu1 %v762_v61, %s5576_s22  ;;  %838 = vrot.lane.b32.xlu0 %v820_v60, %s5577_s20 }
  0xef   : > { %836 = vrot.lane.b32.xlu1 %v819_v62, %s5577_s20  ;;  %842 = vrot.lane.b32.xlu0 %v822_v63, %s5577_s20 }
  0xf3   : > { %840 = vrot.lane.b32.xlu1 %v821_v1, %s5577_s20  ;;  %834 = vrot.lane.b32.xlu0 %v818_v2, %s5577_s20 }
  0xf7   : > { %896 = vrot.lane.b32.xlu1 %v879_v3, %s5578_s23  ;;  %898 = vrot.lane.b32.xlu0 %v880_v4, %s5578_s23 }
  0xfb   : > { %900 = vrot.lane.b32.xlu1 %v881_v6, %s5578_s23  ;;  %902 = vrot.lane.b32.xlu0 %v882_v7, %s5578_s23 }
  0xff   : > { %894 = vrot.lane.b32.xlu1 %v878_v12, %s5578_s23  ;;  %956 = vrot.lane.b32.xlu0 %v939_v8, %s5579_s15 }
 0x103   : > { %958 = vrot.lane.b32.xlu1 %v940_v13, %s5579_s15  ;;  %960 = vrot.lane.b32.xlu0 %v941_v14, %s5579_s15 }
 0x107   : > { %962 = vrot.lane.b32.xlu1 %v942_v15, %s5579_s15  ;;  %954 = vrot.lane.b32.xlu0 %v938_v16, %s5579_s15 }
 0x10b   : > { %544 = vrot.lane.b32.xlu1 %v523_v17, %s5572_s30  ;;  %546 = vrot.lane.b32.xlu0 %v524_v18, %s5572_s30 }
 0x10f   : > { %604 = vrot.lane.b32.xlu1 %v583_v19, %s5573_s16  ;;  %606 = vrot.lane.b32.xlu0 %v584_v20, %s5573_s16  ;;  %v500_v19 = vmul.f32 %v5770_v30, %v5956_v42  ;;  %v499_v20 = vmul.f32 %v5762_v23, %v5956_v42 }
 0x113   : > { %664 = vrot.lane.b32.xlu1 %v643_v21, %s5574_s27  ;;  %666 = vrot.lane.b32.xlu0 %v644_v24, %s5574_s27  ;;  %v498_v21 = vmul.f32 %v5772_v31, %v5956_v42  ;;  %v501_v24 = vmul.f32 %v5760_v22, %v5956_v42 }
 0x117   : > { %724 = vrot.lane.b32.xlu1 %v703_v25, %s5575_s14  ;;  %726 = vrot.lane.b32.xlu0 %v704_v27, %s5575_s14 }
 0x11b   : > { %784 = vrot.lane.b32.xlu1 %v763_v28, %s5576_s22  ;;  %786 = vrot.lane.b32.xlu0 %v764_v29, %s5576_s22 }
 0x11f   : > { %844 = vrot.lane.b32.xlu1 %v823_v32, %s5577_s20  ;;  %846 = vrot.lane.b32.xlu0 %v824_v33, %s5577_s20 }
 0x123   : > { %904 = vrot.lane.b32.xlu1 %v883_v36, %s5578_s23  ;;  %906 = vrot.lane.b32.xlu0 %v884_v37, %s5578_s23 }
 0x127   : > { %964 = vrot.lane.b32.xlu1 %v943_v39, %s5579_s15  ;;  %966 = vrot.lane.b32.xlu0 %v944_v40, %s5579_s15 }
 0x12d   : > { %v541_v43 = vpop.permute.xlu0 %540  ;;  %v537_v44 = vpop.permute.xlu1 %536 }
 0x131   : > { %v539_v46 = vpop.permute.xlu1 %538  ;;  %v535_v47 = vpop.permute.xlu0 %534 }
 0x132   : > { %v552_v17 = vsel %vm550_vm0, %v537_v44, %v539_v46  ;;  %v553_v18 = vsel %vm550_vm0, %v539_v46, %v541_v43  ;;  %v551_v23 = vsel %vm550_vm0, %v535_v47, %v537_v44 }
 0x133   : > { %v567_v28 = vadd.f32 %v552_v17, %v499_v20  ;;  %v568_v29 = vadd.f32 %v553_v18, %v500_v19  ;;  %v566_v47 = vadd.f32 %v551_v23, %v498_v21 }
 0x135   : > { %v5958_v48 = vpop.permute.xlu1 %542  ;;  %v599_v49 = vpop.permute.xlu0 %598 }
 0x136   : > { %v554_v31 = vsel %vm550_vm0, %v541_v43, %v5958_v48 }
 0x139   : > { %v597_v51 = vpop.permute.xlu1 %596  ;;  %v5960_v52 = vpop.permute.xlu0 %602 }
 0x13a   : > { %v612_v25 = vsel %vm610_vm1, %v597_v51, %v599_v49 }
 0x13b   : > { %v627_v36 = vadd.f32 %v612_v25, %v567_v28 }
 0x13d   : > { %v601_v53 = vpop.permute.xlu1 %600  ;;  %v657_v54 = vpop.permute.xlu0 %656 }
 0x13e   : > { %v613_v27 = vsel %vm610_vm1, %v599_v49, %v601_v53  ;;  %v614_v39 = vsel %vm610_vm1, %v601_v53, %v5960_v52  ;;  %v569_v49 = vadd.f32 %v554_v31, %v501_v24 }
 0x13f   : > { %v628_v37 = vadd.f32 %v613_v27, %v568_v29 }
 0x141   : > { %v595_v55 = vpop.permute.xlu1 %594  ;;  %v661_v56 = vpop.permute.xlu0 %660 }
 0x142   : > { %v611_v40 = vsel %vm610_vm1, %v595_v55, %v597_v51  ;;  %v629_v55 = vadd.f32 %v614_v39, %v569_v49 }
 0x145   : > { %v659_v58 = vpop.permute.xlu1 %658  ;;  %v655_v59 = vpop.permute.xlu0 %654 }
 0x146   : > { %v672_v33 = vsel %vm670_vm2, %v657_v54, %v659_v58  ;;  %v673_v22 = vsel %vm670_vm2, %v659_v58, %v661_v56  ;;  %v671_v58 = vsel %vm670_vm2, %v655_v59, %v657_v54 }
 0x147   : > { %v687_v43 = vadd.f32 %v672_v33, %v627_v36  ;;  %v688_v17 = vadd.f32 %v673_v22, %v628_v37 }
 0x149   : > { %v5962_v60 = vpop.permute.xlu1 %662  ;;  %v719_v61 = vpop.permute.xlu0 %718 }
 0x14a   : > { %v674_v20 = vsel %vm670_vm2, %v661_v56, %v5962_v60 }
 0x14b   : > { %v689_v28 = vadd.f32 %v674_v20, %v629_v55 }
 0x14d   : > { %v717_v62 = vpop.permute.xlu1 %716  ;;  %v5964_v63 = vpop.permute.xlu0 %722 }
 0x14e   : > { %v732_v46 = vsel %vm730_vm3, %v717_v62, %v719_v61 }
 0x14f   : > { %v747_v21 = vadd.f32 %v732_v46, %v687_v43 }
 0x151   : > { %v721_v1 = vpop.permute.xlu1 %720  ;;  %v5966_v2 = vpop.permute.xlu0 %776 }
 0x152   : > { %v733_v44 = vsel %vm730_vm3, %v719_v61, %v721_v1  ;;  %v626_v61 = vadd.f32 %v611_v40, %v566_v47  ;;  %v734_v25 = vsel %vm730_vm3, %v721_v1, %v5964_v63 }
 0x153   : > { %v748_v24 = vadd.f32 %v733_v44, %v688_v17  ;;  %v749_v22 = vadd.f32 %v734_v25, %v689_v28 }
 0x154   : > { %v686_v59 = vadd.f32 %v671_v58, %v626_v61 }
 0x155   : > { %v715_v3 = vpop.permute.xlu1 %714  ;;  %v5968_v4 = vpop.permute.xlu0 %780 }
 0x156   : > { %v731_v27 = vsel %vm730_vm3, %v715_v3, %v717_v62 }
 0x157   : > { %v746_v36 = vadd.f32 %v731_v27, %v686_v59 }
 0x159   : > { %v779_v6 = vpop.permute.xlu1 %778  ;;  %v775_v7 = vpop.permute.xlu0 %774 }
 0x15a   : > { %v792_v53 = vsel %vm790_vm4, %v5966_v2, %v779_v6  ;;  %v793_v51 = vsel %vm790_vm4, %v779_v6, %v5968_v4  ;;  %v791_v33 = vsel %vm790_vm4, %v775_v7, %v5966_v2 }
 0x15b   : > { %v807_v29 = vadd.f32 %v792_v53, %v747_v21  ;;  %v808_v23 = vadd.f32 %v793_v51, %v748_v24  ;;  %v806_v7 = vadd.f32 %v791_v33, %v746_v36  ;;  %v502_v33 = vmul.f32 %v5782_v35, %v5956_v42  ;;  %v1111_v35 = vld [vmem:[#allocation2 + $0x8] sm:$0xff] }
 0x15d   : > { %v5970_v8 = vpop.permute.xlu1 %782  ;;  %v839_v12 = vpop.permute.xlu0 %838 }
 0x15e   : > { %v794_v1 = vsel %vm790_vm4, %v5968_v4, %v5970_v8 }
 0x15f   : > { %v809_v40 = vadd.f32 %v794_v1, %v749_v22 }
 0x161   : > { %v5972_v13 = vpop.permute.xlu1 %836  ;;  %v5974_v14 = vpop.permute.xlu0 %842 }
 0x162   : > { %v852_v54 = vsel %vm850_vm5, %v5972_v13, %v839_v12 }
 0x165   : > { %v5976_v15 = vpop.permute.xlu1 %840  ;;  %v5978_v16 = vpop.permute.xlu0 %834 }
 0x166   : > { %v853_v56 = vsel %vm850_vm5, %v839_v12, %v5976_v15  ;;  %v867_v12 = vadd.f32 %v852_v54, %v807_v29  ;;  %v854_v39 = vsel %vm850_vm5, %v5976_v15, %v5974_v14  ;;  %v851_v2 = vsel %vm850_vm5, %v5978_v16, %v5972_v13 }
 0x167   : > { %v868_v37 = vadd.f32 %v853_v56, %v808_v23  ;;  %v869_v15 = vadd.f32 %v854_v39, %v809_v40  ;;  %v866_v58 = vadd.f32 %v851_v2, %v806_v7  ;;  %v1112_v39 = vld [vmem:[#allocation2 + $0x10] sm:$0xff]  ;;  %v1115_v2 = vld [vmem:[#allocation2 + $0x28] sm:$0xff]  ;;  %v1117_v7 = vld [vmem:[#allocation2 + $0x38] sm:$0xff] }
 0x169   : > { %v897_v30 = vpop.permute.xlu1 %896  ;;  %v899_v32 = vpop.permute.xlu0 %898 }
 0x16a   : > { %v912_v62 = vsel %vm910_vm6, %v897_v30, %v899_v32 }
 0x16b   : > { %v927_v46 = vadd.f32 %v912_v62, %v867_v12  ;;  %v525_v62 = vmul.f32 %v5764_v26, %v5755_v11  ;;  %v1110_v12 = vld [vmem:[#allocation2] sm:$0xff]  ;;  %v645_v26 = vmul.f32 %v5792_v38, %v5755_v11  ;;  %v1119_v38 = vld [vmem:[#allocation2 + $0x48] sm:$0xff] }
 0x16d   : > { %v901_v18 = vpop.permute.xlu1 %900  ;;  %v6002_v19 = vpop.permute.xlu0 %902 }
 0x16e   : > { %v913_v3 = vsel %vm910_vm6, %v899_v32, %v901_v18  ;;  %v914_v32 = vsel %vm910_vm6, %v901_v18, %v6002_v19 }
 0x16f   : > { %v928_v4 = vadd.f32 %v913_v3, %v868_v37  ;;  %v929_v13 = vadd.f32 %v914_v32, %v869_v15  ;;  %v1116_v32 = vld [vmem:[#allocation2 + $0x30] sm:$0xff] }
 0x171   : > { %v895_v6 = vpop.permute.xlu1 %894  ;;  %v957_v31 = vpop.permute.xlu0 %956 }
 0x172   : > { %v911_v49 = vsel %vm910_vm6, %v895_v6, %v897_v30 }
 0x173   : > { %v926_v16 = vadd.f32 %v911_v49, %v866_v58 }
 0x175   : > { %v959_v44 = vpop.permute.xlu1 %958  ;;  %v961_v47 = vpop.permute.xlu0 %960 }
 0x176   : > { %v972_v43 = vsel %vm970_vm7, %v957_v31, %v959_v44  ;;  %v973_v17 = vsel %vm970_vm7, %v959_v44, %v961_v47  ;;  %v4870_v44 = vpack.c.bf16 %v1117_v7, %v1115_v2 }
 0x177   : > { %v987_v20 = vadd.f32 %v972_v43, %v927_v46  ;;  %v988_v53 = vadd.f32 %v973_v17, %v928_v4  ;;  %v4868_v4 = vpack.c.bf16 %v1112_v39, %v1110_v12  ;;  %v1121_v43 = vld [vmem:[#allocation2 + $0x58] sm:$0xff] }
 0x179   : > { %v6037_v51 = vadd.f32 %v5954_v41, %v987_v20  ;;  %v6040_v55 = vadd.f32 %v5954_v41, %v988_v53  ;;  %v6042_v61 = vpop.permute.xlu1 %962  ;;  %v955_v18 = vpop.permute.xlu0 %954  ;;  %v705_v20 = vmul.f32 %v5812_v45, %v5755_v11  ;;  %v1118_v53 = vld [vmem:[#allocation2 + $0x40] sm:$0xff]  ;;  %v885_v45 = vmul.f32 %v5866_v0, %v5755_v11 }
 0x17a   : > { %v974_v30 = vsel %vm970_vm7, %v961_v47, %v6042_v61  ;;  %v971_v21 = vsel %vm970_vm7, %v955_v18, %v957_v31  ;;  %v1114_v47 = vld [vmem:[#allocation2 + $0x20] sm:$0xff]  ;;  %v1123_v18 = vld [vmem:[#allocation2 + $0x68] sm:$0xff] }
 0x17b   : > { %v1009_v24 = vmax.f32 %v6037_v51, 0.0  ;;  %v1010_v25 = vmax.f32 %v6040_v55, 0.0  ;;  %v989_v27 = vadd.f32 %v974_v30, %v929_v13  ;;  %v986_v54 = vadd.f32 %v971_v21, %v926_v16  ;;  %v1120_v13 = vld [vmem:[#allocation2 + $0x50] sm:$0xff]  ;;  %v1125_v30 = vld [vmem:[#allocation2 + $0x78] sm:$0xff]  ;;  %v1175_v51 = vld [vmem:[#allocation2 + $0x208] sm:$0xff] }
 0x17c   : > { %v4872_v15 = vpack.c.bf16 %v1116_v32, %v1114_v47  ;;  %v1137_v47 = vld [vmem:[#allocation2 + $0xd8] sm:$0xff]  ;;  %v945_v55 = vmul.f32 %v5880_v5, %v5755_v11 }
 0x17d   : > { %v6050_v56 = vadd.f32 %v5954_v41, %v989_v27  ;;  %v6053_v59 = vadd.f32 %v5954_v41, %v986_v54  ;;  %v6055_v28 = vpop.permute.xlu1 %544  ;;  %v5434_v29 = vpack.i.bf16 %v1010_v25, %v1009_v24  ;;  %v825_v54 = vmul.f32 %v5846_v57, %v5755_v11 }
 0x17e   : > { %v555_v31 = vsel %vm550_vm0, %v5958_v48, %v6055_v28  ;;  %v1113_v48 = vld [vmem:[#allocation2 + $0x18] sm:$0xff] }
 0x17f   : > { %v1011_v23 = vmax.f32 %v6050_v56, 0.0  ;;  %v1008_v6 = vmax.f32 %v6053_v59, 0.0  ;;  %5435 = vrot.lane.b32.xlu1 %v5434_v29, %s5572_s30  ;;  %v570_v36 = vadd.f32 %v555_v31, %v502_v33  ;;  %v4866_v37 = vpack.c.bf16 %v1113_v48, %v1111_v35  ;;  %v1124_v31 = vld [vmem:[#allocation2 + $0x70] sm:$0xff]  ;;  %v1126_v35 = vld [vmem:[#allocation2 + $0x80] sm:$0xff] }
 0x180   : > { %v4878_v29 = vpack.c.bf16 %v1125_v30, %v1123_v18  ;;  %v1128_v48 = vld [vmem:[#allocation2 + $0x90] sm:$0xff]  ;;  %v1143_v18 = vld [vmem:[#allocation2 + $0x108] sm:$0xff]  ;;  %v1145_v30 = vld [vmem:[#allocation2 + $0x118] sm:$0xff] }
 0x181   : > { %v6069_v1 = vpop.permute.xlu1 %604  ;;  %v5439_v3 = vpack.i.bf16 %v1008_v6, %v1011_v23  ;;  %4867 = vmatprep.subr.bf16.mxu0 %v4866_v37  ;;  %v4884_v39 = vpack.c.bf16 %v1128_v48, %v1126_v35  ;;  %v1150_v35 = vld [vmem:[#allocation2 + $0x140] sm:$0xff]  ;;  %v1152_v48 = vld [vmem:[#allocation2 + $0x150] sm:$0xff] }
 0x182   : > { %v615_v22 = vsel %vm610_vm1, %v5960_v52, %v6069_v1  ;;  %v585_v52 = vmul.f32 %v5780_v34, %v5755_v11  ;;  %4869 = vmatpush1.bf16.msra.mxu0 %v4868_v4  ;;  %v765_v34 = vmul.f32 %v5826_v50, %v5755_v11  ;;  %v4876_v50 = vpack.c.bf16 %v1120_v13, %v1118_v53  ;;  %v1138_v13 = vld [vmem:[#allocation2 + $0xe0] sm:$0xff] }
 0x183   : > { %548 = vrot.lane.b32.xlu1 %v525_v62, %s5572_s30  ;;  %5440 = vrot.lane.b32.xlu0 %v5439_v3, %s5572_s30  ;;  %v630_v40 = vadd.f32 %v615_v22, %v570_v36  ;;  %v1127_v62 = vld [vmem:[#allocation2 + $0x88] sm:$0xff]  ;;  %v1129_v3 = vld [vmem:[#allocation2 + $0x98] sm:$0xff] }
 0x184   : > { %4871 = vmatprep.subr.bf16.mxu0 %v4870_v44  ;;  %v4882_v57 = vpack.c.bf16 %v1129_v3, %v1127_v62  ;;  %v1135_v44 = vld [vmem:[#allocation2 + $0xc8] sm:$0xff]  ;;  %v1148_v62 = vld [vmem:[#allocation2 + $0x130] sm:$0xff] }
 0x185   : > { %v6084_v46 = vpop.permute.xlu1 %664  ;;  %v1151_v3 = vld [vmem:[#allocation2 + $0x148] sm:$0xff] }
 0x186   : > { %v675_v49 = vsel %vm670_vm2, %v5962_v60, %v6084_v46  ;;  %v4874_v60 = vpack.c.bf16 %v1121_v43, %v1119_v38  ;;  %4873 = vmatpush1.bf16.msra.mxu0 %v4872_v15  ;;  %v4890_v38 = vpack.c.bf16 %v1137_v47, %v1135_v44  ;;  %v1134_v43 = vld [vmem:[#allocation2 + $0xc0] sm:$0xff] }
 0x187   : > { %v690_v17 = vadd.f32 %v675_v49, %v630_v40  ;;  %668 = vrot.lane.b32.xlu1 %v645_v26, %s5574_s27  ;;  %608 = vrot.lane.b32.xlu0 %v585_v52, %s5573_s16  ;;  %v1133_v26 = vld [vmem:[#allocation2 + $0xb8] sm:$0xff]  ;;  %v1130_v40 = vld [vmem:[#allocation2 + $0xa0] sm:$0xff]  ;;  %v1132_v52 = vld [vmem:[#allocation2 + $0xb0] sm:$0xff] }
 0x188   : > { %4875 = vmatprep.subr.bf16.mxu0 %v4874_v60  ;;  %v1158_v47 = vld [vmem:[#allocation2 + $0x180] sm:$0xff] }
 0x189   : > { %v6093_v58 = vpop.permute.xlu1 %724 }
 0x18a   : > { %v735_v16 = vsel %vm730_vm3, %v5964_v63, %v6093_v58  ;;  %v1122_v63 = vld [vmem:[#allocation2 + $0x60] sm:$0xff]  ;;  %4877 = vmatpush1.bf16.msra.mxu0 %v4876_v50  ;;  %v4898_v50 = vpack.c.bf16 %v1145_v30, %v1143_v18 }
 0x18b   : > { %v750_v21 = vadd.f32 %v735_v16, %v690_v17  ;;  %788 = vrot.lane.b32.xlu1 %v765_v34, %s5576_s22  ;;  %728 = vrot.lane.b32.xlu0 %v705_v20, %s5575_s14  ;;  %v4880_v0 = vpack.c.bf16 %v1124_v31, %v1122_v63  ;;  %v1136_v17 = vld [vmem:[#allocation2 + $0xd0] sm:$0xff]  ;;  %v1139_v34 = vld [vmem:[#allocation2 + $0xe8] sm:$0xff]  ;;  %v1141_v20 = vld [vmem:[#allocation2 + $0xf8] sm:$0xff]  ;;  %s5585_s14 = smov 98   ;;  %s5586_s22 = smov 97  }
 0x18c   : > { %4879 = vmatprep.subr.bf16.mxu0 %v4878_v29  ;;  %v4894_v53 = vpack.c.bf16 %v1141_v20, %v1139_v34  ;;  %v1140_v16 = vld [vmem:[#allocation2 + $0xf0] sm:$0xff]  ;;  %v1147_v29 = vld [vmem:[#allocation2 + $0x128] sm:$0xff] }
 0x18d   : > { %v6104_v27 = vpop.permute.xlu1 %784  ;;  %v1164_v34 = vld [vmem:[#allocation2 + $0x1b0] sm:$0xff] }
 0x18e   : > { %v795_v33 = vsel %vm790_vm4, %v5970_v8, %v6104_v27  ;;  %v1131_v8 = vld [vmem:[#allocation2 + $0xa8] sm:$0xff]  ;;  %4881 = vmatpush1.bf16.msra.mxu0 %v4880_v0 }
 0x18f   : > { %v810_v22 = vadd.f32 %v795_v33, %v750_v21  ;;  %908 = vrot.lane.b32.xlu1 %v885_v45, %s5578_s23  ;;  %848 = vrot.lane.b32.xlu0 %v825_v54, %s5577_s20  ;;  %v4886_v7 = vpack.c.bf16 %v1133_v26, %v1131_v8  ;;  %v4896_v21 = vpack.c.bf16 %v1140_v16, %v1138_v13  ;;  %v1142_v45 = vld [vmem:[#allocation2 + $0x100] sm:$0xff]  ;;  %v1144_v54 = vld [vmem:[#allocation2 + $0x110] sm:$0xff]  ;;  %v1157_v8 = vld [vmem:[#allocation2 + $0x178] sm:$0xff] }
 0x190   : > { %4883 = vmatprep.subr.bf16.mxu0 %v4882_v57  ;;  %v4900_v63 = vpack.c.bf16 %v1144_v54, %v1142_v45  ;;  %v1146_v33 = vld [vmem:[#allocation2 + $0x120] sm:$0xff]  ;;  %v4908_v26 = vpack.c.bf16 %v1152_v48, %v1150_v35  ;;  %v1168_v48 = vld [vmem:[#allocation2 + $0x1d0] sm:$0xff] }
 0x191   : > { %v6115_v36 = vpop.permute.xlu1 %844  ;;  %v4904_v0 = vpack.c.bf16 %v1148_v62, %v1146_v33 }
 0x192   : > { %v855_v12 = vsel %vm850_vm5, %v5974_v14, %v6115_v36  ;;  %4885 = vmatpush1.bf16.msra.mxu0 %v4884_v39  ;;  %v4888_v14 = vpack.c.bf16 %v1132_v52, %v1130_v40  ;;  %v1154_v39 = vld [vmem:[#allocation2 + $0x160] sm:$0xff]  ;;  %v1159_v40 = vld [vmem:[#allocation2 + $0x188] sm:$0xff]  ;;  %v1161_v52 = vld [vmem:[#allocation2 + $0x198] sm:$0xff] }
 0x193   : > { %v870_v37 = vadd.f32 %v855_v12, %v810_v22  ;;  %4887 = vmatprep.subr.bf16.mxu0 %v4886_v7  ;;  %v1153_v22 = vld [vmem:[#allocation2 + $0x158] sm:$0xff]  ;;  %v1155_v12 = vld [vmem:[#allocation2 + $0x168] sm:$0xff]  ;;  %v1156_v7 = vld [vmem:[#allocation2 + $0x170] sm:$0xff]  ;;  %v4914_v44 = vpack.c.bf16 %v1161_v52, %v1159_v40 }
 0x194   : > { %v4906_v57 = vpack.c.bf16 %v1153_v22, %v1151_v3  ;;  %v1170_v52 = vld [vmem:[#allocation2 + $0x1e0] sm:$0xff] }
 0x195   : > { %v6120_v2 = vpop.permute.xlu1 %904 }
 0x196   : > { %v915_v4 = vsel %vm910_vm6, %v6002_v19, %v6120_v2  ;;  %4889 = vmatpush1.bf16.msra.mxu0 %v4888_v14  ;;  %v4892_v19 = vpack.c.bf16 %v1136_v17, %v1134_v43  ;;  %v1163_v14 = vld [vmem:[#allocation2 + $0x1a8] sm:$0xff] }
 0x197   : > { %v930_v32 = vadd.f32 %v915_v4, %v870_v37  ;;  %4891 = vmatprep.subr.bf16.mxu0 %v4890_v38  ;;  %v4910_v37 = vpack.c.bf16 %v1157_v8, %v1155_v12  ;;  %v4912_v4 = vpack.c.bf16 %v1156_v7, %v1154_v39  ;;  %v1165_v38 = vld [vmem:[#allocation2 + $0x1b8] sm:$0xff]  ;;  %v1171_v7 = vld [vmem:[#allocation2 + $0x1e8] sm:$0xff] }
 0x198   : > { %v4918_v17 = vpack.c.bf16 %v1165_v38, %v1163_v14 }
 0x199   : > { %v6125_v49 = vpop.permute.xlu1 %964 }
 0x19a   : > { %v975_v15 = vsel %vm970_vm7, %v6042_v61, %v6125_v49  ;;  %4893 = vmatpush1.bf16.msra.mxu0 %v4892_v19  ;;  %v1149_v61 = vld [vmem:[#allocation2 + $0x138] sm:$0xff]  ;;  %v6132_v19 = vpop.permute.xlu0 %546 }
 0x19b   : > { %v6130_v60 = vadd.f32 %v975_v15, %v930_v32  ;;  %4895 = vmatprep.subr.bf16.mxu0 %v4894_v53  ;;  %v4902_v31 = vpack.c.bf16 %v1149_v61, %v1147_v29  ;;  %v1160_v32 = vld [vmem:[#allocation2 + $0x190] sm:$0xff]  ;;  %v1162_v15 = vld [vmem:[#allocation2 + $0x1a0] sm:$0xff] }
 0x19c   : > { %v4916_v43 = vpack.c.bf16 %v1160_v32, %v1158_v47  ;;  %v4920_v20 = vpack.c.bf16 %v1164_v34, %v1162_v15 }
 0x19e   : > { %4897 = vmatpush1.bf16.msra.mxu0 %v4896_v21  ;;  %v6134_v53 = vpop.permute.xlu0 %606  ;;  %v556_v21 = vsel %vm550_vm0, %v6055_v28, %v6132_v19 }
 0x19f   : > { %4899 = vmatprep.subr.bf16.mxu0 %v4898_v50  ;;  %v503_v50 = vmul.f32 %v5751_v9, %v5956_v42  ;;  %v616_v45 = vsel %vm610_vm1, %v6069_v1, %v6134_v53 }
 0x1a1   : > { %v571_v54 = vadd.f32 %v556_v21, %v503_v50 }
 0x1a2   : > { %4901 = vmatpush1.bf16.msra.mxu0 %v4900_v63  ;;  %v6136_v13 = vpop.permute.xlu0 %666 }
 0x1a3   : > { %4903 = vmatprep.subr.bf16.mxu0 %v4902_v31  ;;  %v676_v29 = vsel %vm670_vm2, %v6084_v46, %v6136_v13  ;;  %v631_v61 = vadd.f32 %v616_v45, %v571_v54  ;;  %v505_v54 = vmul.f32 %v5755_v11, %v5956_v42 }
 0x1a5   : > { %v691_v28 = vadd.f32 %v676_v29, %v631_v61 }
 0x1a6   : > { %4905 = vmatpush1.bf16.msra.mxu0 %v4904_v0  ;;  %v6138_v16 = vpop.permute.xlu0 %726  ;;  %v1167_v0 = vld [vmem:[#allocation2 + $0x1c8] sm:$0xff] }
 0x1a7   : > { %4907 = vmatprep.subr.bf16.mxu0 %v4906_v57  ;;  %v736_v31 = vsel %vm730_vm3, %v6093_v58, %v6138_v16  ;;  %v1169_v58 = vld [vmem:[#allocation2 + $0x1d8] sm:$0xff]  ;;  %v1166_v57 = vld [vmem:[#allocation2 + $0x1c0] sm:$0xff] }
 0x1a8   : > { %v751_v33 = vadd.f32 %v736_v31, %v691_v28  ;;  %v4922_v35 = vpack.c.bf16 %v1169_v58, %v1167_v0  ;;  %v4924_v8 = vpack.c.bf16 %v1168_v48, %v1166_v57  ;;  %v504_v31 = vmul.f32 %v5753_v10, %v5956_v42 }
 0x1aa   : > { %4909 = vmatpush1.bf16.msra.mxu0 %v4908_v26  ;;  %v6140_v18 = vpop.permute.xlu0 %786 }
 0x1ab   : > { %4911 = vmatprep.subr.bf16.mxu0 %v4910_v37  ;;  %v796_v9 = vsel %vm790_vm4, %v6104_v27, %v6140_v18 }
 0x1ac   : > { %v811_v62 = vadd.f32 %v796_v9, %v751_v33 }
 0x1ae   : > { %4913 = vmatpush1.bf16.msra.mxu0 %v4912_v4  ;;  %v6142_v30 = vpop.permute.xlu0 %846  ;;  %v1172_v4 = vld [vmem:[#allocation2 + $0x1f0] sm:$0xff] }
 0x1af   : > { %4915 = vmatprep.subr.bf16.mxu0 %v4914_v44  ;;  %v856_v1 = vsel %vm850_vm5, %v6115_v36, %v6142_v30  ;;  %v6176_v44 = vadd.f32 %v5954_v41, %v6130_v60 }
 0x1b0   : > { %v871_v22 = vadd.f32 %v856_v1, %v811_v62 }
 0x1b2   : > { %4917 = vmatpush1.bf16.msra.mxu0 %v4916_v43  ;;  %v6155_v63 = vpop.permute.xlu0 %906 }
 0x1b3   : > { %4919 = vmatprep.subr.bf16.mxu0 %v4918_v17  ;;  %v916_v46 = vsel %vm910_vm6, %v6120_v2, %v6155_v63  ;;  %v1173_v2 = vld [vmem:[#allocation2 + $0x1f8] sm:$0xff]  ;;  %v1012_v17 = vmax.f32 %v6176_v44, 0.0  ;;  %v1184_v44 = vld [vmem:[#allocation2 + $0x250] sm:$0xff] }
 0x1b4   : > { %v931_v12 = vadd.f32 %v916_v46, %v871_v22  ;;  %v4926_v40 = vpack.c.bf16 %v1173_v2, %v1171_v7  ;;  %v1179_v2 = vld [vmem:[#allocation2 + $0x228] sm:$0xff] }
 0x1b6   : > { %4921 = vmatpush1.bf16.msra.mxu0 %v4920_v20  ;;  %v6166_v3 = vpop.permute.xlu0 %966 }
 0x1b7   : > { %v976_v27 = vsel %vm970_vm7, %v6125_v49, %v6166_v3  ;;  %4923 = vmatprep.subr.bf16.mxu0 %v4922_v35  ;;  %v4928_v49 = vpack.c.bf16 %v1172_v4, %v1170_v52 }
 0x1b8   : > { %v991_v36 = vadd.f32 %v976_v27, %v931_v12 }
 0x1ba   : > { %4925 = vmatpush1.bf16.msra.mxu0 %v4924_v8  ;;  %v6179_v47 = vadd.f32 %v5954_v41, %v991_v36 }
 0x1bb   : > { %4927 = vmatprep.subr.bf16.mxu0 %v4926_v40  ;;  %v1181_v40 = vld [vmem:[#allocation2 + $0x238] sm:$0xff] }
 0x1bc   : > { %v1013_v34 = vmax.f32 %v6179_v47, 0.0 }
 0x1be   : > { %4929 = vmatpush1.bf16.msra.mxu0 %v4928_v49  ;;  %v5449_v59 = vpack.i.bf16 %v1013_v34, %v1012_v17 }
 0x1f1   : > { %v5436_v26 = vpop.permute.xlu1 %5435 }
 0x1f2   : > { %v5438_v37 = vunpack.i.h.bf16 %v5436_v26  ;;  %v5437_v39 = vunpack.i.l.bf16 %v5436_v26  ;;  %v1176_v26 = vld [vmem:[#allocation2 + $0x210] sm:$0xff] }
 0x1f4   : > { %v1041_v14 = vsel %vm550_vm0, %v5437_v39, %v5438_v37 }
 0x1f5   : > { %v6181_v32 = vpop.permute.xlu0 %5440  ;;  %v6198_v21 = vmax.f32 %v1009_v24, %v1041_v14  ;;  %v1177_v24 = vld [vmem:[#allocation2 + $0x218] sm:$0xff] }
 0x1f6   : > { %v5443_v38 = vunpack.i.h.bf16 %v6181_v32  ;;  %v5442_v43 = vunpack.i.l.bf16 %v6181_v32 }
 0x1f8   : > { %v1042_v60 = vsel %vm550_vm0, %v5438_v37, %v5442_v43  ;;  %v1040_v15 = vsel %vm550_vm0, %v5443_v38, %v5437_v39 }
 0x1f9   : > { %v6194_v20 = vmax.f32 %v1008_v6, %v1040_v15  ;;  %v6202_v50 = vmax.f32 %v1010_v25, %v1042_v60  ;;  %v4930_v6 = vpack.c.bf16 %v1177_v24, %v1175_v51  ;;  %v549_v25 = vpop.permute.xlu1 %548  ;;  %v609_v29 = vpop.permute.xlu0 %608  ;;  %v4934_v51 = vpack.c.bf16 %v1181_v40, %v1179_v2  ;;  %v1203_v2 = vld [vmem:[#allocation2 + $0x2e8] sm:$0xff]  ;;  %v1205_v40 = vld [vmem:[#allocation2 + $0x2f8] sm:$0xff] }
 0x1fa   : > { %v557_v61 = vsel %vm550_vm0, %v6132_v19, %v549_v25  ;;  %v573_v28 = vadd.f32 %v549_v25, %v505_v54  ;;  %v617_v9 = vsel %vm610_vm1, %v6134_v53, %v609_v29  ;;  %v1178_v54 = vld [vmem:[#allocation2 + $0x220] sm:$0xff] }
 0x1fb   : > { %1071 = vrot.lane.b32.xlu1 %v6194_v20, %s5574_s27  ;;  %v5444_v45 = vpack.i.bf16 %v6202_v50, %v6198_v21  ;;  %4931 = vmatprep.subr.bf16.mxu0 %v4930_v6  ;;  %v572_v33 = vadd.f32 %v557_v61, %v504_v31 }
 0x1fc   : > { %v633_v1 = vadd.f32 %v609_v29, %v573_v28  ;;  %v1180_v29 = vld [vmem:[#allocation2 + $0x230] sm:$0xff] }
 0x1fd   : > { %5445 = vrot.lane.b32.xlu0 %v5444_v45, %s5574_s27  ;;  %v669_v5 = vpop.permute.xlu1 %668  ;;  %v632_v62 = vadd.f32 %v617_v9, %v572_v33  ;;  %v729_v22 = vpop.permute.xlu0 %728  ;;  %v4936_v56 = vpack.c.bf16 %v1180_v29, %v1178_v54  ;;  %v1182_v9 = vld [vmem:[#allocation2 + $0x240] sm:$0xff]  ;;  %v1187_v33 = vld [vmem:[#allocation2 + $0x268] sm:$0xff]  ;;  %v1212_v54 = vld [vmem:[#allocation2 + $0x330] sm:$0xff] }
 0x1fe   : > { %v693_v46 = vadd.f32 %v669_v5, %v633_v1  ;;  %v677_v11 = vsel %vm670_vm2, %v6136_v13, %v669_v5  ;;  %v737_v19 = vsel %vm730_vm3, %v6138_v16, %v729_v22  ;;  %v1174_v13 = vld [vmem:[#allocation2 + $0x200] sm:$0xff]  ;;  %v1189_v5 = vld [vmem:[#allocation2 + $0x278] sm:$0xff]  ;;  %v1215_v29 = vld [vmem:[#allocation2 + $0x348] sm:$0xff]  ;;  %vm2231_vm3 = vcmask 801792  }
 0x1ff   : > { %5450 = vrot.lane.b32.xlu1 %v5449_v59, %s5572_s30  ;;  %v692_v58 = vadd.f32 %v677_v11, %v632_v62  ;;  %v4942_v62 = vpack.c.bf16 %v1189_v5, %v1187_v33  ;;  %v1191_v11 = vld [vmem:[#allocation2 + $0x288] sm:$0xff]  ;;  %v1218_v5 = vld [vmem:[#allocation2 + $0x360] sm:$0xff] }
 0x200   : > { %v753_v57 = vadd.f32 %v729_v22, %v693_v46  ;;  %v1186_v46 = vld [vmem:[#allocation2 + $0x260] sm:$0xff]  ;;  %v1188_v22 = vld [vmem:[#allocation2 + $0x270] sm:$0xff] }
 0x201   : > { %968 = vrot.lane.b32.xlu0 %v945_v55, %s5579_s15  ;;  %v789_v0 = vpop.permute.xlu1 %788  ;;  %v752_v10 = vadd.f32 %v737_v19, %v692_v58  ;;  %v849_v35 = vpop.permute.xlu0 %848  ;;  %v4944_v58 = vpack.c.bf16 %v1188_v22, %v1186_v46  ;;  %v1225_v46 = vld [vmem:[#allocation2 + $0x398] sm:$0xff]  ;;  %s444_s15 = sand.u32 1, %s5550_s26  }
 0x202   : > { %v813_v27 = vadd.f32 %v789_v0, %v753_v57  ;;  %v797_v53 = vsel %vm790_vm4, %v6140_v18, %v789_v0  ;;  %v857_v12 = vsel %vm850_vm5, %v6142_v30, %v849_v35  ;;  %v4932_v30 = vpack.c.bf16 %v1176_v26, %v1174_v13  ;;  %v1193_v0 = vld [vmem:[#allocation2 + $0x298] sm:$0xff]  ;;  %v1190_v57 = vld [vmem:[#allocation2 + $0x280] sm:$0xff]  ;;  %s4204_s20 = scalar_lea.sflag [#allocation4], %s444_s15 }
 0x203   : > { %v812_v48 = vadd.f32 %v797_v53, %v752_v10  ;;  %v4946_v19 = vpack.c.bf16 %v1193_v0, %v1191_v11  ;;  %v1192_v10 = vld [vmem:[#allocation2 + $0x290] sm:$0xff]  ;;  %v1222_v0 = vld [vmem:[#allocation2 + $0x380] sm:$0xff]  ;;  %vm2331_vm4 = vcmask 793600   ;;  %vm2610_vm5 = vcmask 400384  }
 0x204   : > { %v873_v8 = vadd.f32 %v849_v35, %v813_v27  ;;  %v1197_v27 = vld [vmem:[#allocation2 + $0x2b8] sm:$0xff]  ;;  %v4948_v35 = vpack.c.bf16 %v1192_v10, %v1190_v57 }
 0x205   : > { %v909_v42 = vpop.permute.xlu1 %908  ;;  %v872_v37 = vadd.f32 %v857_v12, %v812_v48  ;;  %v1194_v48 = vld [vmem:[#allocation2 + $0x2a0] sm:$0xff]  ;;  %v1196_v12 = vld [vmem:[#allocation2 + $0x2b0] sm:$0xff]  ;;  %v1229_v57 = vld [vmem:[#allocation2 + $0x3b8] sm:$0xff] }
 0x206   : > { %v917_v18 = vsel %vm910_vm6, %v6155_v63, %v909_v42  ;;  %v933_v4 = vadd.f32 %v909_v42, %v873_v8  ;;  %v1195_v42 = vld [vmem:[#allocation2 + $0x2a8] sm:$0xff]  ;;  %v4952_v13 = vpack.c.bf16 %v1196_v12, %v1194_v48  ;;  %v1233_v48 = vld [vmem:[#allocation2 + $0x3d8] sm:$0xff]  ;;  %vm2706_vm6 = vcmask 1043456  }
 0x207   : > { %v932_v15 = vadd.f32 %v917_v18, %v872_v37  ;;  %v4950_v53 = vpack.c.bf16 %v1197_v27, %v1195_v42  ;;  %v1199_v8 = vld [vmem:[#allocation2 + $0x2c8] sm:$0xff]  ;;  %v1198_v37 = vld [vmem:[#allocation2 + $0x2c0] sm:$0xff] }
 0x208   : > { %v1226_v27 = vld [vmem:[#allocation2 + $0x3a0] sm:$0xff] }
 0x26d   : > { %v1072_v36 = vpop.permute.xlu1 %1071 }
 0x26f   : > { %v6233_v39 = vpop.permute.xlu0 %5445 }
 0x270   : > { %v5448_v16 = vunpack.i.h.bf16 %v6233_v39  ;;  %v5447_v7 = vunpack.i.l.bf16 %v6233_v39 }
 0x271   : > { %v6239_v52 = vpop.permute.xlu1 %5450 }
 0x272   : > { %v5453_v49 = vunpack.i.h.bf16 %v6239_v52  ;;  %v5452_v14 = vunpack.i.l.bf16 %v6239_v52  ;;  %v1088_v38 = vsel %vm670_vm2, %v5447_v7, %v5448_v16  ;;  %v1087_v60 = vsel %vm670_vm2, %v1072_v36, %v5447_v7  ;;  %v1201_v36 = vld [vmem:[#allocation2 + $0x2d8] sm:$0xff]  ;;  %v1200_v7 = vld [vmem:[#allocation2 + $0x2d0] sm:$0xff]  ;;  %v1242_v52 = vld [vmem:[#allocation2 + $0x420] sm:$0xff] }
 0x273   : > { %v969_v45 = vpop.permute.xlu0 %968  ;;  %v1103_v59 = vmax.f32 %v6198_v21, %v1088_v38  ;;  %v1102_v63 = vmax.f32 %v6194_v20, %v1087_v60  ;;  %v1185_v21 = vld [vmem:[#allocation2 + $0x258] sm:$0xff]  ;;  %v4954_v26 = vpack.c.bf16 %v1201_v36, %v1199_v8  ;;  %v4956_v18 = vpack.c.bf16 %v1200_v7, %v1198_v37  ;;  %v1207_v38 = vld [vmem:[#allocation2 + $0x308] sm:$0xff]  ;;  %v1230_v36 = vld [vmem:[#allocation2 + $0x3c0] sm:$0xff] }
 0x274   : > { %v1043_v24 = vsel %vm550_vm0, %v5442_v43, %v5452_v14  ;;  %v1044_v6 = vsel %vm550_vm0, %v5452_v14, %v5453_v49  ;;  %v977_v55 = vsel %vm970_vm7, %v6166_v3, %v969_v45  ;;  %v993_v25 = vadd.f32 %v969_v45, %v933_v4  ;;  %v1183_v43 = vld [vmem:[#allocation2 + $0x248] sm:$0xff]  ;;  %v1204_v14 = vld [vmem:[#allocation2 + $0x2f0] sm:$0xff]  ;;  %v1209_v60 = vld [vmem:[#allocation2 + $0x318] sm:$0xff] }
 0x275   : > { %v992_v61 = vadd.f32 %v977_v55, %v932_v15  ;;  %1417 = vmatprep.mubr.f32.mxu0 %v1103_v59  ;;  %v6259_v20 = vmax.f32 %v1011_v23, %v1043_v24  ;;  %v6263_v32 = vmax.f32 %v1012_v17, %v1044_v6  ;;  %v4938_v23 = vpack.c.bf16 %v1185_v21, %v1183_v43  ;;  %v1206_v59 = vld [vmem:[#allocation2 + $0x300] sm:$0xff]  ;;  %v1213_v24 = vld [vmem:[#allocation2 + $0x338] sm:$0xff] }
 0x276   : > { %1418 = vmatmul.mubr.f32.vlgmr.msra.gmra.mrb[0].mxu0 %v1102_v63  ;;  %v6266_v31 = vadd.f32 %v5954_v41, %v993_v25  ;;  %v4958_v4 = vpack.c.bf16 %v1205_v40, %v1203_v2  ;;  %v4962_v45 = vpack.c.bf16 %v1209_v60, %v1207_v38  ;;  %v1208_v63 = vld [vmem:[#allocation2 + $0x310] sm:$0xff]  ;;  %v1210_v25 = vld [vmem:[#allocation2 + $0x320] sm:$0xff]  ;;  %v1237_v37 = vld [vmem:[#allocation2 + $0x3f8] sm:$0xff]  ;;  %vm5588_vm7 = vmmov 0  }
 0x277   : > { %v5454_v3 = vpack.i.bf16 %v6263_v32, %v6259_v20  ;;  %v6271_v28 = vadd.f32 %v5954_v41, %v992_v61  ;;  %4933 = vmatpush1.bf16.msra.mxu0 %v4932_v30  ;;  %v4940_v41 = vpack.c.bf16 %v1184_v44, %v1182_v9  ;;  %v1202_v30 = vld [vmem:[#allocation2 + $0x2e0] sm:$0xff]  ;;  %v4964_v6 = vpack.c.bf16 %v1208_v63, %v1206_v59  ;;  %v1217_v61 = vld [vmem:[#allocation2 + $0x358] sm:$0xff]  ;;  %v1240_v63 = vld [vmem:[#allocation2 + $0x410] sm:$0xff] }
 0x278   : > { %4935 = vmatprep.subr.bf16.mxu0 %v4934_v51  ;;  %v1015_v1 = vmax.f32 %v6266_v31, 0.0  ;;  %v4960_v15 = vpack.c.bf16 %v1204_v14, %v1202_v30  ;;  %v1211_v51 = vld [vmem:[#allocation2 + $0x328] sm:$0xff]  ;;  %v4968_v43 = vpack.c.bf16 %v1212_v54, %v1210_v25  ;;  %v4970_v21 = vpack.c.bf16 %v1217_v61, %v1215_v29  ;;  %v1221_v9 = vld [vmem:[#allocation2 + $0x378] sm:$0xff]  ;;  %v1234_v40 = vld [vmem:[#allocation2 + $0x3e0] sm:$0xff] }
 0x279   : > { %5455 = vrot.lane.b32.xlu0 %v5454_v3, %s5574_s27  ;;  %v1014_v17 = vmax.f32 %v6271_v28, 0.0  ;;  %v4966_v55 = vpack.c.bf16 %v1213_v24, %v1211_v51  ;;  %v1214_v3 = vld [vmem:[#allocation2 + $0x340] sm:$0xff]  ;;  %v1241_v30 = vld [vmem:[#allocation2 + $0x418] sm:$0xff]  ;;  %v1243_v24 = vld [vmem:[#allocation2 + $0x428] sm:$0xff] }
 0x27a   : > { %v1238_v59 = vld [vmem:[#allocation2 + $0x400] sm:$0xff]  ;;  %v1251_v28 = vld [vmem:[#allocation2 + $0x468] sm:$0xff] }
 0x27b   : > { %1036 = vrot.lane.b32.xlu1 %v1014_v17, %s5572_s30  ;;  %4937 = vmatpush1.bf16.msra.mxu0 %v4936_v56  ;;  %v1216_v56 = vld [vmem:[#allocation2 + $0x350] sm:$0xff] }
 0x27c   : > { %4939 = vmatprep.subr.bf16.mxu0 %v4938_v23  ;;  %v1219_v23 = vld [vmem:[#allocation2 + $0x368] sm:$0xff]  ;;  %v4972_v44 = vpack.c.bf16 %v1216_v56, %v1214_v3  ;;  %v1244_v56 = vld [vmem:[#allocation2 + $0x430] sm:$0xff] }
 0x27d   : > { %1038 = vrot.lane.b32.xlu0 %v1015_v1, %s5572_s30  ;;  %v4974_v33 = vpack.c.bf16 %v1221_v9, %v1219_v23  ;;  %v1249_v23 = vld [vmem:[#allocation2 + $0x458] sm:$0xff]  ;;  %v1248_v9 = vld [vmem:[#allocation2 + $0x450] sm:$0xff] }
 0x27f   : > { %4941 = vmatpush1.bf16.msra.mxu0 %v4940_v41  ;;  %v1220_v41 = vld [vmem:[#allocation2 + $0x370] sm:$0xff] }
 0x280   : > { %4943 = vmatprep.subr.bf16.mxu0 %v4942_v62  ;;  %v1223_v62 = vld [vmem:[#allocation2 + $0x388] sm:$0xff]  ;;  %v4976_v22 = vpack.c.bf16 %v1220_v41, %v1218_v5  ;;  %v1250_v5 = vld [vmem:[#allocation2 + $0x460] sm:$0xff]  ;;  %v1252_v41 = vld [vmem:[#allocation2 + $0x470] sm:$0xff] }
 0x281   : > { %v4978_v11 = vpack.c.bf16 %v1225_v46, %v1223_v62  ;;  %v1255_v62 = vld [vmem:[#allocation2 + $0x488] sm:$0xff]  ;;  %v1257_v46 = vld [vmem:[#allocation2 + $0x498] sm:$0xff] }
 0x283   : > { %4945 = vmatpush1.bf16.msra.mxu0 %v4944_v58  ;;  %v1224_v58 = vld [vmem:[#allocation2 + $0x390] sm:$0xff] }
 0x284   : > { %4947 = vmatprep.subr.bf16.mxu0 %v4946_v19  ;;  %v1227_v19 = vld [vmem:[#allocation2 + $0x3a8] sm:$0xff]  ;;  %v4980_v10 = vpack.c.bf16 %v1224_v58, %v1222_v0  ;;  %v1254_v0 = vld [vmem:[#allocation2 + $0x480] sm:$0xff]  ;;  %v1256_v58 = vld [vmem:[#allocation2 + $0x490] sm:$0xff] }
 0x285   : > { %v4982_v42 = vpack.c.bf16 %v1229_v57, %v1227_v19  ;;  %v1259_v19 = vld [vmem:[#allocation2 + $0x4a8] sm:$0xff]  ;;  %v1261_v57 = vld [vmem:[#allocation2 + $0x4b8] sm:$0xff] }
 0x287   : > { %4949 = vmatpush1.bf16.msra.mxu0 %v4948_v35  ;;  %v1228_v35 = vld [vmem:[#allocation2 + $0x3b0] sm:$0xff] }
 0x288   : > { %4951 = vmatprep.subr.bf16.mxu0 %v4950_v53  ;;  %v1231_v53 = vld [vmem:[#allocation2 + $0x3c8] sm:$0xff]  ;;  %v4984_v12 = vpack.c.bf16 %v1228_v35, %v1226_v27  ;;  %v1258_v27 = vld [vmem:[#allocation2 + $0x4a0] sm:$0xff]  ;;  %v1260_v35 = vld [vmem:[#allocation2 + $0x4b0] sm:$0xff] }
 0x289   : > { %v4986_v8 = vpack.c.bf16 %v1233_v48, %v1231_v53  ;;  %v1263_v53 = vld [vmem:[#allocation2 + $0x4c8] sm:$0xff]  ;;  %v1265_v48 = vld [vmem:[#allocation2 + $0x4d8] sm:$0xff] }
 0x28b   : > { %4953 = vmatpush1.bf16.msra.mxu0 %v4952_v13  ;;  %v1232_v13 = vld [vmem:[#allocation2 + $0x3d0] sm:$0xff] }
 0x28c   : > { %4955 = vmatprep.subr.bf16.mxu0 %v4954_v26  ;;  %v1235_v26 = vld [vmem:[#allocation2 + $0x3e8] sm:$0xff]  ;;  %v4988_v7 = vpack.c.bf16 %v1232_v13, %v1230_v36  ;;  %v1262_v36 = vld [vmem:[#allocation2 + $0x4c0] sm:$0xff]  ;;  %v1264_v13 = vld [vmem:[#allocation2 + $0x4d0] sm:$0xff] }
 0x28d   : > { %v4990_v2 = vpack.c.bf16 %v1237_v37, %v1235_v26  ;;  %v1267_v26 = vld [vmem:[#allocation2 + $0x4e8] sm:$0xff]  ;;  %v1269_v37 = vld [vmem:[#allocation2 + $0x4f8] sm:$0xff] }
 0x28f   : > { %4957 = vmatpush1.bf16.msra.mxu0 %v4956_v18  ;;  %v1236_v18 = vld [vmem:[#allocation2 + $0x3f0] sm:$0xff] }
 0x290   : > { %4959 = vmatprep.subr.bf16.mxu0 %v4958_v4  ;;  %v1239_v4 = vld [vmem:[#allocation2 + $0x408] sm:$0xff]  ;;  %v4992_v14 = vpack.c.bf16 %v1236_v18, %v1234_v40  ;;  %v1266_v40 = vld [vmem:[#allocation2 + $0x4e0] sm:$0xff]  ;;  %v1268_v18 = vld [vmem:[#allocation2 + $0x4f0] sm:$0xff] }
 0x291   : > { %v4994_v38 = vpack.c.bf16 %v1241_v30, %v1239_v4  ;;  %v1271_v4 = vld [vmem:[#allocation2 + $0x508] sm:$0xff]  ;;  %v1273_v30 = vld [vmem:[#allocation2 + $0x518] sm:$0xff] }
 0x293   : > { %4961 = vmatpush1.bf16.msra.mxu0 %v4960_v15 }
 0x294   : > { %4963 = vmatprep.subr.bf16.mxu0 %v4962_v45 }
 0x297   : > { %4965 = vmatpush1.bf16.msra.mxu0 %v4964_v6  ;;  %v1245_v6 = vld [vmem:[#allocation2 + $0x438] sm:$0xff] }
 0x298   : > { %4967 = vmatprep.subr.bf16.mxu0 %v4966_v55 }
 0x29b   : > { %4969 = vmatpush1.bf16.msra.mxu0 %v4968_v43 }
 0x29c   : > { %4971 = vmatprep.subr.bf16.mxu0 %v4970_v21  ;;  %v4996_v21 = vpack.c.bf16 %v1240_v63, %v1238_v59  ;;  %v1272_v59 = vld [vmem:[#allocation2 + $0x510] sm:$0xff]  ;;  %v1275_v63 = vld [vmem:[#allocation2 + $0x528] sm:$0xff] }
 0x29f   : > { %4973 = vmatpush1.bf16.msra.mxu0 %v4972_v44 }
 0x2a0   : > { %4975 = vmatprep.subr.bf16.mxu0 %v4974_v33 }
 0x2a3   : > { %4977 = vmatpush1.bf16.msra.mxu0 %v4976_v22  ;;  %v5008_v22 = vpack.c.bf16 %v1252_v41, %v1250_v5 }
 0x2a4   : > { %4979 = vmatprep.subr.bf16.mxu0 %v4978_v11  ;;  %v5010_v11 = vpack.c.bf16 %v1257_v46, %v1255_v62  ;;  %v1290_v62 = vld [vmem:[#allocation2 + $0x5a0] sm:$0xff]  ;;  %v1292_v46 = vld [vmem:[#allocation2 + $0x5b0] sm:$0xff] }
 0x2a7   : > { %4981 = vmatpush1.bf16.msra.mxu0 %v4980_v10  ;;  %v5012_v10 = vpack.c.bf16 %v1256_v58, %v1254_v0  ;;  %v5048_v0 = vpack.c.bf16 %v1292_v46, %v1290_v62  ;;  %v1326_v62 = vld [vmem:[#allocation2 + $0x6c0] sm:$0xff]  ;;  %v1328_v46 = vld [vmem:[#allocation2 + $0x6d0] sm:$0xff] }
 0x2a8   : > { %4983 = vmatprep.subr.bf16.mxu0 %v4982_v42  ;;  %v5014_v42 = vpack.c.bf16 %v1261_v57, %v1259_v19  ;;  %v1294_v19 = vld [vmem:[#allocation2 + $0x5c0] sm:$0xff]  ;;  %v1296_v57 = vld [vmem:[#allocation2 + $0x5d0] sm:$0xff] }
 0x2ab   : > { %4985 = vmatpush1.bf16.msra.mxu0 %v4984_v12  ;;  %v5016_v12 = vpack.c.bf16 %v1260_v35, %v1258_v27  ;;  %v5052_v27 = vpack.c.bf16 %v1296_v57, %v1294_v19  ;;  %v1330_v19 = vld [vmem:[#allocation2 + $0x6e0] sm:$0xff]  ;;  %v1332_v57 = vld [vmem:[#allocation2 + $0x6f0] sm:$0xff] }
 0x2ac   : > { %4987 = vmatprep.subr.bf16.mxu0 %v4986_v8  ;;  %v5018_v8 = vpack.c.bf16 %v1265_v48, %v1263_v53  ;;  %v1298_v53 = vld [vmem:[#allocation2 + $0x5e0] sm:$0xff]  ;;  %v1300_v48 = vld [vmem:[#allocation2 + $0x5f0] sm:$0xff] }
 0x2af   : > { %4989 = vmatpush1.bf16.msra.mxu0 %v4988_v7  ;;  %v5020_v7 = vpack.c.bf16 %v1264_v13, %v1262_v36  ;;  %v5056_v36 = vpack.c.bf16 %v1300_v48, %v1298_v53  ;;  %v1334_v53 = vld [vmem:[#allocation2 + $0x700] sm:$0xff]  ;;  %v1336_v48 = vld [vmem:[#allocation2 + $0x710] sm:$0xff] }
 0x2b0   : > { %4991 = vmatprep.subr.bf16.mxu0 %v4990_v2  ;;  %v5022_v2 = vpack.c.bf16 %v1269_v37, %v1267_v26 }
 0x2b3   : > { %4993 = vmatpush1.bf16.msra.mxu0 %v4992_v14  ;;  %v5024_v14 = vpack.c.bf16 %v1268_v18, %v1266_v40  ;;  %v1304_v40 = vld [vmem:[#allocation2 + $0x610] sm:$0xff]  ;;  %v1307_v18 = vld [vmem:[#allocation2 + $0x628] sm:$0xff] }
 0x2b4   : > { %4995 = vmatprep.subr.bf16.mxu0 %v4994_v38  ;;  %v5026_v38 = vpack.c.bf16 %v1273_v30, %v1271_v4  ;;  %v1309_v4 = vld [vmem:[#allocation2 + $0x638] sm:$0xff] }
 0x2eb   : > { %v6282_v60 = vpop.permute.xlu0 %5455 }
 0x2ec   : > { %v5458_v15 = vunpack.i.h.bf16 %v6282_v60  ;;  %v5457_v45 = vunpack.i.l.bf16 %v6282_v60  ;;  %v1311_v60 = vld [vmem:[#allocation2 + $0x648] sm:$0xff] }
 0x2ed   : > { %v1037_v51 = vpop.permute.xlu1 %1036 }
 0x2ee   : > { %v1089_v55 = vsel %vm670_vm2, %v5448_v16, %v5457_v45  ;;  %v1045_v25 = vsel %vm550_vm0, %v5453_v49, %v1037_v51  ;;  %v1090_v54 = vsel %vm670_vm2, %v5457_v45, %v5458_v15  ;;  %v4998_v16 = vpack.c.bf16 %v1245_v6, %v1243_v24  ;;  %v1270_v45 = vld [vmem:[#allocation2 + $0x500] sm:$0xff] }
 0x2ef   : > { %v1104_v29 = vmax.f32 %v6202_v50, %v1089_v55  ;;  %v1039_v61 = vpop.permute.xlu0 %1038  ;;  %v1105_v43 = vmax.f32 %v6259_v20, %v1090_v54  ;;  %v6304_v49 = vmax.f32 %v1013_v34, %v1045_v25  ;;  %v1247_v20 = vld [vmem:[#allocation2 + $0x448] sm:$0xff]  ;;  %v1246_v34 = vld [vmem:[#allocation2 + $0x440] sm:$0xff]  ;;  %v5028_v24 = vpack.c.bf16 %v1272_v59, %v1270_v45  ;;  %v1276_v25 = vld [vmem:[#allocation2 + $0x530] sm:$0xff] }
 0x2f0   : > { %v1046_v3 = vsel %vm550_vm0, %v1037_v51, %v1039_v61  ;;  %v6300_v39 = vmax.f32 %v1015_v1, %v1039_v61  ;;  %v5000_v1 = vpack.c.bf16 %v1244_v56, %v1242_v52  ;;  %v5002_v47 = vpack.c.bf16 %v1249_v23, %v1247_v20  ;;  %v1277_v51 = vld [vmem:[#allocation2 + $0x538] sm:$0xff]  ;;  %v1274_v55 = vld [vmem:[#allocation2 + $0x520] sm:$0xff]  ;;  %v1279_v54 = vld [vmem:[#allocation2 + $0x548] sm:$0xff] }
 0x2f1   : > { %v6308_v50 = vmax.f32 %v1014_v17, %v1046_v3  ;;  %1488 = vmatprep.mubr.f32.mxu0 %v1105_v43  ;;  %v1253_v17 = vld [vmem:[#allocation2 + $0x478] sm:$0xff]  ;;  %v5004_v44 = vpack.c.bf16 %v1248_v9, %v1246_v34  ;;  %v5030_v6 = vpack.c.bf16 %v1277_v51, %v1275_v63  ;;  %v5032_v61 = vpack.c.bf16 %v1276_v25, %v1274_v55  ;;  %v1280_v3 = vld [vmem:[#allocation2 + $0x550] sm:$0xff]  ;;  %v1282_v23 = vld [vmem:[#allocation2 + $0x560] sm:$0xff] }
 0x2f2   : > { %1085 = vrot.lane.b32.xlu0 %v6300_v39, %s5574_s27  ;;  %1489 = vmatmul.mubr.f32.vlgmr.msra.gmra.mrb[0].mxu0 %v1104_v29  ;;  %v5006_v33 = vpack.c.bf16 %v1253_v17, %v1251_v28  ;;  %v1281_v29 = vld [vmem:[#allocation2 + $0x558] sm:$0xff]  ;;  %v1286_v28 = vld [vmem:[#allocation2 + $0x580] sm:$0xff]  ;;  %v1288_v17 = vld [vmem:[#allocation2 + $0x590] sm:$0xff]  ;;  %v5062_v51 = vpack.c.bf16 %v1309_v4, %v1307_v18 }
 0x2f3   : > { %v5459_v31 = vpack.i.bf16 %v6308_v50, %v6304_v49  ;;  %4997 = vmatpush1.bf16.msra.mxu0 %v4996_v21  ;;  %v5034_v43 = vpack.c.bf16 %v1281_v29, %v1279_v54  ;;  %v1278_v21 = vld [vmem:[#allocation2 + $0x540] sm:$0xff]  ;;  %v1285_v52 = vld [vmem:[#allocation2 + $0x578] sm:$0xff]  ;;  %v5044_v5 = vpack.c.bf16 %v1288_v17, %v1286_v28  ;;  %v1312_v29 = vld [vmem:[#allocation2 + $0x650] sm:$0xff] }
 0x2f4   : > { %4999 = vmatprep.subr.bf16.mxu0 %v4998_v16  ;;  %v1283_v16 = vld [vmem:[#allocation2 + $0x568] sm:$0xff]  ;;  %v5036_v56 = vpack.c.bf16 %v1280_v3, %v1278_v21  ;;  %v1313_v25 = vld [vmem:[#allocation2 + $0x658] sm:$0xff]  ;;  %v1314_v3 = vld [vmem:[#allocation2 + $0x660] sm:$0xff] }
 0x2f5   : > { %5460 = vrot.lane.b32.xlu1 %v5459_v31, %s5574_s27  ;;  %v5038_v20 = vpack.c.bf16 %v1285_v52, %v1283_v16  ;;  %v1284_v31 = vld [vmem:[#allocation2 + $0x570] sm:$0xff]  ;;  %v5066_v54 = vpack.c.bf16 %v1313_v25, %v1311_v60  ;;  %v1321_v52 = vld [vmem:[#allocation2 + $0x698] sm:$0xff]  ;;  %v1322_v28 = vld [vmem:[#allocation2 + $0x6a0] sm:$0xff] }
 0x2f6   : > { %v5040_v34 = vpack.c.bf16 %v1284_v31, %v1282_v23  ;;  %v1316_v16 = vld [vmem:[#allocation2 + $0x670] sm:$0xff]  ;;  %v1318_v23 = vld [vmem:[#allocation2 + $0x680] sm:$0xff]  ;;  %v1638_v25 = vld [vmem:[%s7124_s3 + $0x8] sm:$0xff] }
 0x2f7   : > { %5001 = vmatpush1.bf16.msra.mxu0 %v5000_v1  ;;  %v1287_v1 = vld [vmem:[#allocation2 + $0x588] sm:$0xff]  ;;  %v1320_v31 = vld [vmem:[#allocation2 + $0x690] sm:$0xff] }
 0x2f8   : > { %5003 = vmatprep.subr.bf16.mxu0 %v5002_v47  ;;  %v1289_v47 = vld [vmem:[#allocation2 + $0x598] sm:$0xff]  ;;  %v1324_v17 = vld [vmem:[#allocation2 + $0x6b0] sm:$0xff] }
 0x2f9   : > { %v5042_v9 = vpack.c.bf16 %v1289_v47, %v1287_v1  ;;  %v1323_v1 = vld [vmem:[#allocation2 + $0x6a8] sm:$0xff]  ;;  %v1325_v47 = vld [vmem:[#allocation2 + $0x6b8] sm:$0xff] }
 0x2fb   : > { %5005 = vmatpush1.bf16.msra.mxu0 %v5004_v44  ;;  %v1291_v44 = vld [vmem:[#allocation2 + $0x5a8] sm:$0xff] }
 0x2fc   : > { %5007 = vmatprep.subr.bf16.mxu0 %v5006_v33  ;;  %v1293_v33 = vld [vmem:[#allocation2 + $0x5b8] sm:$0xff] }
 0x2fd   : > { %v5046_v41 = vpack.c.bf16 %v1293_v33, %v1291_v44  ;;  %v1327_v44 = vld [vmem:[#allocation2 + $0x6c8] sm:$0xff]  ;;  %v1329_v33 = vld [vmem:[#allocation2 + $0x6d8] sm:$0xff] }
 0x2ff   : > { %5009 = vmatpush1.bf16.msra.mxu0 %v5008_v22  ;;  %v1295_v22 = vld [vmem:[#allocation2 + $0x5c8] sm:$0xff] }
 0x300   : > { %5011 = vmatprep.subr.bf16.mxu0 %v5010_v11  ;;  %v1297_v11 = vld [vmem:[#allocation2 + $0x5d8] sm:$0xff] }
 0x301   : > { %v5050_v58 = vpack.c.bf16 %v1297_v11, %v1295_v22  ;;  %v1331_v22 = vld [vmem:[#allocation2 + $0x6e8] sm:$0xff]  ;;  %v1333_v11 = vld [vmem:[#allocation2 + $0x6f8] sm:$0xff] }
 0x303   : > { %5013 = vmatpush1.bf16.msra.mxu0 %v5012_v10  ;;  %v1299_v10 = vld [vmem:[#allocation2 + $0x5e8] sm:$0xff] }
 0x304   : > { %5015 = vmatprep.subr.bf16.mxu0 %v5014_v42  ;;  %v1301_v42 = vld [vmem:[#allocation2 + $0x5f8] sm:$0xff] }
 0x305   : > { %v5054_v35 = vpack.c.bf16 %v1301_v42, %v1299_v10  ;;  %v1335_v10 = vld [vmem:[#allocation2 + $0x708] sm:$0xff]  ;;  %v1337_v42 = vld [vmem:[#allocation2 + $0x718] sm:$0xff] }
 0x307   : > { %5017 = vmatpush1.bf16.msra.mxu0 %v5016_v12  ;;  %v1303_v12 = vld [vmem:[#allocation2 + $0x608] sm:$0xff] }
 0x308   : > { %5019 = vmatprep.subr.bf16.mxu0 %v5018_v8  ;;  %v1305_v8 = vld [vmem:[#allocation2 + $0x618] sm:$0xff] }
 0x309   : > { %v5058_v13 = vpack.c.bf16 %v1305_v8, %v1303_v12  ;;  %v1339_v12 = vld [vmem:[#allocation2 + $0x728] sm:$0xff]  ;;  %v1341_v8 = vld [vmem:[#allocation2 + $0x738] sm:$0x1f] }
 0x30b   : > { %5021 = vmatpush1.bf16.msra.mxu0 %v5020_v7 }
 0x30c   : > { %5023 = vmatprep.subr.bf16.mxu0 %v5022_v2  ;;  %v1302_v2 = vld [vmem:[#allocation2 + $0x600] sm:$0xff] }
 0x30d   : > { %v5060_v63 = vpack.c.bf16 %v1304_v40, %v1302_v2  ;;  %v1340_v2 = vld [vmem:[#allocation2 + $0x730] sm:$0x1f] }
 0x30f   : > { %5025 = vmatpush1.bf16.msra.mxu0 %v5024_v14 }
 0x310   : > { %5027 = vmatprep.subr.bf16.mxu0 %v5026_v38 }
 0x313   : > { %5029 = vmatpush1.bf16.msra.mxu0 %v5028_v24  ;;  %v1306_v24 = vld [vmem:[#allocation2 + $0x620] sm:$0xff] }
 0x314   : > { %5031 = vmatprep.subr.bf16.mxu0 %v5030_v6  ;;  %v1308_v6 = vld [vmem:[#allocation2 + $0x630] sm:$0xff] }
 0x317   : > { %5033 = vmatpush1.bf16.msra.mxu0 %v5032_v61  ;;  %v1317_v61 = vld [vmem:[#allocation2 + $0x678] sm:$0xff] }
 0x318   : > { %5035 = vmatprep.subr.bf16.mxu0 %v5034_v43 }
 0x31b   : > { %5037 = vmatpush1.bf16.msra.mxu0 %v5036_v56  ;;  %v5072_v56 = vpack.c.bf16 %v1316_v16, %v1314_v3  ;;  %v4310_v16 = vld [vmem:[%s7124_s3 + $0x38] sm:$0xff] }
 0x31c   : > { %5039 = vmatprep.subr.bf16.mxu0 %v5038_v20 }
 0x31f   : > { %5041 = vmatpush1.bf16.msra.mxu0 %v5040_v34  ;;  %v5076_v34 = vpack.c.bf16 %v1320_v31, %v1318_v23  ;;  %v4316_v23 = vld [vmem:[%s7124_s3 + $0x48] sm:$0xff] }
 0x320   : > { %5043 = vmatprep.subr.bf16.mxu0 %v5042_v9  ;;  %v5078_v9 = vpack.c.bf16 %v1325_v47, %v1323_v1  ;;  %v4321_v1 = vld [vmem:[%s7124_s3 + $0x50] sm:$0xff] }
 0x323   : > { %5045 = vmatpush1.bf16.msra.mxu0 %v5044_v5  ;;  %v5080_v5 = vpack.c.bf16 %v1324_v17, %v1322_v28  ;;  %v4327_v17 = vld [vmem:[%s7124_s3 + $0x60] sm:$0xff] }
 0x324   : > { %5047 = vmatprep.subr.bf16.mxu0 %v5046_v41  ;;  %v5082_v41 = vpack.c.bf16 %v1329_v33, %v1327_v44 }
 0x327   : > { %5049 = vmatpush1.bf16.msra.mxu0 %v5048_v0  ;;  %v5084_v0 = vpack.c.bf16 %v1328_v46, %v1326_v62  ;;  %v4333_v62 = vld [vmem:[%s7124_s3 + $0x70] sm:$0xff] }
 0x328   : > { %5051 = vmatprep.subr.bf16.mxu0 %v5050_v58  ;;  %v5086_v58 = vpack.c.bf16 %v1333_v11, %v1331_v22  ;;  %v4334_v22 = vld [vmem:[%s7124_s3 + $0x78] sm:$0xff]  ;;  %v4339_v11 = vld [vmem:[%s7124_s3 + $0x80] sm:$0xff] }
 0x32b   : > { %5053 = vmatpush1.bf16.msra.mxu0 %v5052_v27  ;;  %v5088_v27 = vpack.c.bf16 %v1332_v57, %v1330_v19 }
 0x32c   : > { %5055 = vmatprep.subr.bf16.mxu0 %v5054_v35  ;;  %v5090_v35 = vpack.c.bf16 %v1337_v42, %v1335_v10 }
 0x32f   : > { %5057 = vmatpush1.bf16.msra.mxu0 %v5056_v36  ;;  %v5092_v36 = vpack.c.bf16 %v1336_v48, %v1334_v53 }
 0x330   : > { %5059 = vmatprep.subr.bf16.mxu0 %v5058_v13  ;;  %v5094_v13 = vpack.c.bf16 %v1341_v8, %v1339_v12  ;;  %v2524_v12 = vld [vmem:[%s7125_s4 + $0x8] sm:$0xff]  ;;  %v2587_v8 = vld [vmem:[%s7127_s6] sm:$0xff] }
 0x364   : > { %v6319_v30 = vpop.permute.xlu0 %1085 }
 0x365   : > { %v1109_v55 = vmax.f32 %v6300_v39, %v6319_v30  ;;  %v1319_v39 = vld [vmem:[#allocation2 + $0x688] sm:$0xff] }
 0x366   : > { %v5074_v20 = vpack.c.bf16 %v1321_v52, %v1319_v39  ;;  %v4315_v52 = vld [vmem:[%s7124_s3 + $0x40] sm:$0xff] }
 0x367   : > { %v6315_v26 = vpop.permute.xlu1 %5460 }
 0x368   : > { %v5463_v37 = vunpack.i.h.bf16 %v6315_v26  ;;  %v5462_v7 = vunpack.i.l.bf16 %v6315_v26 }
 0x36a   : > { %v1091_v14 = vsel %vm670_vm2, %v5458_v15, %v5462_v7  ;;  %v1092_v38 = vsel %vm670_vm2, %v5462_v7, %v5463_v37  ;;  %v5064_v15 = vpack.c.bf16 %v1308_v6, %v1306_v24  ;;  %v1338_v7 = vld [vmem:[#allocation2 + $0x720] sm:$0xff]  ;;  %v1093_v18 = vsel %vm670_vm2, %v5463_v37, %v6319_v30  ;;  %v4293_v30 = vld [vmem:[%s7124_s3 + $0x10] sm:$0xff] }
 0x36b   : > { %v1106_v45 = vmax.f32 %v6263_v32, %v1091_v14  ;;  %v1107_v59 = vmax.f32 %v6304_v49, %v1092_v38  ;;  %v1310_v32 = vld [vmem:[#allocation2 + $0x640] sm:$0xff]  ;;  %v1315_v49 = vld [vmem:[#allocation2 + $0x668] sm:$0xff]  ;;  %v5097_v40 = vpack.c.bf16 %v1340_v2, %v1338_v7  ;;  %v1108_v4 = vmax.f32 %v6308_v50, %v1093_v18 }
 0x36c   : > { %v5068_v43 = vpack.c.bf16 %v1312_v29, %v1310_v32  ;;  %v5070_v21 = vpack.c.bf16 %v1317_v61, %v1315_v49  ;;  %v5581_v14 = vmov 0.0   ;;  %v2523_v50 = vld [vmem:[%s7125_s4] sm:$0xff]  ;;  %v4304_v49 = vld [vmem:[%s7124_s3 + $0x28] sm:$0xff]  ;;  %v5587_v7 = vmov 0.0|0.0  }
 0x36d   : > { %1559 = vmatprep.mubr.f32.mxu0 %v1107_v59  ;;  %1725 = vmatprep.mubr.f32.mxu1 %v5581_v14  ;;  %v1637_v6 = vld [vmem:[%s7124_s3] sm:$0xff] }
 0x36e   : > { %1560 = vmatmul.mubr.f32.vlgmr.msra.gmra.mrb[0].mxu0 %v1106_v45 }
 0x36f   : > { %5061 = vmatpush1.bf16.msra.mxu0 %v5060_v63  ;;  %4292 = vmatprep.mubr.msk.f32.mxu0 %vm1342_vm8, %v1109_v55 }
 0x370   : > { %5063 = vmatprep.subr.bf16.mxu0 %v5062_v51  ;;  %v4294_v51 = vld [vmem:[%s7124_s3 + $0x18] sm:$0xff] }
 0x373   : > { %5065 = vmatpush1.bf16.msra.mxu0 %v5064_v15 }
 0x374   : > { %5067 = vmatprep.subr.bf16.mxu0 %v5066_v54  ;;  %v4303_v54 = vld [vmem:[%s7124_s3 + $0x20] sm:$0xff] }
 0x377   : > { %5069 = vmatpush1.bf16.msra.mxu0 %v5068_v43  ;;  %v4309_v43 = vld [vmem:[%s7124_s3 + $0x30] sm:$0xff] }
 0x378   : > { %5071 = vmatprep.subr.bf16.mxu0 %v5070_v21 }
 0x37b   : > { %5073 = vmatpush1.bf16.msra.mxu0 %v5072_v56 }
 0x37c   : > { %5075 = vmatprep.subr.bf16.mxu0 %v5074_v20 }
 0x37f   : > { %5077 = vmatpush1.bf16.msra.mxu0 %v5076_v34 }
 0x380   : > { %5079 = vmatprep.subr.bf16.mxu0 %v5078_v9  ;;  %v4322_v9 = vld [vmem:[%s7124_s3 + $0x58] sm:$0xff] }
 0x383   : > { %5081 = vmatpush1.bf16.msra.mxu0 %v5080_v5  ;;  %v4328_v5 = vld [vmem:[%s7124_s3 + $0x68] sm:$0xff] }
 0x384   : > { %5083 = vmatprep.subr.bf16.mxu0 %v5082_v41 }
 0x387   : > { %5085 = vmatpush1.bf16.msra.mxu0 %v5084_v0  ;;  %v4340_v0 = vld [vmem:[%s7124_s3 + $0x88] sm:$0xff] }
 0x388   : > { %5087 = vmatprep.subr.bf16.mxu0 %v5086_v58 }
 0x38b   : > { %5089 = vmatpush1.bf16.msra.mxu0 %v5088_v27 }
 0x38c   : > { %5091 = vmatprep.subr.bf16.mxu0 %v5090_v35 }
 0x38f   : > { %5093 = vmatpush1.bf16.msra.mxu0 %v5092_v36  ;;  %v2588_v36 = vld [vmem:[%s7127_s6 + $0x8] sm:$0xff] }
 0x390   : > { %5096 = vmatprep.subr.msk.bf16.mxu0 %vm5095_vm11, %v5094_v13  ;;  %v2589_v13 = vld [vmem:[%s7127_s6 + $0x10] sm:$0xff]  ;;  %v5101_v2 = vpack.c.bf16 %v2588_v36, %v2587_v8 }
 0x393   : > { %5099 = vmatpush1.bf16.msk.msra.mxu0 %vm5095_vm11, %v5097_v40  ;;  %v2590_v40 = vld [vmem:[%s7127_s6 + $0x18] sm:$0xff] }
 0x394   : > { %5229 = vmatprep.subr.bf16.mxu0 %v5587_v7  ;;  %v5104_v18 = vpack.c.bf16 %v2590_v40, %v2589_v13  ;;  %v4350_v40 = vld [vmem:[%s7128_s7 + $0x28] sm:$0xff] }
 0x396   : > { %1631 = vmatmul.mubr.f32.vlgmr.msra.gmra.mrb[0].mxu0 %v1108_v4  ;;  %v2591_v4 = vld [vmem:[%s7127_s6 + $0x20] sm:$0xff] }
 0x397   : > { %4828 = vmatprep.mubr.msk.f32.mxu0 %vm5588_vm7, %v5581_v14 }
 0x469   : > { %v1632_v38 = vpop.f32.mrb[0].mxu0 }
 0x46a   : > { %1644 = vrot.lane.b32.xlu1 %v1632_v38, %s5572_s30  ;;  %v1634_v45 = vpop.f32.mrb[1].mxu0 }
 0x46b   : > { %1646 = vrot.lane.b32.xlu0 %v1634_v45, %s5572_s30 }
 0x46e   : > { %1828 = vrot.lane.b32.xlu1 %v1632_v38, %s5573_s16 }
 0x46f   : > { %1830 = vrot.lane.b32.xlu0 %v1634_v45, %s5573_s16 }
 0x472   : > { %1927 = vrot.lane.b32.xlu1 %v1632_v38, %s5582_s21 }
 0x473   : > { %1929 = vrot.lane.b32.xlu0 %v1634_v45, %s5582_s21 }
 0x476   : > { %2027 = vrot.lane.b32.xlu1 %v1632_v38, %s5583_s17 }
 0x477   : > { %2029 = vrot.lane.b32.xlu0 %v1634_v45, %s5583_s17  ;;  %s4455_s17 = sshll.u32 %s5681_s29, 4  ;;  %s5589_s29 = smov [#allocation5]  }
 0x47a   : > { %2127 = vrot.lane.b32.xlu1 %v1632_v38, %s5584_s24 }
 0x47b   : > { %2129 = vrot.lane.b32.xlu0 %v1634_v45, %s5584_s24  ;;  %s445_s24 = scalar_lea.vmem [#allocation5], %s444_s15 }
 0x47e   : > { %2227 = vrot.lane.b32.xlu1 %v1632_v38, %s5585_s14 }
 0x47f   : > { %2229 = vrot.lane.b32.xlu0 %v1634_v45, %s5585_s14  ;;  %s4216_s14 = sshll.u32 %s445_s24, 4  ;;  %s7081_s14 = int_to_ptr.vmem [resolvable:$true] %s4216_s14 }
 0x480   : > { %s5492_s23 = scalar_lea.vmem %s7081_s14, 16 }
 0x481   : > { %p5493_p6 = scmp.ne.s32.totalorder %s7081_s14, %s5492_s23 }
 0x482   : > { %2327 = vrot.lane.b32.xlu1 %v1632_v38, %s5586_s22 }
 0x483   : > { %2329 = vrot.lane.b32.xlu0 %v1634_v45, %s5586_s22  ;;  %p5494_p10 = pnand %p5493_p6, %p7151_p9 }
 0x485   : > { %p5495_p12 = pneg %p5494_p10 }
 0x486   : > { %2427 = vrot.lane.b32.xlu1 %v1632_v38, %s5574_s27 }
 0x487   : > { %2429 = vrot.lane.b32.xlu0 %v1634_v45, %s5574_s27  ;;  %s5496_s27 = sshll.u32 %s5589_s29, 4  ;;  %s5497_s27 = int_to_ptr.vmem [resolvable:$false] %s5496_s27 }
 0x488   : > { %p5499_p2 = scmp.lt.s32.totalorder %s7081_s14, %s5497_s27 }
 0x48a   : > { %2527 = vperm.xlu1 %5433, %v2523_v50   ;;  %v2593_v50 = vld [vmem:[%s7127_s6 + $0x30] sm:$0xff] }
 0x4dc   : > { %v1645_v26 = vpop.permute.xlu1 %1644 }
 0x4dd   : > { %v1647_v37 = vpop.permute.xlu0 %1646 }
 0x4de   : > { %4295 = vmatprep.subr.msk.mxu1 %vm1656_vm12, %v1647_v37  ;;  %v1648_v59 = vsel %vm550_vm0, %v1645_v26, %v1647_v37  ;;  %v2594_v26 = vld [vmem:[%s7127_s6 + $0x38] sm:$0xff] }
 0x4df   : > { %4296 = vmatpush1.msk.msra.mxu1 %vm1656_vm12, %v1648_v59  ;;  %v5110_v37 = vpack.c.bf16 %v2594_v26, %v2593_v50  ;;  %v2596_v59 = vld [vmem:[%s7127_s6 + $0x48] sm:$0xff] }
 0x4e0   : > { %4297 = vmatmul.mubr.msk.f32.vlgmr.msra.gmra.mrb[0].mxu1 %vm1649_vm13, %v4293_v30  ;;  %4299 = vmatprep.subr.msk.mxu1 %vm1656_vm12, %v1634_v45  ;;  %v1829_v24 = vpop.permute.xlu1 %1828  ;;  %v2595_v30 = vld [vmem:[%s7127_s6 + $0x40] sm:$0xff] }
 0x4e1   : > { %4300 = vmatpush1.msk.msra.mxu1 %vm1656_vm12, %v1632_v38  ;;  %v1831_v63 = vpop.permute.xlu0 %1830  ;;  %1731 = vmatprep.mubr.f32.mxu1 %v5581_v14  ;;  %v2592_v38 = vld [vmem:[%s7127_s6 + $0x28] sm:$0xff] }
 0x4e2   : > { %4305 = vmatprep.subr.msk.mxu1 %vm1656_vm12, %v1831_v63  ;;  %v1832_v55 = vsel %vm610_vm1, %v1829_v24, %v1831_v63  ;;  %vm2131_vm1 = vcmask 908288   ;;  %v5107_v45 = vpack.c.bf16 %v2592_v38, %v2591_v4  ;;  %v5113_v63 = vpack.c.bf16 %v2596_v59, %v2595_v30  ;;  %v2598_v24 = vld [vmem:[%s7127_s6 + $0x58] sm:$0xff]  ;;  %v4357_v30 = vld [vmem:[%s7128_s7 + $0x50] sm:$0xff] }
 0x4e3   : > { %v4352_v38 = vld [vmem:[%s7128_s7 + $0x38] sm:$0xff] }
 0x4e4   : > { %4298 = vmatmul.mubr.msk.f32.gmra.mrb[2].mxu1 %vm1649_vm13, %v4294_v51  ;;  %v1928_v15 = vpop.permute.xlu1 %1927  ;;  %v2597_v51 = vld [vmem:[%s7127_s6 + $0x50] sm:$0xff]  ;;  %v4358_v59 = vld [vmem:[%s7128_s7 + $0x58] sm:$0xff] }
 0x4e5   : > { %1812 = vmatprep.mubr.f32.mxu1 %v5581_v14  ;;  %v1930_v60 = vpop.permute.xlu0 %1929 }
 0x4e6   : > { %v1932_v32 = vsel %vm1931_vm14, %v1928_v15, %v1930_v60  ;;  %v2601_v15 = vld [vmem:[%s7127_s6 + $0x70] sm:$0xff] }
 0x4e8   : > { %4301 = vmatmul.mubr.msk.f32.vlgmr.msra.gmra.mrb[0].mxu1 %vm1649_vm13, %v1637_v6  ;;  %v2028_v61 = vpop.permute.xlu1 %2027  ;;  %v5116_v6 = vpack.c.bf16 %v2598_v24, %v2597_v51  ;;  %v5146_v51 = vpack.c.bf16 %v4358_v59, %v4357_v30  ;;  %v4031_v59 = vld [vmem:[%s7130_s9 + $0x20] sm:$0xff] }
 0x4e9   : > { %4306 = vmatpush1.msk.msra.mxu1 %vm1656_vm12, %v1832_v55  ;;  %1818 = vmatprep.mubr.f32.mxu1 %v5581_v14  ;;  %v2030_v29 = vpop.permute.xlu0 %2029  ;;  %v2599_v55 = vld [vmem:[%s7127_s6 + $0x60] sm:$0xff] }
 0x4ea   : > { %4311 = vmatprep.subr.msk.mxu1 %vm1656_vm12, %v1930_v60  ;;  %v2032_v21 = vsel %vm2031_vm15, %v2028_v61, %v2030_v29  ;;  %v2600_v60 = vld [vmem:[%s7127_s6 + $0x68] sm:$0xff] }
 0x4ec   : > { %4302 = vmatmul.mubr.msk.f32.gmra.mrb[2].mxu1 %vm1649_vm13, %v1638_v25  ;;  %v2128_v39 = vpop.permute.xlu1 %2127  ;;  %v5119_v25 = vpack.c.bf16 %v2600_v60, %v2599_v55  ;;  %v4360_v55 = vld [vmem:[%s7128_s7 + $0x68] sm:$0xff] }
 0x4ed   : > { %1907 = vmatprep.mubr.f32.mxu1 %v5581_v14  ;;  %v2130_v3 = vpop.permute.xlu0 %2129 }
 0x4ee   : > { %v2132_v56 = vsel %vm2131_vm1, %v2128_v39, %v2130_v3  ;;  %v2608_v39 = vld [vmem:[%s7127_s6 + $0xa8] sm:$0xff] }
 0x4f0   : > { %4307 = vmatmul.mubr.msk.f32.vlgmr.msra.gmra.mrb[0].mxu1 %vm1649_vm13, %v4303_v54  ;;  %v2228_v31 = vpop.permute.xlu1 %2227  ;;  %v2602_v54 = vld [vmem:[%s7127_s6 + $0x78] sm:$0xff] }
 0x4f1   : > { %4312 = vmatpush1.msk.msra.mxu1 %vm1656_vm12, %v1932_v32  ;;  %1913 = vmatprep.mubr.f32.mxu1 %v5581_v14  ;;  %v2230_v20 = vpop.permute.xlu0 %2229  ;;  %v5122_v32 = vpack.c.bf16 %v2602_v54, %v2601_v15  ;;  %v4365_v15 = vld [vmem:[%s7128_s7 + $0x80] sm:$0xff]  ;;  %v4361_v54 = vld [vmem:[%s7128_s7 + $0x70] sm:$0xf] }
 0x4f2   : > { %4317 = vmatprep.subr.msk.mxu1 %vm1656_vm12, %v2030_v29  ;;  %v2232_v47 = vsel %vm2231_vm3, %v2228_v31, %v2230_v20  ;;  %v2603_v29 = vld [vmem:[%s7127_s6 + $0x80] sm:$0xff] }
 0x4f4   : > { %4308 = vmatmul.mubr.msk.f32.gmra.mrb[2].mxu1 %vm1649_vm13, %v4304_v49  ;;  %v2328_v28 = vpop.permute.xlu1 %2327  ;;  %v2604_v49 = vld [vmem:[%s7127_s6 + $0x88] sm:$0xff] }
 0x4f5   : > { %2007 = vmatprep.mubr.f32.mxu1 %v5581_v14  ;;  %v2330_v34 = vpop.permute.xlu0 %2329  ;;  %v5125_v61 = vpack.c.bf16 %v2604_v49, %v2603_v29  ;;  %v4366_v49 = vld [vmem:[%s7128_s7 + $0x88] sm:$0xff] }
 0x4f6   : > { %v2332_v44 = vsel %vm2331_vm4, %v2328_v28, %v2330_v34 }
 0x4f8   : > { %4313 = vmatmul.mubr.msk.f32.vlgmr.msra.gmra.mrb[0].mxu1 %vm1649_vm13, %v4309_v43  ;;  %v2428_v41 = vpop.permute.xlu1 %2427  ;;  %v2605_v43 = vld [vmem:[%s7127_s6 + $0x90] sm:$0xff] }
 0x4f9   : > { %4318 = vmatpush1.msk.msra.mxu1 %vm1656_vm12, %v2032_v21  ;;  %2013 = vmatprep.mubr.f32.mxu1 %v5581_v14  ;;  %v2430_v33 = vpop.permute.xlu0 %2429  ;;  %v2606_v21 = vld [vmem:[%s7127_s6 + $0x98] sm:$0xff] }
 0x4fa   : > { %4323 = vmatprep.subr.msk.mxu1 %vm1656_vm12, %v2130_v3  ;;  %v2431_v46 = vsel %vm670_vm2, %v2428_v41, %v2430_v33  ;;  %v5128_v3 = vpack.c.bf16 %v2606_v21, %v2605_v43  ;;  %vm2617_vm2 = vcmask 1040384   ;;  %v4371_v21 = vld [vmem:[%s7128_s7 + $0xa0] sm:$0xff] }
 0x4fc   : > { %4314 = vmatmul.mubr.msk.f32.gmra.mrb[2].mxu1 %vm1649_vm13, %v4310_v16  ;;  %v2607_v16 = vld [vmem:[%s7127_s6 + $0xa0] sm:$0xff] }
 0x4fd   : > { %2107 = vmatprep.mubr.f32.mxu1 %v5581_v14 }
 0x500   : > { %4319 = vmatmul.mubr.msk.f32.vlgmr.msra.gmra.mrb[0].mxu1 %vm1649_vm13, %v4315_v52  ;;  %v5131_v52 = vpack.c.bf16 %v2608_v39, %v2607_v16  ;;  %v4368_v16 = vld [vmem:[%s7128_s7 + $0x98] sm:$0xf] }
 0x501   : > { %4324 = vmatpush1.msk.msra.mxu1 %vm1656_vm12, %v2132_v56  ;;  %2113 = vmatprep.mubr.f32.mxu1 %v5581_v14  ;;  %v2609_v56 = vld [vmem:[%s7127_s6 + $0xb0] sm:$0x1] }
 0x502   : > { %4329 = vmatprep.subr.msk.mxu1 %vm1656_vm12, %v2230_v20 }
 0x504   : > { %4320 = vmatmul.mubr.msk.f32.gmra.mrb[2].mxu1 %vm1649_vm13, %v4316_v23 }
 0x505   : > { %2207 = vmatprep.mubr.f32.mxu1 %v5581_v14 }
 0x508   : > { %4325 = vmatmul.mubr.msk.f32.vlgmr.msra.gmra.mrb[0].mxu1 %vm1649_vm13, %v4321_v1 }
 0x509   : > { %4330 = vmatpush1.msk.msra.mxu1 %vm1656_vm12, %v2232_v47  ;;  %2213 = vmatprep.mubr.f32.mxu1 %v5581_v14  ;;  %v2528_v58 = vpop.permute.xlu1 %2527 }
 0x50a   : > { %4335 = vmatprep.subr.msk.mxu1 %vm1656_vm12, %v2330_v34 }
 0x50c   : > { %4326 = vmatmul.mubr.msk.f32.gmra.mrb[2].mxu1 %vm1649_vm13, %v4322_v9 }
 0x50d   : > { %2307 = vmatprep.mubr.f32.mxu1 %v5581_v14 }
 0x510   : > { %4331 = vmatmul.mubr.msk.f32.vlgmr.msra.gmra.mrb[0].mxu1 %vm1649_vm13, %v4327_v17 }
 0x511   : > { %4336 = vmatpush1.msk.msra.mxu1 %vm1656_vm12, %v2332_v44  ;;  %2313 = vmatprep.mubr.f32.mxu1 %v5581_v14 }
 0x512   : > { %4341 = vmatprep.subr.msk.mxu1 %vm1656_vm12, %v2430_v33 }
 0x514   : > { %4332 = vmatmul.mubr.msk.f32.gmra.mrb[2].mxu1 %vm1649_vm13, %v4328_v5 }
 0x515   : > { %2407 = vmatprep.mubr.f32.mxu1 %v5581_v14 }
 0x518   : > { %4337 = vmatmul.mubr.msk.f32.vlgmr.msra.gmra.mrb[0].mxu1 %vm1649_vm13, %v4333_v62 }
 0x519   : > { %4342 = vmatpush1.msk.msra.mxu1 %vm1656_vm12, %v2431_v46  ;;  %2413 = vmatprep.mubr.f32.mxu1 %v5581_v14 }
 0x51a   : > { %5100 = vmatprep.subr.bf16.mxu1 %v5587_v7 }
 0x51c   : > { %4338 = vmatmul.mubr.msk.f32.gmra.mrb[2].mxu1 %vm1649_vm13, %v4334_v22  ;;  %v2697_v22 = vld [vmem:[%s7128_s7] sm:$0xff] }
 0x51d   : > { %2506 = vmatprep.mubr.f32.mxu1 %v5581_v14 }
 0x520   : > { %4343 = vmatmul.mubr.msk.f32.vlgmr.msra.gmra.mrb[0].mxu1 %vm1649_vm13, %v4339_v11  ;;  %v2698_v11 = vld [vmem:[%s7128_s7 + $0x8] sm:$0xff] }
 0x521   : > { %2512 = vmatprep.mubr.f32.mxu1 %v5581_v14  ;;  %5102 = vmatpush1.bf16.msra.mxu1 %v5101_v2 }
 0x522   : > { %5103 = vmatprep.subr.bf16.mxu1 %v5587_v7 }
 0x524   : > { %4344 = vmatmul.mubr.msk.f32.gmra.mrb[2].mxu1 %vm1649_vm13, %v4340_v0  ;;  %v2699_v0 = vld [vmem:[%s7128_s7 + $0x10] sm:$0xff] }
 0x525   : > { %5105 = vmatpush1.bf16.msra.mxu1 %v5104_v18  ;;  %v4351_v18 = vld [vmem:[%s7128_s7 + $0x30] sm:$0xff] }
 0x526   : > { %5106 = vmatprep.subr.bf16.mxu1 %v5587_v7  ;;  %v5140_v4 = vpack.c.bf16 %v4351_v18, %v4350_v40  ;;  %v4402_v40 = vld [vmem:[%s7128_s7 + $0x158] sm:$0xff] }
 0x529   : > { %5108 = vmatpush1.bf16.msra.mxu1 %v5107_v45  ;;  %v4353_v45 = vld [vmem:[%s7128_s7 + $0x40] sm:$0xff] }
 0x52a   : > { %5109 = vmatprep.subr.bf16.mxu1 %v5587_v7 }
 0x52d   : > { %5111 = vmatpush1.bf16.msra.mxu1 %v5110_v37  ;;  %v5143_v37 = vpack.c.bf16 %v4353_v45, %v4352_v38  ;;  %v4027_v38 = vld [vmem:[%s7130_s9] sm:$0xff]  ;;  %v4028_v45 = vld [vmem:[%s7130_s9 + $0x8] sm:$0xff] }
 0x52e   : > { %5112 = vmatprep.subr.bf16.mxu1 %v5587_v7 }
 0x531   : > { %5114 = vmatpush1.bf16.msra.mxu1 %v5113_v63  ;;  %v4354_v63 = vld [vmem:[%s7128_s7 + $0x48] sm:$0xf] }
 0x532   : > { %5115 = vmatprep.subr.bf16.mxu1 %v5587_v7 }
 0x535   : > { %5117 = vmatpush1.bf16.msra.mxu1 %v5116_v6  ;;  %v4359_v6 = vld [vmem:[%s7128_s7 + $0x60] sm:$0xff] }
 0x536   : > { %5118 = vmatprep.subr.bf16.mxu1 %v5587_v7  ;;  %v5149_v60 = vpack.c.bf16 %v4360_v55, %v4359_v6  ;;  %v4034_v6 = vld [vmem:[%s7130_s9 + $0x38] sm:$0xff] }
 0x539   : > { %5120 = vmatpush1.bf16.msra.mxu1 %v5119_v25  ;;  %v4364_v25 = vld [vmem:[%s7128_s7 + $0x78] sm:$0xff] }
 0x53a   : > { %5121 = vmatprep.subr.bf16.mxu1 %v5587_v7 }
 0x53d   : > { %5123 = vmatpush1.bf16.msra.mxu1 %v5122_v32  ;;  %v5152_v32 = vpack.c.bf16 %v4365_v15, %v4364_v25  ;;  %v4036_v25 = vld [vmem:[%s7130_s9 + $0x48] sm:$0xff] }
 0x53e   : > { %5124 = vmatprep.subr.bf16.mxu1 %v5587_v7 }
 0x541   : > { %5126 = vmatpush1.bf16.msra.mxu1 %v5125_v61  ;;  %v4367_v61 = vld [vmem:[%s7128_s7 + $0x90] sm:$0xff] }
 0x542   : > { %5127 = vmatprep.subr.bf16.mxu1 %v5587_v7  ;;  %v5155_v43 = vpack.c.bf16 %v4367_v61, %v4366_v49  ;;  %v4039_v49 = vld [vmem:[%s7130_s9 + $0x60] sm:$0xff]  ;;  %v4040_v61 = vld [vmem:[%s7130_s9 + $0x68] sm:$0xff] }
 0x545   : > { %5129 = vmatpush1.bf16.msra.mxu1 %v5128_v3  ;;  %v4372_v3 = vld [vmem:[%s7128_s7 + $0xa8] sm:$0xff] }
 0x546   : > { %5130 = vmatprep.subr.bf16.mxu1 %v5587_v7  ;;  %v5158_v39 = vpack.c.bf16 %v4372_v3, %v4371_v21  ;;  %v4406_v21 = vld [vmem:[%s7128_s7 + $0x168] sm:$0xff]  ;;  %v4407_v3 = vld [vmem:[%s7128_s7 + $0x170] sm:$0xff] }
 0x549   : > { %5132 = vmatpush1.bf16.msra.mxu1 %v5131_v52 }
 0x54a   : > { %2665 = vmatprep.subr.mxu1 %v5581_v14 }
 0x54d   : > { %4345 = vmatpush1.msk.msra.mxu1 %vm2617_vm2, %v2609_v56  ;;  %v4373_v56 = vld [vmem:[%s7128_s7 + $0xb0] sm:$0xff] }
 0x54e   : > { %5133 = vmatprep.subr.bf16.mxu1 %v5587_v7 }
 0x5f3   : > { %v2508_v19 = vpop.f32.mrb[0].mxu1 }
 0x5f4   : > { %v6459_v57 = vadd.f32 %v2528_v58, %v2508_v19  ;;  %v2510_v10 = vpop.f32.mrb[1].mxu1  ;;  %v2700_v19 = vld [vmem:[%s7128_s7 + $0x18] sm:$0xff] }
 0x5f5   : > { %v6461_v42 = vadd.f32 %v2528_v58, %v2510_v10  ;;  %v5134_v58 = vpack.c.bf16 %v2698_v11, %v2697_v22  ;;  %v4387_v22 = vld [vmem:[%s7128_s7 + $0x100] sm:$0xff]  ;;  %v4388_v11 = vld [vmem:[%s7128_s7 + $0x108] sm:$0xff] }
 0x5f6   : > { %v2539_v27 = vmax.f32 %v6459_v57, 0.0  ;;  %v5137_v57 = vpack.c.bf16 %v2700_v19, %v2699_v0  ;;  %v5173_v0 = vpack.c.bf16 %v4388_v11, %v4387_v22  ;;  %v4393_v19 = vld [vmem:[%s7128_s7 + $0x120] sm:$0xff]  ;;  %v4422_v22 = vld [vmem:[%s7128_s7 + $0x1c8] sm:$0xff]  ;;  %v4423_v11 = vld [vmem:[%s7128_s7 + $0x1d0] sm:$0xff] }
 0x5f7   : > { %v2540_v35 = vmax.f32 %v6461_v42, 0.0  ;;  %v6465_v53 = vpop.f32.mrb[2].mxu1 }
 0x5f8   : > { %2547 = vrot.lane.b32.xlu0 %v2539_v27, %s5572_s30  ;;  %v6470_v48 = vpop.f32.mrb[3].mxu1 }
 0x5f9   : > { %2549 = vrot.lane.b32.xlu1 %v2540_v35, %s5572_s30 }
 0x5fc   : > { %2532 = vperm.xlu0 %5432, %v2524_v12  }
 0x66a   : > { %v2548_v20 = vpop.permute.xlu0 %2547 }
 0x66b   : > { %v2550_v23 = vpop.permute.xlu1 %2549 }
 0x66c   : > { %v2555_v31 = vsel %vm550_vm0, %v2548_v20, %v2550_v23  ;;  %v2562_v1 = vmax.f32 %v2540_v35, %v2550_v23  ;;  %v4374_v20 = vld [vmem:[%s7128_s7 + $0xb8] sm:$0xff] }
 0x66d   : > { %v2561_v47 = vmax.f32 %v2539_v27, %v2555_v31  ;;  %v5161_v23 = vpack.c.bf16 %v4374_v20, %v4373_v56  ;;  %v4378_v31 = vld [vmem:[%s7128_s7 + $0xc8] sm:$0xff] }
 0x66e   : > { %2571 = vrot.lane.b32.xlu0 %v2562_v1, %s5582_s21 }
 0x66f   : > { %2569 = vrot.lane.b32.xlu1 %v2561_v47, %s5582_s21 }
 0x67b   : > { %v2533_v34 = vpop.permute.xlu0 %2532 }
 0x67c   : > { %v2537_v9 = vadd.f32 %v2533_v34, %v6465_v53  ;;  %v2538_v28 = vadd.f32 %v2533_v34, %v6470_v48  ;;  %v2701_v48 = vld [vmem:[%s7128_s7 + $0x20] sm:$0xf] }
 0x67e   : > { %v2541_v17 = vmax.f32 %v2537_v9, 0.0  ;;  %v2542_v44 = vmax.f32 %v2538_v28, 0.0  ;;  %v4380_v28 = vld [vmem:[%s7128_s7 + $0xd8] sm:$0xff] }
 0x680   : > { %2551 = vrot.lane.b32.xlu1 %v2541_v17, %s5572_s30  ;;  %2553 = vrot.lane.b32.xlu0 %v2542_v44, %s5572_s30  ;;  %s7079_s30 = scalar_lea.hbm %s7134_s13, %s4455_s17 }
 0x6e0   : > { %v2572_v33 = vpop.permute.xlu0 %2571 }
 0x6e1   : > { %v2584_v5 = vmax.f32 %v2562_v1, %v2572_v33  ;;  %v2570_v41 = vpop.permute.xlu1 %2569  ;;  %v4379_v1 = vld [vmem:[%s7128_s7 + $0xd0] sm:$0xff] }
 0x6e2   : > { %v2577_v62 = vsel %vm1931_vm14, %v2570_v41, %v2572_v33  ;;  %v5164_v34 = vpack.c.bf16 %v4379_v1, %v4378_v31  ;;  %v4385_v33 = vld [vmem:[%s7128_s7 + $0xf0] sm:$0xff]  ;;  %v4382_v41 = vld [vmem:[%s7128_s7 + $0xe8] sm:$0xf]  ;;  %v4414_v1 = vld [vmem:[%s7128_s7 + $0x198] sm:$0xff] }
 0x6e3   : > { %v2583_v46 = vmax.f32 %v2561_v47, %v2577_v62  ;;  %4346 = vmatprep.mubr.msk.f32.mxu1 %vm2610_vm5, %v2584_v5  ;;  %v4375_v47 = vld [vmem:[%s7128_s7 + $0xc0] sm:$0xf]  ;;  %v4386_v5 = vld [vmem:[%s7128_s7 + $0xf8] sm:$0xff]  ;;  %v4413_v31 = vld [vmem:[%s7128_s7 + $0x190] sm:$0xff] }
 0x6e4   : > { %v5170_v62 = vpack.c.bf16 %v4386_v5, %v4385_v33  ;;  %v4420_v33 = vld [vmem:[%s7128_s7 + $0x1b8] sm:$0xff]  ;;  %v4421_v5 = vld [vmem:[%s7128_s7 + $0x1c0] sm:$0xff] }
 0x6e5   : > { %2686 = vmatmul.mubr.f32.vlgmr.msra.gmra.mrb[4].mxu1 %v2583_v46 }
 0x6e6   : > { %5135 = vmatpush3.bf16.msra.mxu1 %v5134_v58  ;;  %v4392_v58 = vld [vmem:[%s7128_s7 + $0x118] sm:$0xff] }
 0x6e7   : > { %5136 = vmatprep.subr.bf16.mxu1 %v5587_v7 }
 0x6ea   : > { %5138 = vmatpush3.bf16.msra.mxu1 %v5137_v57  ;;  %v4389_v57 = vld [vmem:[%s7128_s7 + $0x110] sm:$0xf] }
 0x6eb   : > { %4596 = vmatprep.subr.mxu1 %v5581_v14 }
 0x6ee   : > { %4597 = vmatpush3.msk.msra.mxu1 %vm2706_vm6, %v2701_v48  ;;  %v4399_v48 = vld [vmem:[%s7128_s7 + $0x140] sm:$0xff] }
 0x6ef   : > { %5139 = vmatprep.subr.bf16.mxu1 %v5587_v7 }
 0x6f2   : > { %v2552_v10 = vpop.permute.xlu1 %2551  ;;  %v2554_v42 = vpop.permute.xlu0 %2553 }
 0x6f3   : > { %v2556_v27 = vsel %vm550_vm0, %v2552_v10, %v2554_v42  ;;  %v2564_v35 = vmax.f32 %v2542_v44, %v2554_v42  ;;  %vm2702_vm0 = vcmask 293888   ;;  %v5176_v10 = vpack.c.bf16 %v4393_v19, %v4392_v58  ;;  %v4427_v58 = vld [vmem:[%s7128_s7 + $0x1e0] sm:$0xff]  ;;  %v4428_v19 = vld [vmem:[%s7128_s7 + $0x1e8] sm:$0xff] }
 0x6f4   : > { %v2563_v53 = vmax.f32 %v2541_v17, %v2556_v27  ;;  %v4381_v17 = vld [vmem:[%s7128_s7 + $0xe0] sm:$0xff]  ;;  %v4394_v27 = vld [vmem:[%s7128_s7 + $0x128] sm:$0xff] }
 0x6f5   : > { %2575 = vrot.lane.b32.xlu0 %v2564_v35, %s5582_s21  ;;  %v5167_v44 = vpack.c.bf16 %v4381_v17, %v4380_v28  ;;  %v4415_v28 = vld [vmem:[%s7128_s7 + $0x1a0] sm:$0xff]  ;;  %v4416_v17 = vld [vmem:[%s7128_s7 + $0x1a8] sm:$0xff] }
 0x6f6   : > { %2573 = vrot.lane.b32.xlu1 %v2563_v53, %s5582_s21  ;;  %s5498_s21 = scalar_lea.vmem %s5497_s27, 32 }
 0x6f7   : > { %p5500_p3 = scmp.lt.s32.totalorder %s5498_s21, %s5492_s23 }
 0x6f9   : > { %p5501_p4 = por %p5500_p3, %p5499_p2 }
 0x6fb   : > { %p5502_p7 = pnand %p5501_p4, %p5495_p12 }
 0x767   : > { %v2576_v12 = vpop.permute.xlu0 %2575 }
 0x768   : > { %v2586_v8 = vmax.f32 %v2564_v35, %v2576_v12  ;;  %v2574_v36 = vpop.permute.xlu1 %2573  ;;  %v4395_v35 = vld [vmem:[%s7128_s7 + $0x130] sm:$0xff] }
 0x769   : > { %v2578_v13 = vsel %vm1931_vm14, %v2574_v36, %v2576_v12  ;;  %v4400_v12 = vld [vmem:[%s7128_s7 + $0x148] sm:$0xff] }
 0x76a   : > { %v2585_v2 = vmax.f32 %v2563_v53, %v2578_v13  ;;  %4347 = vmatprep.mubr.msk.f32.mxu1 %vm2610_vm5, %v2586_v8  ;;  %v5179_v53 = vpack.c.bf16 %v4395_v35, %v4394_v27  ;;  %v4396_v8 = vld [vmem:[%s7128_s7 + $0x138] sm:$0xf]  ;;  %v5182_v36 = vpack.c.bf16 %v4400_v12, %v4399_v48  ;;  %v4429_v27 = vld [vmem:[%s7128_s7 + $0x1f0] sm:$0xff]  ;;  %v4434_v48 = vld [vmem:[%s7128_s7 + $0x208] sm:$0xff] }
 0x76b   : > { %v4430_v35 = vld [vmem:[%s7128_s7 + $0x1f8] sm:$0xff]  ;;  %v4435_v12 = vld [vmem:[%s7128_s7 + $0x210] sm:$0xff] }
 0x76c   : > { %2691 = vmatmul.mubr.f32.gmra.mrb[6].mxu1 %v2585_v2  ;;  %v4401_v2 = vld [vmem:[%s7128_s7 + $0x150] sm:$0xff] }
 0x76d   : > { %4598 = vmatprep.mubr.msk.f32.mxu1 %vm5588_vm7, %v5581_v14  ;;  %v5185_v18 = vpack.c.bf16 %v4402_v40, %v4401_v2  ;;  %v4436_v2 = vld [vmem:[%s7128_s7 + $0x218] sm:$0xff]  ;;  %v4437_v40 = vld [vmem:[%s7128_s7 + $0x220] sm:$0xff] }
 0x7b8   : > { %v6614_v50 = vpop.f32.mrb[4].mxu1 }
 0x7b9   : > { %v2689_v26 = vpop.f32.mrb[5].mxu1  ;;  %4599 = vmatmul.mubr.msk.f32.vlgmr.msra.gmra.mrb[8].mxu1 %vm2702_vm0, %v6614_v50  ;;  %v2787_v24 = vrot.slane %v6614_v50, 1  ;;  %v2870_v29 = vrot.slane %v6614_v50, 2  ;;  %v2953_v52 = vrot.slane %v6614_v50, 3  ;;  %v3036_v9 = vrot.slane %v6614_v50, 4 }
 0x7ba   : > { %5141 = vmatpush3.bf16.msra.mxu1 %v5140_v4  ;;  %4611 = vmatprep.mubr.msk.f32.mxu1 %vm5588_vm7, %v5581_v14  ;;  %v3119_v46 = vrot.slane %v6614_v50, 5  ;;  %v3202_v42 = vrot.slane %v6614_v50, 6  ;;  %v3285_v13 = vrot.slane %v6614_v50, 7  ;;  %v4403_v4 = vld [vmem:[%s7128_s7 + $0x160] sm:$0xf]  ;;  %v4029_v50 = vld [vmem:[%s7130_s9 + $0x10] sm:$0xff]  ;;  %v5230_v26 = vpack.c.bf16 %v4028_v45, %v4027_v38 }
 0x7bb   : > { %5142 = vmatprep.subr.bf16.mxu1 %v5587_v7  ;;  %v4442_v38 = vld [vmem:[%s7128_s7 + $0x238] sm:$0xff]  ;;  %v4438_v45 = vld [vmem:[%s7128_s7 + $0x228] sm:$0xf] }
 0x7bc   : > { %5231 = vmatpush3.bf16.msra.mxu0 %v5230_v26 }
 0x7bd   : > { %5232 = vmatprep.subr.bf16.mxu0 %v5587_v7 }
 0x7be   : > { %5144 = vmatpush3.bf16.msra.mxu1 %v5143_v37  ;;  %v4030_v37 = vld [vmem:[%s7130_s9 + $0x18] sm:$0xff] }
 0x7bf   : > { %4609 = vmatprep.subr.mxu1 %v5581_v14  ;;  %v5233_v30 = vpack.c.bf16 %v4030_v37, %v4029_v50  ;;  %v4443_v37 = vld [vmem:[%s7128_s7 + $0x240] sm:$0xff] }
 0x7c1   : > { %5234 = vmatpush3.bf16.msra.mxu0 %v5233_v30  ;;  %v4444_v30 = vld [vmem:[%s7128_s7 + $0x248] sm:$0xff] }
 0x7c2   : > { %4610 = vmatpush3.msk.msra.mxu1 %vm2706_vm6, %v4354_v63  ;;  %v4032_v63 = vld [vmem:[%s7130_s9 + $0x28] sm:$0xff]  ;;  %5235 = vmatprep.subr.bf16.mxu0 %v5587_v7 }
 0x7c3   : > { %4612 = vmatmul.mubr.msk.f32.vlgmr.msra.gmra.mrb[8].mxu1 %vm2702_vm0, %v2787_v24  ;;  %5145 = vmatprep.subr.bf16.mxu1 %v5587_v7  ;;  %v4033_v24 = vld [vmem:[%s7130_s9 + $0x30] sm:$0xff] }
 0x7c4   : > { %5147 = vmatpush3.bf16.msra.mxu1 %v5146_v51  ;;  %4624 = vmatprep.mubr.msk.f32.mxu1 %vm5588_vm7, %v5581_v14  ;;  %v5236_v51 = vpack.c.bf16 %v4032_v63, %v4031_v59  ;;  %v5239_v55 = vpack.c.bf16 %v4034_v6, %v4033_v24  ;;  %v5221_v59 = vpack.c.bf16 %v4444_v30, %v4443_v37  ;;  %v4448_v63 = vld [vmem:[%s7128_s7 + $0x258] sm:$0xff]  ;;  %v4445_v24 = vld [vmem:[%s7128_s7 + $0x250] sm:$0xf] }
 0x7c5   : > { %5148 = vmatprep.subr.bf16.mxu1 %v5587_v7 }
 0x7c6   : > { %5237 = vmatpush3.bf16.msra.mxu0 %v5236_v51  ;;  %v4449_v51 = vld [vmem:[%s7128_s7 + $0x260] sm:$0xff] }
 0x7c7   : > { %5238 = vmatprep.subr.bf16.mxu0 %v5587_v7  ;;  %v5224_v6 = vpack.c.bf16 %v4449_v51, %v4448_v63 }
 0x7c8   : > { %5150 = vmatpush3.bf16.msra.mxu1 %v5149_v60  ;;  %v4035_v60 = vld [vmem:[%s7130_s9 + $0x40] sm:$0xff] }
 0x7c9   : > { %4622 = vmatprep.subr.mxu1 %v5581_v14  ;;  %v5242_v15 = vpack.c.bf16 %v4036_v25, %v4035_v60  ;;  %v4450_v60 = vld [vmem:[%s7128_s7 + $0x268] sm:$0xff]  ;;  %v4451_v25 = vld [vmem:[%s7128_s7 + $0x270] sm:$0xff] }
 0x7ca   : > { %5240 = vmatpush3.bf16.msra.mxu0 %v5239_v55 }
 0x7cb   : > { %5241 = vmatprep.subr.bf16.mxu0 %v5587_v7 }
 0x7cc   : > { %4623 = vmatpush3.msk.msra.mxu1 %vm2706_vm6, %v4361_v54  ;;  %v4037_v54 = vld [vmem:[%s7130_s9 + $0x50] sm:$0xff] }
 0x7cd   : > { %4625 = vmatmul.mubr.msk.f32.vlgmr.msra.gmra.mrb[8].mxu1 %vm2702_vm0, %v2870_v29  ;;  %5151 = vmatprep.subr.bf16.mxu1 %v5587_v7 }
 0x7ce   : > { %5153 = vmatpush3.bf16.msra.mxu1 %v5152_v32  ;;  %4637 = vmatprep.mubr.msk.f32.mxu1 %vm5588_vm7, %v5581_v14  ;;  %v4038_v32 = vld [vmem:[%s7130_s9 + $0x58] sm:$0xff] }
 0x7cf   : > { %5154 = vmatprep.subr.bf16.mxu1 %v5587_v7  ;;  %5243 = vmatpush3.bf16.msra.mxu0 %v5242_v15  ;;  %v5245_v29 = vpack.c.bf16 %v4038_v32, %v4037_v54  ;;  %v5227_v15 = vpack.c.bf16 %v4451_v25, %v4450_v60  ;;  %v4452_v54 = vld [vmem:[%s7128_s7 + $0x278] sm:$0xf] }
 0x7d0   : > { %5244 = vmatprep.subr.bf16.mxu0 %v5587_v7 }
 0x7d2   : > { %5156 = vmatpush3.bf16.msra.mxu1 %v5155_v43  ;;  %v5248_v43 = vpack.c.bf16 %v4040_v61, %v4039_v49  ;;  %v4042_v49 = vld [vmem:[%s7130_s9 + $0x78] sm:$0xff] }
 0x7d3   : > { %4635 = vmatprep.subr.mxu1 %v5581_v14  ;;  %5246 = vmatpush3.bf16.msra.mxu0 %v5245_v29  ;;  %v4041_v29 = vld [vmem:[%s7130_s9 + $0x70] sm:$0xff] }
 0x7d4   : > { %5247 = vmatprep.subr.bf16.mxu0 %v5587_v7  ;;  %v5251_v61 = vpack.c.bf16 %v4042_v49, %v4041_v29 }
 0x7d6   : > { %4636 = vmatpush3.msk.msra.mxu1 %vm2706_vm6, %v4368_v16  ;;  %v5188_v16 = vpack.c.bf16 %v4407_v3, %v4406_v21  ;;  %v4115_v21 = vld [vmem:[%s7132_s11] sm:$0xff]  ;;  %v4116_v3 = vld [vmem:[%s7132_s11 + $0x8] sm:$0xff] }
 0x7d7   : > { %4638 = vmatmul.mubr.msk.f32.vlgmr.msra.gmra.mrb[8].mxu1 %vm2702_vm0, %v2953_v52  ;;  %5157 = vmatprep.subr.bf16.mxu1 %v5587_v7  ;;  %v4409_v52 = vld [vmem:[%s7128_s7 + $0x180] sm:$0xff] }
 0x7d8   : > { %5159 = vmatpush3.bf16.msra.mxu1 %v5158_v39  ;;  %4650 = vmatprep.mubr.msk.f32.mxu1 %vm5588_vm7, %v5581_v14  ;;  %v4408_v39 = vld [vmem:[%s7128_s7 + $0x178] sm:$0xff] }
 0x7d9   : > { %5160 = vmatprep.subr.bf16.mxu1 %v5587_v7  ;;  %5249 = vmatpush3.bf16.msra.mxu0 %v5248_v43  ;;  %v2696_v43 = vld [vmem:[%s7129_s8] sm:$0x1] }
 0x7da   : > { %5250 = vmatprep.subr.bf16.mxu0 %v5587_v7 }
 0x7dc   : > { %5162 = vmatpush3.bf16.msra.mxu1 %v5161_v23  ;;  %v5191_v23 = vpack.c.bf16 %v4409_v52, %v4408_v39 }
 0x7dd   : > { %4648 = vmatprep.subr.mxu1 %v5581_v14  ;;  %5252 = vmatpush3.bf16.msra.mxu0 %v5251_v61 }
 0x7de   : > { %5253 = vmatprep.subr.bf16.mxu0 %v5587_v7 }
 0x7e0   : > { %4649 = vmatpush3.msk.msra.mxu1 %vm2706_vm6, %v4375_v47  ;;  %v4410_v47 = vld [vmem:[%s7128_s7 + $0x188] sm:$0xf] }
 0x7e1   : > { %4651 = vmatmul.mubr.msk.f32.vlgmr.msra.gmra.mrb[8].mxu1 %vm2702_vm0, %v3036_v9  ;;  %5163 = vmatprep.subr.bf16.mxu1 %v5587_v7 }
 0x7e2   : > { %5165 = vmatpush3.bf16.msra.mxu1 %v5164_v34  ;;  %4663 = vmatprep.mubr.msk.f32.mxu1 %vm5588_vm7, %v5581_v14  ;;  %v5194_v34 = vpack.c.bf16 %v4414_v1, %v4413_v31  ;;  %v4118_v31 = vld [vmem:[%s7132_s11 + $0x18] sm:$0xff] }
 0x7e3   : > { %5166 = vmatprep.subr.bf16.mxu1 %v5587_v7 }
 0x7e6   : > { %5168 = vmatpush3.bf16.msra.mxu1 %v5167_v44  ;;  %v5197_v44 = vpack.c.bf16 %v4416_v17, %v4415_v28  ;;  %v4121_v28 = vld [vmem:[%s7132_s11 + $0x30] sm:$0xff] }
 0x7e7   : > { %4661 = vmatprep.subr.mxu1 %v5581_v14 }
 0x7ea   : > { %4662 = vmatpush3.msk.msra.mxu1 %vm2706_vm6, %v4382_v41  ;;  %v4417_v41 = vld [vmem:[%s7128_s7 + $0x1b0] sm:$0xf] }
 0x7eb   : > { %4664 = vmatmul.mubr.msk.f32.vlgmr.msra.gmra.mrb[8].mxu1 %vm2702_vm0, %v3119_v46  ;;  %5169 = vmatprep.subr.bf16.mxu1 %v5587_v7 }
 0x7ec   : > { %5171 = vmatpush3.bf16.msra.mxu1 %v5170_v62  ;;  %4676 = vmatprep.mubr.msk.f32.mxu1 %vm5588_vm7, %v5581_v14  ;;  %v5200_v62 = vpack.c.bf16 %v4421_v5, %v4420_v33  ;;  %v4124_v33 = vld [vmem:[%s7132_s11 + $0x48] sm:$0xff] }
 0x7ed   : > { %5172 = vmatprep.subr.bf16.mxu1 %v5587_v7 }
 0x7f0   : > { %5174 = vmatpush3.bf16.msra.mxu1 %v5173_v0  ;;  %v5203_v0 = vpack.c.bf16 %v4423_v11, %v4422_v22  ;;  %v4127_v22 = vld [vmem:[%s7132_s11 + $0x60] sm:$0xff]  ;;  %v4128_v11 = vld [vmem:[%s7132_s11 + $0x68] sm:$0xff] }
 0x7f1   : > { %4674 = vmatprep.subr.mxu1 %v5581_v14 }
 0x7f4   : > { %4675 = vmatpush3.msk.msra.mxu1 %vm2706_vm6, %v4389_v57  ;;  %v4424_v57 = vld [vmem:[%s7128_s7 + $0x1d8] sm:$0xf] }
 0x7f5   : > { %4677 = vmatmul.mubr.msk.f32.vlgmr.msra.gmra.mrb[8].mxu1 %vm2702_vm0, %v3202_v42  ;;  %5175 = vmatprep.subr.bf16.mxu1 %v5587_v7 }
 0x7f6   : > { %5177 = vmatpush3.bf16.msra.mxu1 %v5176_v10  ;;  %4689 = vmatprep.mubr.msk.f32.mxu1 %vm5588_vm7, %v5581_v14  ;;  %v5206_v10 = vpack.c.bf16 %v4428_v19, %v4427_v58  ;;  %v4129_v58 = vld [vmem:[%s7132_s11 + $0x70] sm:$0xff]  ;;  %v4130_v19 = vld [vmem:[%s7132_s11 + $0x78] sm:$0xff] }
 0x7f7   : > { %5178 = vmatprep.subr.bf16.mxu1 %v5587_v7 }
 0x7fa   : > { %5180 = vmatpush3.bf16.msra.mxu1 %v5179_v53  ;;  %v5209_v53 = vpack.c.bf16 %v4430_v35, %v4429_v27 }
 0x7fb   : > { %4687 = vmatprep.subr.mxu1 %v5581_v14 }
 0x7fe   : > { %4688 = vmatpush3.msk.msra.mxu1 %vm2706_vm6, %v4396_v8  ;;  %v4431_v8 = vld [vmem:[%s7128_s7 + $0x200] sm:$0xf] }
 0x7ff   : > { %4690 = vmatmul.mubr.msk.f32.vlgmr.msra.gmra.mrb[8].mxu1 %vm2702_vm0, %v3285_v13  ;;  %5181 = vmatprep.subr.bf16.mxu1 %v5587_v7 }
 0x800   : > { %5183 = vmatpush3.bf16.msra.mxu1 %v5182_v36  ;;  %4702 = vmatprep.mubr.msk.f32.mxu1 %vm5588_vm7, %v5581_v14  ;;  %v5212_v36 = vpack.c.bf16 %v4435_v12, %v4434_v48 }
 0x801   : > { %5184 = vmatprep.subr.bf16.mxu1 %v5587_v7 }
 0x804   : > { %5186 = vmatpush3.bf16.msra.mxu1 %v5185_v18  ;;  %v5215_v18 = vpack.c.bf16 %v4437_v40, %v4436_v2 }
 0x805   : > { %4700 = vmatprep.subr.mxu1 %v5581_v14 }
 0x808   : > { %4701 = vmatpush3.msk.msra.mxu1 %vm2706_vm6, %v4403_v4  ;;  %v4441_v4 = vld [vmem:[%s7128_s7 + $0x230] sm:$0xff] }
 0x809   : > { %5187 = vmatprep.subr.bf16.mxu1 %v5587_v7  ;;  %v5218_v50 = vpack.c.bf16 %v4442_v38, %v4441_v4 }
 0x83f   : > { %v6849_v56 = vpop.f32.mrb[6].mxu1 }
 0x840   : > { %v2694_v20 = vpop.f32.mrb[7].mxu1  ;;  %4703 = vmatmul.mubr.msk.f32.vlgmr.msra.gmra.mrb[8].mxu1 %vm2702_vm0, %v6849_v56  ;;  %v3451_v9 = vrot.slane %v6849_v56, 1  ;;  %v3534_v46 = vrot.slane %v6849_v56, 2  ;;  %v3617_v42 = vrot.slane %v6849_v56, 3  ;;  %v3700_v13 = vrot.slane %v6849_v56, 4 }
 0x841   : > { %5189 = vmatpush3.bf16.msra.mxu1 %v5188_v16  ;;  %4715 = vmatprep.mubr.msk.f32.mxu1 %vm5588_vm7, %v5581_v14  ;;  %v3783_v26 = vrot.slane %v6849_v56, 5  ;;  %v3866_v55 = vrot.slane %v6849_v56, 6  ;;  %v3949_v32 = vrot.slane %v6849_v56, 7  ;;  %v5254_v56 = vpack.c.bf16 %v4116_v3, %v4115_v21 }
 0x842   : > { %5190 = vmatprep.subr.bf16.mxu1 %v5587_v7 }
 0x845   : > { %5192 = vmatpush3.bf16.msra.mxu1 %v5191_v23  ;;  %v4117_v23 = vld [vmem:[%s7132_s11 + $0x10] sm:$0xff] }
 0x846   : > { %4713 = vmatprep.subr.mxu1 %v5581_v14  ;;  %v5257_v1 = vpack.c.bf16 %v4118_v31, %v4117_v23 }
 0x849   : > { %4714 = vmatpush3.msk.msra.mxu1 %vm2706_vm6, %v4410_v47  ;;  %v4119_v47 = vld [vmem:[%s7132_s11 + $0x20] sm:$0xff] }
 0x84a   : > { %4716 = vmatmul.mubr.msk.f32.vlgmr.msra.gmra.mrb[8].mxu1 %vm2702_vm0, %v3451_v9  ;;  %5193 = vmatprep.subr.bf16.mxu1 %v5587_v7 }
 0x84b   : > { %5195 = vmatpush3.bf16.msra.mxu1 %v5194_v34  ;;  %4728 = vmatprep.mubr.msk.f32.mxu1 %vm5588_vm7, %v5581_v14  ;;  %v4120_v34 = vld [vmem:[%s7132_s11 + $0x28] sm:$0xff] }
 0x84c   : > { %5196 = vmatprep.subr.bf16.mxu1 %v5587_v7  ;;  %v5260_v9 = vpack.c.bf16 %v4120_v34, %v4119_v47 }
 0x84f   : > { %5198 = vmatpush3.bf16.msra.mxu1 %v5197_v44  ;;  %v4123_v44 = vld [vmem:[%s7132_s11 + $0x40] sm:$0xff] }
 0x850   : > { %4726 = vmatprep.subr.mxu1 %v5581_v14  ;;  %v5266_v5 = vpack.c.bf16 %v4124_v33, %v4123_v44 }
 0x853   : > { %4727 = vmatpush3.msk.msra.mxu1 %vm2706_vm6, %v4417_v41  ;;  %v4125_v41 = vld [vmem:[%s7132_s11 + $0x50] sm:$0xff] }
 0x854   : > { %4729 = vmatmul.mubr.msk.f32.vlgmr.msra.gmra.mrb[8].mxu1 %vm2702_vm0, %v3534_v46  ;;  %5199 = vmatprep.subr.bf16.mxu1 %v5587_v7 }
 0x855   : > { %5201 = vmatpush3.bf16.msra.mxu1 %v5200_v62  ;;  %4741 = vmatprep.mubr.msk.f32.mxu1 %vm5588_vm7, %v5581_v14  ;;  %v4126_v62 = vld [vmem:[%s7132_s11 + $0x58] sm:$0xff] }
 0x856   : > { %5202 = vmatprep.subr.bf16.mxu1 %v5587_v7  ;;  %v5269_v46 = vpack.c.bf16 %v4126_v62, %v4125_v41 }
 0x859   : > { %5204 = vmatpush3.bf16.msra.mxu1 %v5203_v0  ;;  %v5272_v0 = vpack.c.bf16 %v4128_v11, %v4127_v22 }
 0x85a   : > { %4739 = vmatprep.subr.mxu1 %v5581_v14 }
 0x85d   : > { %4740 = vmatpush3.msk.msra.mxu1 %vm2706_vm6, %v4424_v57  ;;  %v5275_v57 = vpack.c.bf16 %v4130_v19, %v4129_v58 }
 0x85e   : > { %4742 = vmatmul.mubr.msk.f32.vlgmr.msra.gmra.mrb[8].mxu1 %vm2702_vm0, %v3617_v42  ;;  %5205 = vmatprep.subr.bf16.mxu1 %v5587_v7 }
 0x85f   : > { %5207 = vmatpush3.bf16.msra.mxu1 %v5206_v10  ;;  %4754 = vmatprep.mubr.msk.f32.mxu1 %vm5588_vm7, %v5581_v14  ;;  %v4043_v10 = vld [vmem:[%s7131_s10] sm:$0x1] }
 0x860   : > { %5208 = vmatprep.subr.bf16.mxu1 %v5587_v7 }
 0x863   : > { %5210 = vmatpush3.bf16.msra.mxu1 %v5209_v53 }
 0x864   : > { %4752 = vmatprep.subr.mxu1 %v5581_v14 }
 0x867   : > { %4753 = vmatpush3.msk.msra.mxu1 %vm2706_vm6, %v4431_v8 }
 0x868   : > { %4755 = vmatmul.mubr.msk.f32.vlgmr.msra.gmra.mrb[8].mxu1 %vm2702_vm0, %v3700_v13  ;;  %5211 = vmatprep.subr.bf16.mxu1 %v5587_v7 }
 0x869   : > { %5213 = vmatpush3.bf16.msra.mxu1 %v5212_v36  ;;  %4767 = vmatprep.mubr.msk.f32.mxu1 %vm5588_vm7, %v5581_v14 }
 0x86a   : > { %5214 = vmatprep.subr.bf16.mxu1 %v5587_v7 }
 0x86d   : > { %5216 = vmatpush3.bf16.msra.mxu1 %v5215_v18 }
 0x86e   : > { %4765 = vmatprep.subr.mxu1 %v5581_v14 }
 0x871   : > { %4766 = vmatpush3.msk.msra.mxu1 %vm2706_vm6, %v4438_v45 }
 0x872   : > { %4768 = vmatmul.mubr.msk.f32.vlgmr.msra.gmra.mrb[8].mxu1 %vm2702_vm0, %v3783_v26  ;;  %5217 = vmatprep.subr.bf16.mxu1 %v5587_v7 }
 0x873   : > { %5219 = vmatpush3.bf16.msra.mxu1 %v5218_v50  ;;  %4780 = vmatprep.mubr.msk.f32.mxu1 %vm5588_vm7, %v5581_v14 }
 0x874   : > { %5220 = vmatprep.subr.bf16.mxu1 %v5587_v7 }
 0x877   : > { %5222 = vmatpush3.bf16.msra.mxu1 %v5221_v59 }
 0x878   : > { %4778 = vmatprep.subr.mxu1 %v5581_v14 }
 0x87b   : > { %4779 = vmatpush3.msk.msra.mxu1 %vm2706_vm6, %v4445_v24 }
 0x87c   : > { %4781 = vmatmul.mubr.msk.f32.vlgmr.msra.gmra.mrb[8].mxu1 %vm2702_vm0, %v3866_v55  ;;  %5223 = vmatprep.subr.bf16.mxu1 %v5587_v7 }
 0x87d   : > { %5225 = vmatpush3.bf16.msra.mxu1 %v5224_v6  ;;  %4793 = vmatprep.mubr.msk.f32.mxu1 %vm5588_vm7, %v5581_v14 }
 0x87e   : > { %5226 = vmatprep.subr.bf16.mxu1 %v5587_v7 }
 0x881   : > { %5228 = vmatpush3.bf16.msra.mxu1 %v5227_v15 }
 0x882   : > { %4791 = vmatprep.subr.mxu1 %v5581_v14 }
 0x885   : > { %4792 = vmatpush3.msk.msra.mxu1 %vm2706_vm6, %v4452_v54 }
 0x886   : > { %4794 = vmatmul.mubr.msk.f32.vlgmr.msra.gmra.mrb[8].mxu1 %vm2702_vm0, %v3949_v32 }
 0x959   : > { %v4021_v16 = vpop.f32.mrb[8].mxu1 }
 0x95a   : > { %v5277_v39 = vadd.f32 %v4021_v16, %v2696_v43  ;;  %v4795_v52 = vpop.f32.mrb[9].mxu1 }
 0x95c   : > { %v4026_v20 = vmax.f32 %v5277_v39, 0.0 }
 0x95e   : > { %4829 = vmatmul.mubr.f32.vlgmr.msra.gmra.mrb[2].mxu0 %v4026_v20 }
 0x95f   : > { %5255 = vmatpush3.bf16.msra.mxu0 %v5254_v56  ;;  %4863 = vmatprep.mubr.msk.f32.mxu0 %vm5588_vm7, %v5581_v14  ;;  %v4122_v14 = vld [vmem:[%s7132_s11 + $0x38] sm:$0xff] }
 0x960   : > { %5256 = vmatprep.subr.bf16.mxu0 %v5587_v7  ;;  %v5263_v17 = vpack.c.bf16 %v4122_v14, %v4121_v28 }
 0x963   : > { %5258 = vmatpush3.bf16.msra.mxu0 %v5257_v1 }
 0x964   : > { %5259 = vmatprep.subr.bf16.mxu0 %v5587_v7 }
 0x967   : > { %5261 = vmatpush3.bf16.msra.mxu0 %v5260_v9 }
 0x968   : > { %5262 = vmatprep.subr.bf16.mxu0 %v5587_v7 }
 0x96b   : > { %5264 = vmatpush3.bf16.msra.mxu0 %v5263_v17 }
 0x96c   : > { %5265 = vmatprep.subr.bf16.mxu0 %v5587_v7 }
 0x96f   : > { %5267 = vmatpush3.bf16.msra.mxu0 %v5266_v5 }
 0x970   : > { %5268 = vmatprep.subr.bf16.mxu0 %v5587_v7 }
 0x973   : > { %5270 = vmatpush3.bf16.msra.mxu0 %v5269_v46 }
 0x974   : > { %5271 = vmatprep.subr.bf16.mxu0 %v5587_v7 }
 0x977   : > { %5273 = vmatpush3.bf16.msra.mxu0 %v5272_v0 }
 0x978   : > { %5274 = vmatprep.subr.bf16.mxu0 %v5587_v7  ;;  %v4131_v7 = vld [vmem:[%s7133_s12] sm:$0x1] }
 0x97b   : > { %5276 = vmatpush3.bf16.msra.mxu0 %v5275_v57 }
 0xa31   : > { %v4110_v42 = vpop.f32.mrb[2].mxu0 }
 0xa32   : > { %v4111_v27 = vadd.f32 %v4110_v42, %v4043_v10  ;;  %v4830_v35 = vpop.f32.mrb[3].mxu0 }
 0xa34   : > { %v4114_v53 = vmax.f32 %v4111_v27, 0.0 }
 0xa36   : > { %4864 = vmatmul.mubr.f32.vlgmr.msra.gmra.mrb[4].mxu0 %v4114_v53 }
 0xb09   : > { %v4198_v48 = vpop.f32.mrb[4].mxu0 }
 0xb0a   : > { %v4199_v12 = vadd.f32 %v4198_v48, %v4131_v7  ;;  %v4865_v8 = vpop.f32.mrb[5].mxu0 }
 0xb0c   : > { %4202 = vst [vmem:[%s445_s24] sm:$0x1] %v4199_v12 }
 0xb0d   : > { %5505 = shalt.err (!%p5502_p7)
}
 0xb0e   : > { %s5506_s15 = scalar_lea.hbm %s7079_s30, 16  ;;  %s5510_s22 = scalar_lea.hbm %s7134_s13, 32 }
 0xb0f   : > { %p5507_p8 = scmp.ne.s32.totalorder %s7079_s30, %s5506_s15  ;;  %p5511_p1 = scmp.lt.u32.totalorder %s7079_s30, %s7134_s13 }
 0xb10   : > { %p5512_p0 = scmp.lt.u32.totalorder %s5510_s22, %s5506_s15  ;;  %p5514_p6 = scmp.lt.u32.totalorder %s5506_s15, %s7079_s30 }
 0xb11   : > { %p5508_p11 = pnand %p5507_p8, %p7151_p9 }
 0xb12   : > { %p5513_p5 = por %p5512_p0, %p5511_p1 }
 0xb13   : > { %p5509_p13 = pneg %p5508_p11 }
 0xb14   : > { %p5515_p10 = por %p5514_p6, %p5513_p5 }
 0xb16   : > { %p5516_p12 = pnand %p5515_p10, %p5509_p13 }
 0xb18   : > { %5519 = shalt.err (!%p5516_p12)
}
 0xb19   : > { %5350 = dma.vmem_to_hbm [thread:$0]  (%p7151_p9), %s7081_s14, 16, %s7079_s30, %s4204_s20  }
 0xb1a PF: > { %p5362_p2 = scmp.ge.s32.totalorder %s5558_s28, 2  ;;  %s4228_s23 = sand.u32 1, %s5546_s25  }
 0xb1b   : > { %p7152_p3 = scmp.ne.s32.totalorder %s7145_s19, 0  ;;  %s4229_s27 = scalar_lea.sflag [#allocation4], %s4228_s23 }
 0xb1d   : > { %p5357_p4 = pnand %p5362_p2, %p7152_p3 }
 0xb1f   : > { %5541 = dma.done.wait (!%p5357_p4), %s4229_s27, 16  }
 0xb20   : > { %5543 = vsyncadd (!%p5357_p4), %s4229_s27, 4294967280  ;;  %s7153_s28 = sld [smem:[#allocation9_spill]]  ;;  %s7154_s21 = sld [smem:[#allocation8_spill]] }
 0xb21   : > { %s7155_s27 = sld [smem:[#allocation10_spill]]  ;;  %s7156_s25 = smov %s5550_s26 }
 0xb26   : > { %p24_p7 = scmp.ge.s32.totalorder %s7153_s28, 4   ;;  %s7157_s26 = smov %s7154_s21 }
 0xb28   :  { %26 = sbr.rel (!%p24_p7) target bundleno = 4 (0x4), region = 135 }
 0xb2f   :  { %4233 = vsyncpa [#allocation3], 1 }
 0xb30   :  { %4235 = vsyncpa [#allocation3 + $0x1], 1 }
 0xb31   :  { %4236 = vsyncpa [#allocation4], 1 }
 0xb32   :  { %4238 = vsyncpa [#allocation4 + $0x1], 1 }

</bundles_post_ra>
